<compile_context>
chip_gen: v7x
topology: tpu7x:2x2x1
jax: 0.10.0
libtpu: 0.0.40
codegen_flags: <defaults>
</compile_context>

<pallas_src>
import functools
import math

import jax
import jax.numpy as jnp
from jax.experimental import pallas as pl
from jax.experimental.pallas import tpu as pltpu

LANE = 128      # vreg lane width
SUBLANE = 8     # f32 sublane count
NEG_INF = -1e30


def _round_up(x, m):
    return (x + m - 1) // m * m


def _size_bytes(shape, dtype):
    return math.prod(shape) * jnp.dtype(dtype).itemsize


def _default_max_block_b():
    # v5e MXU is 4x128^2 -> BB=128 fills it; v6e/v7x MXU is 2x256^2 -> allow BB up to 256.
    try:
        kind = jax.devices()[0].device_kind.lower()
    except Exception:
        return 128
    return 128 if "v5" in kind else 256


def batch_blocking(batch, max_block_b=None):
    if max_block_b is None:
        max_block_b = _default_max_block_b()
    bb = min(max_block_b, _round_up(batch, SUBLANE))
    return bb, _round_up(batch, bb)


# --------------------------------------------------------------------------------------
# Kernel
# --------------------------------------------------------------------------------------
def attn_decoder_kernel(
    # inputs (activations f32, big matrices bf16)
    inp_ref, hid_ref, cell_ref, enc_ref,
    emb_w_ref, emb_b_ref,
    attn_we_ref, attn_wh_ref, attn_b_ref,
    comb_we_ref, comb_wa_ref, comb_b_ref,
    lstm_wih_ref, lstm_whh_ref, lstm_b_ref,
    out_w_ref, out_b_ref,
    # outputs
    y_ref, new_h_ref, new_c_ref, attn_out_ref,
    *, n_layers, hid_dim_p,
):
    f32 = jnp.float32
    wdt = emb_w_ref.dtype           # matmul operand dtype (bf16)
    H = hid_dim_p

    # embedding = Linear(out_dim -> hid); dropout == identity (eval mode).
    # bf16 x bf16 MXU dot, f32 accumulation.
    x16 = inp_ref[...].astype(wdt)                                          # (BB, Op)
    embedded = (jnp.dot(x16, emb_w_ref[...], preferred_element_type=f32)
                + emb_b_ref[...])                                           # (BB, Hp) f32
    emb16 = embedded.astype(wdt)

    # attn_weights = softmax(attn(cat(embedded, hidden[0])), dim=1)
    # (padded L columns carry a -1e30 bias so they get exactly 0 probability)
    h016 = hid_ref[0].astype(wdt)                                           # (BB, Hp)
    logits = (jnp.dot(emb16, attn_we_ref[...], preferred_element_type=f32)
              + jnp.dot(h016, attn_wh_ref[...], preferred_element_type=f32)
              + attn_b_ref[...])                                            # (BB, Lp) f32
    logits = logits - jnp.max(logits, axis=1, keepdims=True)
    e = jnp.exp(logits)
    denom = jnp.sum(e, axis=1, keepdims=True)
    attn_w = e * pl.reciprocal(denom, approx=True)                          # (BB, Lp) f32
    attn_out_ref[...] = attn_w

    # attn_applied = bmm((BB,1,Lp), (BB,Lp,Hp)) as ONE batched bf16 MXU contraction.
    attn_applied = jnp.einsum(
        "bql,blh->bqh", attn_w[:, None, :].astype(wdt), enc_ref[...],
        preferred_element_type=f32)[:, 0, :]                                # (BB, Hp) f32

    # attn_combine(cat(embedded, attn_applied)) then ReLU.
    comb = (jnp.dot(emb16, comb_we_ref[...], preferred_element_type=f32)
            + jnp.dot(attn_applied.astype(wdt), comb_wa_ref[...],
                      preferred_element_type=f32)
            + comb_b_ref[...])
    layer_in = jnp.maximum(comb, 0.0)                                       # (BB, Hp) f32

    # nn.LSTM with seq_len == 1, PyTorch gate order [i, f, g, o]; Hp is lane-aligned so the
    # gate slices fall on vreg boundaries.  Gate math stays f32 (v5e-safe).
    for l in range(n_layers):
        h_prev = hid_ref[l]                                                 # (BB, Hp) f32
        c_prev = cell_ref[l]                                                # (BB, Hp) f32
        gates = (jnp.dot(layer_in.astype(wdt), lstm_wih_ref[l],
                         preferred_element_type=f32)
                 + jnp.dot(h_prev.astype(wdt), lstm_whh_ref[l],
                           preferred_element_type=f32)
                 + lstm_b_ref[l])                                           # (BB, 4*Hp) f32
        if_act = jax.nn.sigmoid(gates[:, 0:2 * H])        # fused [i, f] slab: one EUP pass
        i_g = if_act[:, 0:H]
        f_g = if_act[:, H:2 * H]
        g_g = jnp.tanh(gates[:, 2 * H:3 * H])
        o_g = jax.nn.sigmoid(gates[:, 3 * H:4 * H])
        c_new = f_g * c_prev + i_g * g_g
        h_new = o_g * jnp.tanh(c_new)
        new_h_ref[l] = h_new
        new_c_ref[l] = c_new
        layer_in = h_new

    # out projection + ReLU
    y = (jnp.dot(layer_in.astype(wdt), out_w_ref[...], preferred_element_type=f32)
         + out_b_ref[...])
    y_ref[...] = jnp.maximum(y, 0.0)


# --------------------------------------------------------------------------------------
# Wrapper
# --------------------------------------------------------------------------------------
def prepare_encoder(prepared, encoder_outputs, max_block_b=None):
    """One-time pad + bf16 cast of encoder_outputs (hoist this out of the decode loop)."""
    B = encoder_outputs.shape[0]
    _, B_pad = batch_blocking(B, max_block_b)
    Hp = prepared["emb_w"].shape[1]
    Lp = prepared["attn_we"].shape[1]
    wdt = prepared["emb_w"].dtype
    pads = [(0, B_pad - encoder_outputs.shape[0]),
            (0, Lp - encoder_outputs.shape[1]),
            (0, Hp - encoder_outputs.shape[2])]
    return jnp.pad(encoder_outputs, pads).astype(wdt)


def attn_decoder_forward(prepared, inp, hidden, cell, encoder_outputs, *,
                         single_buffer_weights=True, max_block_b=None):
    out_dim, hid_dim, max_length = prepared["dims"]
    n_layers, B, _ = hidden.shape
    Op, Hp = prepared["emb_w"].shape
    Lp = prepared["attn_we"].shape[1]
    wdt = prepared["emb_w"].dtype

    BB, B_pad = batch_blocking(B, max_block_b)
    nb = B_pad // BB

    def pad_to(x, shape):
        return jnp.pad(x, [(0, t - s) for s, t in zip(x.shape, shape)])

    # Per-step state pads are small; the big encoder pad/cast is done once in
    # prepare_encoder and skipped here when the input is already prepared.
    inp_p = pad_to(inp, (B_pad, Op))
    hidden_p = pad_to(hidden, (n_layers, B_pad, Hp))
    cell_p = pad_to(cell, (n_layers, B_pad, Hp))
    if encoder_outputs.shape == (B_pad, Lp, Hp) and encoder_outputs.dtype == wdt:
        enc_p = encoder_outputs
    else:
        enc_p = pad_to(encoder_outputs, (B_pad, Lp, Hp)).astype(wdt)

    args = (
        inp_p, hidden_p, cell_p, enc_p,
        prepared["emb_w"], prepared["emb_b"],
        prepared["attn_we"], prepared["attn_wh"], prepared["attn_b"],
        prepared["comb_we"], prepared["comb_wa"], prepared["comb_b"],
        prepared["lstm_wih"], prepared["lstm_whh"], prepared["lstm_b"],
        prepared["out_w"], prepared["out_b"],
    )

    # Weights: constant index_map -> DMA'd once and VMEM-resident across batch blocks.
    # Single-buffer them (the second pipeline buffer is pure waste for constant blocks).
    def const_spec(shape):
        nd = len(shape)
        idx = lambda i, _nd=nd: (0,) * _nd
        if single_buffer_weights and hasattr(pl, "Buffered"):
            try:
                return pl.BlockSpec(shape, idx, pipeline_mode=pl.Buffered(1))
            except TypeError:
                pass
        return pl.BlockSpec(shape, idx)

    in_specs = [
        pl.BlockSpec((BB, Op), lambda i: (i, 0)),
        pl.BlockSpec((n_layers, BB, Hp), lambda i: (0, i, 0)),
        pl.BlockSpec((n_layers, BB, Hp), lambda i: (0, i, 0)),
        pl.BlockSpec((BB, Lp, Hp), lambda i: (i, 0, 0)),
    ] + [const_spec(a.shape) for a in args[4:]]

    out_shapes = (
        jax.ShapeDtypeStruct((B_pad, Op), jnp.float32),
        jax.ShapeDtypeStruct((n_layers, B_pad, Hp), jnp.float32),
        jax.ShapeDtypeStruct((n_layers, B_pad, Hp), jnp.float32),
        jax.ShapeDtypeStruct((B_pad, Lp), jnp.float32),
    )
    out_specs = (
        pl.BlockSpec((BB, Op), lambda i: (i, 0)),
        pl.BlockSpec((n_layers, BB, Hp), lambda i: (0, i, 0)),
        pl.BlockSpec((n_layers, BB, Hp), lambda i: (0, i, 0)),
        pl.BlockSpec((BB, Lp), lambda i: (i, 0)),
    )

    # Explicit scoped-VMEM limit sized from the actual block footprint.
    w_bufs = 1 if single_buffer_weights else 2
    w_bytes = sum(_size_bytes(a.shape, a.dtype) for a in args[4:]) * w_bufs
    act_bytes = (_size_bytes((BB, Op), jnp.float32)
                 + 2 * _size_bytes((n_layers, BB, Hp), jnp.float32)
                 + _size_bytes((BB, Lp, Hp), wdt))
    out_bytes = (_size_bytes((BB, Op), jnp.float32)
                 + 2 * _size_bytes((n_layers, BB, Hp), jnp.float32)
                 + _size_bytes((BB, Lp), jnp.float32))
    need = w_bytes + 2 * (act_bytes + out_bytes)
    vmem_limit = int(min(64 << 20, max(32 << 20, 2 * need)))

    kernel = functools.partial(attn_decoder_kernel, n_layers=n_layers, hid_dim_p=Hp)

    y, new_h, new_c, attn_w = pl.pallas_call(
        kernel,
        grid=(nb,),
        in_specs=in_specs,
        out_specs=out_specs,
        out_shape=out_shapes,
        compiler_params=pltpu.CompilerParams(
            dimension_semantics=("parallel",),
            vmem_limit_bytes=vmem_limit),
    )(*args)

    # Slice padding off; PyTorch returns attn_weights with the unsqueeze(1): (B, 1, L)
    y = y[:B, :out_dim]
    new_h = new_h[:, :B, :hid_dim]
    new_c = new_c[:, :B, :hid_dim]
    attn_w = attn_w[:B, :max_length][:, None, :]
    return y, new_h, new_c, attn_w


# --------------------------------------------------------------------------------------
# Parameters
# --------------------------------------------------------------------------------------
def init_params(key, out_dim, hid_dim, max_length, n_layers):
    H = hid_dim
    ks = jax.random.split(key, 12)

    def uni(k, shape, fan_in):
        bound = 1.0 / jnp.sqrt(jnp.float32(fan_in))
        return jax.random.uniform(k, shape, jnp.float32, -bound, bound)

    # Linear weights stored pre-transposed: (in_features, out_features)
    emb_w = uni(ks[0], (out_dim, H), out_dim)
    emb_b = uni(ks[1], (1, H), out_dim)
    attn_w = uni(ks[2], (2 * H, max_length), 2 * H)
    attn_b = uni(ks[3], (1, max_length), 2 * H)
    comb_w = uni(ks[4], (2 * H, H), 2 * H)
    comb_b = uni(ks[5], (1, H), 2 * H)
    lstm_wih = uni(ks[6], (n_layers, H, 4 * H), H)
    lstm_whh = uni(ks[7], (n_layers, H, 4 * H), H)
    lstm_bih = uni(ks[8], (n_layers, 1, 4 * H), H)
    lstm_bhh = uni(ks[9], (n_layers, 1, 4 * H), H)
    out_w = uni(ks[10], (H, out_dim), H)
    out_b = uni(ks[11], (1, out_dim), H)

    return dict(
        emb_w=emb_w, emb_b=emb_b,
        attn_we=attn_w[:H, :], attn_wh=attn_w[H:, :], attn_b=attn_b,
        comb_we=comb_w[:H, :], comb_wa=comb_w[H:, :], comb_b=comb_b,
        lstm_wih=lstm_wih, lstm_whh=lstm_whh, lstm_bih=lstm_bih, lstm_bhh=lstm_bhh,
        out_w=out_w, out_b=out_b,
    )


def prepare_params(params, out_dim, hid_dim, max_length, n_layers,
                   weight_dtype=jnp.bfloat16):
    """Pad lane dims to 128 multiples, cast big matrices to `weight_dtype`, pre-sum the
    LSTM biases, and pad LSTM gate blocks per-gate so in-kernel gate slices are aligned."""
    H, L, O = hid_dim, max_length, out_dim
    Hp, Lp, Op = _round_up(H, LANE), _round_up(L, LANE), _round_up(O, LANE)

    def pad_mat(w, rows, cols):
        return jnp.pad(w, ((0, rows - w.shape[0]), (0, cols - w.shape[1]))).astype(weight_dtype)

    def pad_bias(b, cols, fill=0.0):
        return jnp.pad(b, ((0, 0), (0, cols - b.shape[1])), constant_values=fill)

    def pad_lstm_gates(w):  # (n_layers, H, 4H) -> (n_layers, Hp, 4Hp), per-gate column pad
        gates = jnp.split(w, 4, axis=2)
        gates = [jnp.pad(g, ((0, 0), (0, Hp - g.shape[1]), (0, Hp - g.shape[2])))
                 for g in gates]
        return jnp.concatenate(gates, axis=2).astype(weight_dtype)

    def pad_lstm_bias(b):   # (n_layers, 1, 4H) -> (n_layers, 1, 4Hp), stays f32
        gates = jnp.split(b, 4, axis=2)
        gates = [jnp.pad(g, ((0, 0), (0, 0), (0, Hp - g.shape[2]))) for g in gates]
        return jnp.concatenate(gates, axis=2)

    lstm_b = params["lstm_bih"] + params["lstm_bhh"]     # pre-summed biases (f32)

    return dict(
        dims=(O, H, L),
        emb_w=pad_mat(params["emb_w"], Op, Hp),
        emb_b=pad_bias(params["emb_b"], Hp),
        attn_we=pad_mat(params["attn_we"], Hp, Lp),
        attn_wh=pad_mat(params["attn_wh"], Hp, Lp),
        # padded attention columns get a huge negative bias -> softmax weight exactly 0
        attn_b=pad_bias(params["attn_b"], Lp, fill=NEG_INF),
        comb_we=pad_mat(params["comb_we"], Hp, Hp),
        comb_wa=pad_mat(params["comb_wa"], Hp, Hp),
        comb_b=pad_bias(params["comb_b"], Hp),
        lstm_wih=pad_lstm_gates(params["lstm_wih"]),
        lstm_whh=pad_lstm_gates(params["lstm_whh"]),
        lstm_b=pad_lstm_bias(lstm_b),
        out_w=pad_mat(params["out_w"], Hp, Op),
        out_b=pad_bias(params["out_b"], Op),
    )


# --------------------------------------------------------------------------------------
# Pure-JAX reference (mirrors the kernel's bf16-operand / f32-accumulate matmul math)
# --------------------------------------------------------------------------------------
def reference_forward(params, inp, hidden, cell, enc, weight_dtype=jnp.bfloat16):
    f32 = jnp.float32

    def mm(a, w):
        return jnp.dot(a.astype(weight_dtype), w.astype(weight_dtype),
                       preferred_element_type=f32)

    embedded = mm(inp, params["emb_w"]) + params["emb_b"]
    logits = (mm(embedded, params["attn_we"]) + mm(hidden[0], params["attn_wh"])
              + params["attn_b"])
    attn_w = jax.nn.softmax(logits, axis=1)
    attn_applied = jnp.einsum("bl,blh->bh", attn_w.astype(weight_dtype),
                              enc.astype(weight_dtype), preferred_element_type=f32)
    x = jax.nn.relu(mm(embedded, params["comb_we"]) + mm(attn_applied, params["comb_wa"])
                    + params["comb_b"])
    new_h, new_c = [], []
    for l in range(hidden.shape[0]):
        gates = (mm(x, params["lstm_wih"][l]) + mm(hidden[l], params["lstm_whh"][l])
                 + params["lstm_bih"][l] + params["lstm_bhh"][l])
        i, f, g, o = jnp.split(gates, 4, axis=1)
        c = jax.nn.sigmoid(f) * cell[l] + jax.nn.sigmoid(i) * jnp.tanh(g)
        h = jax.nn.sigmoid(o) * jnp.tanh(c)
        new_h.append(h)
        new_c.append(c)
        x = h
    y = jax.nn.relu(mm(x, params["out_w"]) + params["out_b"])
    return y, jnp.stack(new_h), jnp.stack(new_c), attn_w[:, None, :]


if __name__ == "__main__":
    B, out_dim, hid_dim, max_length, n_layers = 4, 16, 32, 8, 2

    key = jax.random.PRNGKey(0)
    k_par, k_in, k_h, k_c, k_enc = jax.random.split(key, 5)

    params = init_params(k_par, out_dim, hid_dim, max_length, n_layers)
    inp = jax.random.normal(k_in, (B, out_dim), jnp.float32)
    hidden = jax.random.normal(k_h, (n_layers, B, hid_dim), jnp.float32)
    cell = jax.random.normal(k_c, (n_layers, B, hid_dim), jnp.float32)
    encoder_outputs = jax.random.normal(k_enc, (B, max_length, hid_dim), jnp.float32)

    weight_dtype = jnp.bfloat16
    prepared = prepare_params(params, out_dim, hid_dim, max_length, n_layers,
                              weight_dtype=weight_dtype)
    # Hoisted out of the (hypothetical) decode loop: pad + cast the encoder once.
    enc_pre = prepare_encoder(prepared, encoder_outputs)

    def run(single_buffer):
        fwd = jax.jit(functools.partial(attn_decoder_forward, prepared,
                                        single_buffer_weights=single_buffer))
        return jax.block_until_ready(fwd(inp, hidden, cell, enc_pre))

    try:
        outs = run(True)
    except Exception:
        # Fallback if this jax build rejects pipeline_mode=pl.Buffered(1) on pallas_call.
        outs = run(False)

    # Reference uses identical bf16 matmul operands / f32 accumulation; remaining deltas are
    # the approximate reciprocal in the kernel softmax and accumulation order.
    refs = reference_forward(params, inp, hidden, cell, encoder_outputs,
                             weight_dtype=weight_dtype)

    for o, r in zip(outs, refs):
        assert o.shape == r.shape, (o.shape, r.shape)
        err = float(jnp.max(jnp.abs(o - r)))
        assert jnp.allclose(o, r, atol=5e-3, rtol=5e-3), err

    print("KERNEL_OK")
</pallas_src>

<mosaic_0001>
module attributes {stable_mosaic.version = 11 : i64} {
  func.func @attn_decoder_kernel(%arg0: i32, %arg1: memref<8x128xf32, #tpu.memory_space<vmem>>, %arg2: memref<2x8x128xf32, #tpu.memory_space<vmem>>, %arg3: memref<2x8x128xf32, #tpu.memory_space<vmem>>, %arg4: memref<8x128x128xbf16, #tpu.memory_space<vmem>>, %arg5: memref<128x128xbf16, #tpu.memory_space<vmem>>, %arg6: memref<1x128xf32, #tpu.memory_space<vmem>>, %arg7: memref<128x128xbf16, #tpu.memory_space<vmem>>, %arg8: memref<128x128xbf16, #tpu.memory_space<vmem>>, %arg9: memref<1x128xf32, #tpu.memory_space<vmem>>, %arg10: memref<128x128xbf16, #tpu.memory_space<vmem>>, %arg11: memref<128x128xbf16, #tpu.memory_space<vmem>>, %arg12: memref<1x128xf32, #tpu.memory_space<vmem>>, %arg13: memref<2x128x512xbf16, #tpu.memory_space<vmem>>, %arg14: memref<2x128x512xbf16, #tpu.memory_space<vmem>>, %arg15: memref<2x1x512xf32, #tpu.memory_space<vmem>>, %arg16: memref<128x128xbf16, #tpu.memory_space<vmem>>, %arg17: memref<1x128xf32, #tpu.memory_space<vmem>>, %arg18: memref<8x128xf32, #tpu.memory_space<vmem>>, %arg19: memref<2x8x128xf32, #tpu.memory_space<vmem>>, %arg20: memref<2x8x128xf32, #tpu.memory_space<vmem>>, %arg21: memref<8x128xf32, #tpu.memory_space<vmem>>) attributes {dimension_semantics = [#tpu.dimension_semantics<parallel>], iteration_bounds = array<i64: 1>, scalar_prefetch = 0 : i64, scratch_operands = 0 : i64, tpu.core_type = #tpu.core_type<tc>, window_params = [{transform_indices = @transform_0, window_bounds = array<i64: 8, 128>}, {transform_indices = @transform_1, window_bounds = array<i64: 2, 8, 128>}, {transform_indices = @transform_2, window_bounds = array<i64: 2, 8, 128>}, {transform_indices = @transform_3, window_bounds = array<i64: 8, 128, 128>}, {pipeline_mode = #tpu.pipeline_mode<synchronous>, transform_indices = @transform_4, window_bounds = array<i64: 128, 128>}, {pipeline_mode = #tpu.pipeline_mode<synchronous>, transform_indices = @transform_5, window_bounds = array<i64: 1, 128>}, {pipeline_mode = #tpu.pipeline_mode<synchronous>, transform_indices = @transform_6, window_bounds = array<i64: 128, 128>}, {pipeline_mode = #tpu.pipeline_mode<synchronous>, transform_indices = @transform_7, window_bounds = array<i64: 128, 128>}, {pipeline_mode = #tpu.pipeline_mode<synchronous>, transform_indices = @transform_8, window_bounds = array<i64: 1, 128>}, {pipeline_mode = #tpu.pipeline_mode<synchronous>, transform_indices = @transform_9, window_bounds = array<i64: 128, 128>}, {pipeline_mode = #tpu.pipeline_mode<synchronous>, transform_indices = @transform_10, window_bounds = array<i64: 128, 128>}, {pipeline_mode = #tpu.pipeline_mode<synchronous>, transform_indices = @transform_11, window_bounds = array<i64: 1, 128>}, {pipeline_mode = #tpu.pipeline_mode<synchronous>, transform_indices = @transform_12, window_bounds = array<i64: 2, 128, 512>}, {pipeline_mode = #tpu.pipeline_mode<synchronous>, transform_indices = @transform_13, window_bounds = array<i64: 2, 128, 512>}, {pipeline_mode = #tpu.pipeline_mode<synchronous>, transform_indices = @transform_14, window_bounds = array<i64: 2, 1, 512>}, {pipeline_mode = #tpu.pipeline_mode<synchronous>, transform_indices = @transform_15, window_bounds = array<i64: 128, 128>}, {pipeline_mode = #tpu.pipeline_mode<synchronous>, transform_indices = @transform_16, window_bounds = array<i64: 1, 128>}, {transform_indices = @transform_17, window_bounds = array<i64: 8, 128>}, {transform_indices = @transform_18, window_bounds = array<i64: 2, 8, 128>}, {transform_indices = @transform_19, window_bounds = array<i64: 2, 8, 128>}, {transform_indices = @transform_20, window_bounds = array<i64: 8, 128>}]} {
    %c0 = arith.constant 0 : index
    %c0_0 = arith.constant 0 : index
    %0 = vector.load %arg1[%c0, %c0_0] : memref<8x128xf32, #tpu.memory_space<vmem>>, vector<8x128xf32>
    %1 = arith.truncf %0 : vector<8x128xf32> to vector<8x128xbf16>
    %c0_1 = arith.constant 0 : index
    %c0_2 = arith.constant 0 : index
    %2 = vector.load %arg5[%c0_1, %c0_2] : memref<128x128xbf16, #tpu.memory_space<vmem>>, vector<128x128xbf16>
    %cst = arith.constant dense<0.000000e+00> : vector<8x128xf32>
    %3 = tpu.matmul %1, %2, %cst {dimension_numbers = #tpu.dot_dimension_numbers<[1], [0], [0], [1], [0, 0, 1, 1], [], []>} : vector<8x128xbf16>, vector<128x128xbf16>, vector<8x128xf32> -> vector<8x128xf32>
    %c0_3 = arith.constant 0 : index
    %c0_4 = arith.constant 0 : index
    %4 = vector.load %arg6[%c0_3, %c0_4] : memref<1x128xf32, #tpu.memory_space<vmem>>, vector<1x128xf32>
    %5 = vector.broadcast %4 : vector<1x128xf32> to vector<8x128xf32>
    %6 = arith.addf %3, %5 : vector<8x128xf32>
    %7 = arith.truncf %6 : vector<8x128xf32> to vector<8x128xbf16>
    %c0_5 = arith.constant 0 : index
    %c0_6 = arith.constant 0 : index
    %c0_7 = arith.constant 0 : index
    %8 = vector.load %arg2[%c0_5, %c0_6, %c0_7] : memref<2x8x128xf32, #tpu.memory_space<vmem>>, vector<1x8x128xf32>
    %9 = vector.shape_cast %8 : vector<1x8x128xf32> to vector<8x128xf32>
    %10 = arith.truncf %9 : vector<8x128xf32> to vector<8x128xbf16>
    %c0_8 = arith.constant 0 : index
    %c0_9 = arith.constant 0 : index
    %11 = vector.load %arg7[%c0_8, %c0_9] : memref<128x128xbf16, #tpu.memory_space<vmem>>, vector<128x128xbf16>
    %cst_10 = arith.constant dense<0.000000e+00> : vector<8x128xf32>
    %12 = tpu.matmul %7, %11, %cst_10 {dimension_numbers = #tpu.dot_dimension_numbers<[1], [0], [0], [1], [0, 0, 1, 1], [], []>} : vector<8x128xbf16>, vector<128x128xbf16>, vector<8x128xf32> -> vector<8x128xf32>
    %c0_11 = arith.constant 0 : index
    %c0_12 = arith.constant 0 : index
    %13 = vector.load %arg8[%c0_11, %c0_12] : memref<128x128xbf16, #tpu.memory_space<vmem>>, vector<128x128xbf16>
    %cst_13 = arith.constant dense<0.000000e+00> : vector<8x128xf32>
    %14 = tpu.matmul %10, %13, %cst_13 {dimension_numbers = #tpu.dot_dimension_numbers<[1], [0], [0], [1], [0, 0, 1, 1], [], []>} : vector<8x128xbf16>, vector<128x128xbf16>, vector<8x128xf32> -> vector<8x128xf32>
    %15 = arith.addf %12, %14 : vector<8x128xf32>
    %c0_14 = arith.constant 0 : index
    %c0_15 = arith.constant 0 : index
    %16 = vector.load %arg9[%c0_14, %c0_15] : memref<1x128xf32, #tpu.memory_space<vmem>>, vector<1x128xf32>
    %17 = vector.broadcast %16 : vector<1x128xf32> to vector<8x128xf32>
    %18 = arith.addf %15, %17 : vector<8x128xf32>
    %cst_16 = arith.constant dense<0xFF800000> : vector<8xf32>
    %19 = vector.multi_reduction <maximumf>, %18, %cst_16 [1] : vector<8x128xf32> to vector<8xf32>
    %20 = vector.shape_cast %19 : vector<8xf32> to vector<8x1xf32>
    %21 = vector.broadcast %20 : vector<8x1xf32> to vector<8x128xf32>
    %22 = arith.subf %18, %21 : vector<8x128xf32>
    %23 = math.exp %22 : vector<8x128xf32>
    %cst_17 = arith.constant dense<0.000000e+00> : vector<8xf32>
    %24 = vector.multi_reduction <add>, %23, %cst_17 [1] : vector<8x128xf32> to vector<8xf32>
    %25 = vector.shape_cast %24 : vector<8xf32> to vector<8x1xf32>
    %26 = tpu.reciprocal %25 {approx = true} : vector<8x1xf32> -> vector<8x1xf32>
    %27 = vector.broadcast %26 : vector<8x1xf32> to vector<8x128xf32>
    %28 = arith.mulf %23, %27 : vector<8x128xf32>
    %c0_18 = arith.constant 0 : index
    %c0_19 = arith.constant 0 : index
    %29 = vector.load %arg21[%c0_18, %c0_19] : memref<8x128xf32, #tpu.memory_space<vmem>>, vector<8x128xf32>
    tpu.vector_store %arg21[%c0_18, %c0_19], %28 {strides = array<i32>} : memref<8x128xf32, #tpu.memory_space<vmem>>, vector<8x128xf32>,
    %30 = vector.shape_cast %28 : vector<8x128xf32> to vector<8x1x128xf32>
    %31 = arith.truncf %30 : vector<8x1x128xf32> to vector<8x1x128xbf16>
    %c0_20 = arith.constant 0 : index
    %c0_21 = arith.constant 0 : index
    %c0_22 = arith.constant 0 : index
    %32 = vector.load %arg4[%c0_20, %c0_21, %c0_22] : memref<8x128x128xbf16, #tpu.memory_space<vmem>>, vector<8x128x128xbf16>
    "tpu.trace_start"() <{level = 10 : i32, message = "bql,blh->bqh"}> : () -> ()
    %cst_23 = arith.constant dense<0.000000e+00> : vector<8x1x128xf32>
    %33 = tpu.matmul %31, %32, %cst_23 {dimension_numbers = #tpu.dot_dimension_numbers<[2], [1], [1], [2], [0, 0, 0, 1, 1, 2], [0], [0]>} : vector<8x1x128xbf16>, vector<8x128x128xbf16>, vector<8x1x128xf32> -> vector<8x1x128xf32>
    "tpu.trace_stop"() : () -> ()
    %34 = vector.shape_cast %33 : vector<8x1x128xf32> to vector<8x128xf32>
    %c0_24 = arith.constant 0 : index
    %c0_25 = arith.constant 0 : index
    %35 = vector.load %arg10[%c0_24, %c0_25] : memref<128x128xbf16, #tpu.memory_space<vmem>>, vector<128x128xbf16>
    %cst_26 = arith.constant dense<0.000000e+00> : vector<8x128xf32>
    %36 = tpu.matmul %7, %35, %cst_26 {dimension_numbers = #tpu.dot_dimension_numbers<[1], [0], [0], [1], [0, 0, 1, 1], [], []>} : vector<8x128xbf16>, vector<128x128xbf16>, vector<8x128xf32> -> vector<8x128xf32>
    %37 = arith.truncf %34 : vector<8x128xf32> to vector<8x128xbf16>
    %c0_27 = arith.constant 0 : index
    %c0_28 = arith.constant 0 : index
    %38 = vector.load %arg11[%c0_27, %c0_28] : memref<128x128xbf16, #tpu.memory_space<vmem>>, vector<128x128xbf16>
    %cst_29 = arith.constant dense<0.000000e+00> : vector<8x128xf32>
    %39 = tpu.matmul %37, %38, %cst_29 {dimension_numbers = #tpu.dot_dimension_numbers<[1], [0], [0], [1], [0, 0, 1, 1], [], []>} : vector<8x128xbf16>, vector<128x128xbf16>, vector<8x128xf32> -> vector<8x128xf32>
    %40 = arith.addf %36, %39 : vector<8x128xf32>
    %c0_30 = arith.constant 0 : index
    %c0_31 = arith.constant 0 : index
    %41 = vector.load %arg12[%c0_30, %c0_31] : memref<1x128xf32, #tpu.memory_space<vmem>>, vector<1x128xf32>
    %42 = vector.broadcast %41 : vector<1x128xf32> to vector<8x128xf32>
    %43 = arith.addf %40, %42 : vector<8x128xf32>
    %cst_32 = arith.constant 0.000000e+00 : f32
    %44 = vector.broadcast %cst_32 : f32 to vector<8x128xf32>
    %45 = arith.maximumf %43, %44 : vector<8x128xf32>
    %c0_33 = arith.constant 0 : index
    %c0_34 = arith.constant 0 : index
    %c0_35 = arith.constant 0 : index
    %46 = vector.load %arg2[%c0_33, %c0_34, %c0_35] : memref<2x8x128xf32, #tpu.memory_space<vmem>>, vector<1x8x128xf32>
    %47 = vector.shape_cast %46 : vector<1x8x128xf32> to vector<8x128xf32>
    %c0_36 = arith.constant 0 : index
    %c0_37 = arith.constant 0 : index
    %c0_38 = arith.constant 0 : index
    %48 = vector.load %arg3[%c0_36, %c0_37, %c0_38] : memref<2x8x128xf32, #tpu.memory_space<vmem>>, vector<1x8x128xf32>
    %49 = vector.shape_cast %48 : vector<1x8x128xf32> to vector<8x128xf32>
    %50 = arith.truncf %45 : vector<8x128xf32> to vector<8x128xbf16>
    %c0_39 = arith.constant 0 : index
    %c0_40 = arith.constant 0 : index
    %c0_41 = arith.constant 0 : index
    %51 = vector.load %arg13[%c0_39, %c0_40, %c0_41] : memref<2x128x512xbf16, #tpu.memory_space<vmem>>, vector<1x128x512xbf16>
    %52 = vector.shape_cast %51 : vector<1x128x512xbf16> to vector<128x512xbf16>
    %cst_42 = arith.constant dense<0.000000e+00> : vector<8x512xf32>
    %53 = tpu.matmul %50, %52, %cst_42 {dimension_numbers = #tpu.dot_dimension_numbers<[1], [0], [0], [1], [0, 0, 1, 1], [], []>} : vector<8x128xbf16>, vector<128x512xbf16>, vector<8x512xf32> -> vector<8x512xf32>
    %54 = arith.truncf %47 : vector<8x128xf32> to vector<8x128xbf16>
    %c0_43 = arith.constant 0 : index
    %c0_44 = arith.constant 0 : index
    %c0_45 = arith.constant 0 : index
    %55 = vector.load %arg14[%c0_43, %c0_44, %c0_45] : memref<2x128x512xbf16, #tpu.memory_space<vmem>>, vector<1x128x512xbf16>
    %56 = vector.shape_cast %55 : vector<1x128x512xbf16> to vector<128x512xbf16>
    %cst_46 = arith.constant dense<0.000000e+00> : vector<8x512xf32>
    %57 = tpu.matmul %54, %56, %cst_46 {dimension_numbers = #tpu.dot_dimension_numbers<[1], [0], [0], [1], [0, 0, 1, 1], [], []>} : vector<8x128xbf16>, vector<128x512xbf16>, vector<8x512xf32> -> vector<8x512xf32>
    %58 = arith.addf %53, %57 : vector<8x512xf32>
    %c0_47 = arith.constant 0 : index
    %c0_48 = arith.constant 0 : index
    %c0_49 = arith.constant 0 : index
    %59 = vector.load %arg15[%c0_47, %c0_48, %c0_49] : memref<2x1x512xf32, #tpu.memory_space<vmem>>, vector<1x1x512xf32>
    %60 = vector.shape_cast %59 : vector<1x1x512xf32> to vector<1x512xf32>
    %61 = vector.broadcast %60 : vector<1x512xf32> to vector<8x512xf32>
    %62 = arith.addf %58, %61 : vector<8x512xf32>
    %63 = vector.extract_strided_slice %62 {offsets = [0, 0], sizes = [8, 256], strides = [1, 1]} : vector<8x512xf32> to vector<8x256xf32>
    %64 = arith.negf %63 : vector<8x256xf32>
    %65 = math.exp %64 : vector<8x256xf32>
    %cst_50 = arith.constant 1.000000e+00 : f32
    %66 = vector.broadcast %cst_50 : f32 to vector<8x256xf32>
    %67 = arith.addf %66, %65 : vector<8x256xf32>
    %68 = arith.divf %66, %67 : vector<8x256xf32>
    %69 = vector.extract_strided_slice %68 {offsets = [0, 0], sizes = [8, 128], strides = [1, 1]} : vector<8x256xf32> to vector<8x128xf32>
    %70 = vector.extract_strided_slice %68 {offsets = [0, 128], sizes = [8, 128], strides = [1, 1]} : vector<8x256xf32> to vector<8x128xf32>
    %71 = vector.extract_strided_slice %62 {offsets = [0, 256], sizes = [8, 128], strides = [1, 1]} : vector<8x512xf32> to vector<8x128xf32>
    %72 = math.tanh %71 : vector<8x128xf32>
    %73 = vector.extract_strided_slice %62 {offsets = [0, 384], sizes = [8, 128], strides = [1, 1]} : vector<8x512xf32> to vector<8x128xf32>
    %74 = arith.negf %73 : vector<8x128xf32>
    %75 = math.exp %74 : vector<8x128xf32>
    %cst_51 = arith.constant 1.000000e+00 : f32
    %76 = vector.broadcast %cst_51 : f32 to vector<8x128xf32>
    %77 = arith.addf %76, %75 : vector<8x128xf32>
    %78 = arith.divf %76, %77 : vector<8x128xf32>
    %79 = arith.mulf %70, %49 : vector<8x128xf32>
    %80 = arith.mulf %69, %72 : vector<8x128xf32>
    %81 = arith.addf %79, %80 : vector<8x128xf32>
    %82 = math.tanh %81 : vector<8x128xf32>
    %83 = arith.mulf %78, %82 : vector<8x128xf32>
    %c0_52 = arith.constant 0 : index
    %c0_53 = arith.constant 0 : index
    %c0_54 = arith.constant 0 : index
    %84 = vector.load %arg19[%c0_52, %c0_53, %c0_54] : memref<2x8x128xf32, #tpu.memory_space<vmem>>, vector<1x8x128xf32>
    %85 = vector.shape_cast %84 : vector<1x8x128xf32> to vector<8x128xf32>
    %86 = vector.shape_cast %83 : vector<8x128xf32> to vector<1x8x128xf32>
    tpu.vector_store %arg19[%c0_52, %c0_53, %c0_54], %86 {strides = array<i32>} : memref<2x8x128xf32, #tpu.memory_space<vmem>>, vector<1x8x128xf32>,
    %c0_55 = arith.constant 0 : index
    %c0_56 = arith.constant 0 : index
    %c0_57 = arith.constant 0 : index
    %87 = vector.load %arg20[%c0_55, %c0_56, %c0_57] : memref<2x8x128xf32, #tpu.memory_space<vmem>>, vector<1x8x128xf32>
    %88 = vector.shape_cast %87 : vector<1x8x128xf32> to vector<8x128xf32>
    %89 = vector.shape_cast %81 : vector<8x128xf32> to vector<1x8x128xf32>
    tpu.vector_store %arg20[%c0_55, %c0_56, %c0_57], %89 {strides = array<i32>} : memref<2x8x128xf32, #tpu.memory_space<vmem>>, vector<1x8x128xf32>,
    %c1 = arith.constant 1 : index
    %c0_58 = arith.constant 0 : index
    %c0_59 = arith.constant 0 : index
    %90 = vector.load %arg2[%c1, %c0_58, %c0_59] : memref<2x8x128xf32, #tpu.memory_space<vmem>>, vector<1x8x128xf32>
    %91 = vector.shape_cast %90 : vector<1x8x128xf32> to vector<8x128xf32>
    %c1_60 = arith.constant 1 : index
    %c0_61 = arith.constant 0 : index
    %c0_62 = arith.constant 0 : index
    %92 = vector.load %arg3[%c1_60, %c0_61, %c0_62] : memref<2x8x128xf32, #tpu.memory_space<vmem>>, vector<1x8x128xf32>
    %93 = vector.shape_cast %92 : vector<1x8x128xf32> to vector<8x128xf32>
    %94 = arith.truncf %83 : vector<8x128xf32> to vector<8x128xbf16>
    %c1_63 = arith.constant 1 : index
    %c0_64 = arith.constant 0 : index
    %c0_65 = arith.constant 0 : index
    %95 = vector.load %arg13[%c1_63, %c0_64, %c0_65] : memref<2x128x512xbf16, #tpu.memory_space<vmem>>, vector<1x128x512xbf16>
    %96 = vector.shape_cast %95 : vector<1x128x512xbf16> to vector<128x512xbf16>
    %cst_66 = arith.constant dense<0.000000e+00> : vector<8x512xf32>
    %97 = tpu.matmul %94, %96, %cst_66 {dimension_numbers = #tpu.dot_dimension_numbers<[1], [0], [0], [1], [0, 0, 1, 1], [], []>} : vector<8x128xbf16>, vector<128x512xbf16>, vector<8x512xf32> -> vector<8x512xf32>
    %98 = arith.truncf %91 : vector<8x128xf32> to vector<8x128xbf16>
    %c1_67 = arith.constant 1 : index
    %c0_68 = arith.constant 0 : index
    %c0_69 = arith.constant 0 : index
    %99 = vector.load %arg14[%c1_67, %c0_68, %c0_69] : memref<2x128x512xbf16, #tpu.memory_space<vmem>>, vector<1x128x512xbf16>
    %100 = vector.shape_cast %99 : vector<1x128x512xbf16> to vector<128x512xbf16>
    %cst_70 = arith.constant dense<0.000000e+00> : vector<8x512xf32>
    %101 = tpu.matmul %98, %100, %cst_70 {dimension_numbers = #tpu.dot_dimension_numbers<[1], [0], [0], [1], [0, 0, 1, 1], [], []>} : vector<8x128xbf16>, vector<128x512xbf16>, vector<8x512xf32> -> vector<8x512xf32>
    %102 = arith.addf %97, %101 : vector<8x512xf32>
    %c1_71 = arith.constant 1 : index
    %c0_72 = arith.constant 0 : index
    %c0_73 = arith.constant 0 : index
    %103 = vector.load %arg15[%c1_71, %c0_72, %c0_73] : memref<2x1x512xf32, #tpu.memory_space<vmem>>, vector<1x1x512xf32>
    %104 = vector.shape_cast %103 : vector<1x1x512xf32> to vector<1x512xf32>
    %105 = vector.broadcast %104 : vector<1x512xf32> to vector<8x512xf32>
    %106 = arith.addf %102, %105 : vector<8x512xf32>
    %107 = vector.extract_strided_slice %106 {offsets = [0, 0], sizes = [8, 256], strides = [1, 1]} : vector<8x512xf32> to vector<8x256xf32>
    %108 = arith.negf %107 : vector<8x256xf32>
    %109 = math.exp %108 : vector<8x256xf32>
    %cst_74 = arith.constant 1.000000e+00 : f32
    %110 = vector.broadcast %cst_74 : f32 to vector<8x256xf32>
    %111 = arith.addf %110, %109 : vector<8x256xf32>
    %112 = arith.divf %110, %111 : vector<8x256xf32>
    %113 = vector.extract_strided_slice %112 {offsets = [0, 0], sizes = [8, 128], strides = [1, 1]} : vector<8x256xf32> to vector<8x128xf32>
    %114 = vector.extract_strided_slice %112 {offsets = [0, 128], sizes = [8, 128], strides = [1, 1]} : vector<8x256xf32> to vector<8x128xf32>
    %115 = vector.extract_strided_slice %106 {offsets = [0, 256], sizes = [8, 128], strides = [1, 1]} : vector<8x512xf32> to vector<8x128xf32>
    %116 = math.tanh %115 : vector<8x128xf32>
    %117 = vector.extract_strided_slice %106 {offsets = [0, 384], sizes = [8, 128], strides = [1, 1]} : vector<8x512xf32> to vector<8x128xf32>
    %118 = arith.negf %117 : vector<8x128xf32>
    %119 = math.exp %118 : vector<8x128xf32>
    %cst_75 = arith.constant 1.000000e+00 : f32
    %120 = vector.broadcast %cst_75 : f32 to vector<8x128xf32>
    %121 = arith.addf %120, %119 : vector<8x128xf32>
    %122 = arith.divf %120, %121 : vector<8x128xf32>
    %123 = arith.mulf %114, %93 : vector<8x128xf32>
    %124 = arith.mulf %113, %116 : vector<8x128xf32>
    %125 = arith.addf %123, %124 : vector<8x128xf32>
    %126 = math.tanh %125 : vector<8x128xf32>
    %127 = arith.mulf %122, %126 : vector<8x128xf32>
    %c1_76 = arith.constant 1 : index
    %c0_77 = arith.constant 0 : index
    %c0_78 = arith.constant 0 : index
    %128 = vector.load %arg19[%c1_76, %c0_77, %c0_78] : memref<2x8x128xf32, #tpu.memory_space<vmem>>, vector<1x8x128xf32>
    %129 = vector.shape_cast %128 : vector<1x8x128xf32> to vector<8x128xf32>
    %130 = vector.shape_cast %127 : vector<8x128xf32> to vector<1x8x128xf32>
    tpu.vector_store %arg19[%c1_76, %c0_77, %c0_78], %130 {strides = array<i32>} : memref<2x8x128xf32, #tpu.memory_space<vmem>>, vector<1x8x128xf32>,
    %c1_79 = arith.constant 1 : index
    %c0_80 = arith.constant 0 : index
    %c0_81 = arith.constant 0 : index
    %131 = vector.load %arg20[%c1_79, %c0_80, %c0_81] : memref<2x8x128xf32, #tpu.memory_space<vmem>>, vector<1x8x128xf32>
    %132 = vector.shape_cast %131 : vector<1x8x128xf32> to vector<8x128xf32>
    %133 = vector.shape_cast %125 : vector<8x128xf32> to vector<1x8x128xf32>
    tpu.vector_store %arg20[%c1_79, %c0_80, %c0_81], %133 {strides = array<i32>} : memref<2x8x128xf32, #tpu.memory_space<vmem>>, vector<1x8x128xf32>,
    %134 = arith.truncf %127 : vector<8x128xf32> to vector<8x128xbf16>
    %c0_82 = arith.constant 0 : index
    %c0_83 = arith.constant 0 : index
    %135 = vector.load %arg16[%c0_82, %c0_83] : memref<128x128xbf16, #tpu.memory_space<vmem>>, vector<128x128xbf16>
    %cst_84 = arith.constant dense<0.000000e+00> : vector<8x128xf32>
    %136 = tpu.matmul %134, %135, %cst_84 {dimension_numbers = #tpu.dot_dimension_numbers<[1], [0], [0], [1], [0, 0, 1, 1], [], []>} : vector<8x128xbf16>, vector<128x128xbf16>, vector<8x128xf32> -> vector<8x128xf32>
    %c0_85 = arith.constant 0 : index
    %c0_86 = arith.constant 0 : index
    %137 = vector.load %arg17[%c0_85, %c0_86] : memref<1x128xf32, #tpu.memory_space<vmem>>, vector<1x128xf32>
    %138 = vector.broadcast %137 : vector<1x128xf32> to vector<8x128xf32>
    %139 = arith.addf %136, %138 : vector<8x128xf32>
    %cst_87 = arith.constant 0.000000e+00 : f32
    %140 = vector.broadcast %cst_87 : f32 to vector<8x128xf32>
    %141 = arith.maximumf %139, %140 : vector<8x128xf32>
    %c0_88 = arith.constant 0 : index
    %c0_89 = arith.constant 0 : index
    %142 = vector.load %arg18[%c0_88, %c0_89] : memref<8x128xf32, #tpu.memory_space<vmem>>, vector<8x128xf32>
    tpu.vector_store %arg18[%c0_88, %c0_89], %141 {strides = array<i32>} : memref<8x128xf32, #tpu.memory_space<vmem>>, vector<8x128xf32>,
    return
  }
  func.func @transform_0(%arg0: i32) -> (i32, i32) {
    %c0_i32 = arith.constant 0 : i32
    %c0_i32_0 = arith.constant 0 : i32
    return %arg0, %c0_i32 : i32, i32
  }
  func.func @transform_1(%arg0: i32) -> (i32, i32, i32) {
    %c0_i32 = arith.constant 0 : i32
    %c0_i32_0 = arith.constant 0 : i32
    %c0_i32_1 = arith.constant 0 : i32
    return %c0_i32, %arg0, %c0_i32_0 : i32, i32, i32
  }
  func.func @transform_2(%arg0: i32) -> (i32, i32, i32) {
    %c0_i32 = arith.constant 0 : i32
    %c0_i32_0 = arith.constant 0 : i32
    %c0_i32_1 = arith.constant 0 : i32
    return %c0_i32, %arg0, %c0_i32_0 : i32, i32, i32
  }
  func.func @transform_3(%arg0: i32) -> (i32, i32, i32) {
    %c0_i32 = arith.constant 0 : i32
    %c0_i32_0 = arith.constant 0 : i32
    %c0_i32_1 = arith.constant 0 : i32
    return %arg0, %c0_i32, %c0_i32_0 : i32, i32, i32
  }
  func.func @transform_4(%arg0: i32) -> (i32, i32) {
    %c0_i32 = arith.constant 0 : i32
    %c0_i32_0 = arith.constant 0 : i32
    %c0_i32_1 = arith.constant 0 : i32
    return %c0_i32, %c0_i32_0 : i32, i32
  }
  func.func @transform_5(%arg0: i32) -> (i32, i32) {
    %c0_i32 = arith.constant 0 : i32
    %c0_i32_0 = arith.constant 0 : i32
    %c0_i32_1 = arith.constant 0 : i32
    return %c0_i32, %c0_i32_0 : i32, i32
  }
  func.func @transform_6(%arg0: i32) -> (i32, i32) {
    %c0_i32 = arith.constant 0 : i32
    %c0_i32_0 = arith.constant 0 : i32
    %c0_i32_1 = arith.constant 0 : i32
    return %c0_i32, %c0_i32_0 : i32, i32
  }
  func.func @transform_7(%arg0: i32) -> (i32, i32) {
    %c0_i32 = arith.constant 0 : i32
    %c0_i32_0 = arith.constant 0 : i32
    %c0_i32_1 = arith.constant 0 : i32
    return %c0_i32, %c0_i32_0 : i32, i32
  }
  func.func @transform_8(%arg0: i32) -> (i32, i32) {
    %c0_i32 = arith.constant 0 : i32
    %c0_i32_0 = arith.constant 0 : i32
    %c0_i32_1 = arith.constant 0 : i32
    return %c0_i32, %c0_i32_0 : i32, i32
  }
  func.func @transform_9(%arg0: i32) -> (i32, i32) {
    %c0_i32 = arith.constant 0 : i32
    %c0_i32_0 = arith.constant 0 : i32
    %c0_i32_1 = arith.constant 0 : i32
    return %c0_i32, %c0_i32_0 : i32, i32
  }
  func.func @transform_10(%arg0: i32) -> (i32, i32) {
    %c0_i32 = arith.constant 0 : i32
    %c0_i32_0 = arith.constant 0 : i32
    %c0_i32_1 = arith.constant 0 : i32
    return %c0_i32, %c0_i32_0 : i32, i32
  }
  func.func @transform_11(%arg0: i32) -> (i32, i32) {
    %c0_i32 = arith.constant 0 : i32
    %c0_i32_0 = arith.constant 0 : i32
    %c0_i32_1 = arith.constant 0 : i32
    return %c0_i32, %c0_i32_0 : i32, i32
  }
  func.func @transform_12(%arg0: i32) -> (i32, i32, i32) {
    %c0_i32 = arith.constant 0 : i32
    %c0_i32_0 = arith.constant 0 : i32
    %c0_i32_1 = arith.constant 0 : i32
    %c0_i32_2 = arith.constant 0 : i32
    return %c0_i32, %c0_i32_0, %c0_i32_1 : i32, i32, i32
  }
  func.func @transform_13(%arg0: i32) -> (i32, i32, i32) {
    %c0_i32 = arith.constant 0 : i32
    %c0_i32_0 = arith.constant 0 : i32
    %c0_i32_1 = arith.constant 0 : i32
    %c0_i32_2 = arith.constant 0 : i32
    return %c0_i32, %c0_i32_0, %c0_i32_1 : i32, i32, i32
  }
  func.func @transform_14(%arg0: i32) -> (i32, i32, i32) {
    %c0_i32 = arith.constant 0 : i32
    %c0_i32_0 = arith.constant 0 : i32
    %c0_i32_1 = arith.constant 0 : i32
    %c0_i32_2 = arith.constant 0 : i32
    return %c0_i32, %c0_i32_0, %c0_i32_1 : i32, i32, i32
  }
  func.func @transform_15(%arg0: i32) -> (i32, i32) {
    %c0_i32 = arith.constant 0 : i32
    %c0_i32_0 = arith.constant 0 : i32
    %c0_i32_1 = arith.constant 0 : i32
    return %c0_i32, %c0_i32_0 : i32, i32
  }
  func.func @transform_16(%arg0: i32) -> (i32, i32) {
    %c0_i32 = arith.constant 0 : i32
    %c0_i32_0 = arith.constant 0 : i32
    %c0_i32_1 = arith.constant 0 : i32
    return %c0_i32, %c0_i32_0 : i32, i32
  }
  func.func @transform_17(%arg0: i32) -> (i32, i32) {
    %c0_i32 = arith.constant 0 : i32
    %c0_i32_0 = arith.constant 0 : i32
    return %arg0, %c0_i32 : i32, i32
  }
  func.func @transform_18(%arg0: i32) -> (i32, i32, i32) {
    %c0_i32 = arith.constant 0 : i32
    %c0_i32_0 = arith.constant 0 : i32
    %c0_i32_1 = arith.constant 0 : i32
    return %c0_i32, %arg0, %c0_i32_0 : i32, i32, i32
  }
  func.func @transform_19(%arg0: i32) -> (i32, i32, i32) {
    %c0_i32 = arith.constant 0 : i32
    %c0_i32_0 = arith.constant 0 : i32
    %c0_i32_1 = arith.constant 0 : i32
    return %c0_i32, %arg0, %c0_i32_0 : i32, i32, i32
  }
  func.func @transform_20(%arg0: i32) -> (i32, i32) {
    %c0_i32 = arith.constant 0 : i32
    %c0_i32_0 = arith.constant 0 : i32
    return %arg0, %c0_i32 : i32, i32
  }
}

module attributes {stable_mosaic.version = 11 : i64} {
  func.func @attn_decoder_kernel(%arg0: i32, %arg1: memref<8x128xf32, #tpu.memory_space<vmem>>, %arg2: memref<2x8x128xf32, #tpu.memory_space<vmem>>, %arg3: memref<2x8x128xf32, #tpu.memory_space<vmem>>, %arg4: memref<8x128x128xbf16, #tpu.memory_space<vmem>>, %arg5: memref<128x128xbf16, #tpu.memory_space<vmem>>, %arg6: memref<1x128xf32, #tpu.memory_space<vmem>>, %arg7: memref<128x128xbf16, #tpu.memory_space<vmem>>, %arg8: memref<128x128xbf16, #tpu.memory_space<vmem>>, %arg9: memref<1x128xf32, #tpu.memory_space<vmem>>, %arg10: memref<128x128xbf16, #tpu.memory_space<vmem>>, %arg11: memref<128x128xbf16, #tpu.memory_space<vmem>>, %arg12: memref<1x128xf32, #tpu.memory_space<vmem>>, %arg13: memref<2x128x512xbf16, #tpu.memory_space<vmem>>, %arg14: memref<2x128x512xbf16, #tpu.memory_space<vmem>>, %arg15: memref<2x1x512xf32, #tpu.memory_space<vmem>>, %arg16: memref<128x128xbf16, #tpu.memory_space<vmem>>, %arg17: memref<1x128xf32, #tpu.memory_space<vmem>>, %arg18: memref<8x128xf32, #tpu.memory_space<vmem>>, %arg19: memref<2x8x128xf32, #tpu.memory_space<vmem>>, %arg20: memref<2x8x128xf32, #tpu.memory_space<vmem>>, %arg21: memref<8x128xf32, #tpu.memory_space<vmem>>) attributes {dimension_semantics = [#tpu.dimension_semantics<parallel>], iteration_bounds = array<i64: 1>, scalar_prefetch = 0 : i64, scratch_operands = 0 : i64, tpu.core_type = #tpu.core_type<tc>, window_params = [{transform_indices = @transform_0, window_bounds = array<i64: 8, 128>}, {transform_indices = @transform_1, window_bounds = array<i64: 2, 8, 128>}, {transform_indices = @transform_2, window_bounds = array<i64: 2, 8, 128>}, {transform_indices = @transform_3, window_bounds = array<i64: 8, 128, 128>}, {pipeline_mode = #tpu.pipeline_mode<synchronous>, transform_indices = @transform_4, window_bounds = array<i64: 128, 128>}, {pipeline_mode = #tpu.pipeline_mode<synchronous>, transform_indices = @transform_5, window_bounds = array<i64: 1, 128>}, {pipeline_mode = #tpu.pipeline_mode<synchronous>, transform_indices = @transform_6, window_bounds = array<i64: 128, 128>}, {pipeline_mode = #tpu.pipeline_mode<synchronous>, transform_indices = @transform_7, window_bounds = array<i64: 128, 128>}, {pipeline_mode = #tpu.pipeline_mode<synchronous>, transform_indices = @transform_8, window_bounds = array<i64: 1, 128>}, {pipeline_mode = #tpu.pipeline_mode<synchronous>, transform_indices = @transform_9, window_bounds = array<i64: 128, 128>}, {pipeline_mode = #tpu.pipeline_mode<synchronous>, transform_indices = @transform_10, window_bounds = array<i64: 128, 128>}, {pipeline_mode = #tpu.pipeline_mode<synchronous>, transform_indices = @transform_11, window_bounds = array<i64: 1, 128>}, {pipeline_mode = #tpu.pipeline_mode<synchronous>, transform_indices = @transform_12, window_bounds = array<i64: 2, 128, 512>}, {pipeline_mode = #tpu.pipeline_mode<synchronous>, transform_indices = @transform_13, window_bounds = array<i64: 2, 128, 512>}, {pipeline_mode = #tpu.pipeline_mode<synchronous>, transform_indices = @transform_14, window_bounds = array<i64: 2, 1, 512>}, {pipeline_mode = #tpu.pipeline_mode<synchronous>, transform_indices = @transform_15, window_bounds = array<i64: 128, 128>}, {pipeline_mode = #tpu.pipeline_mode<synchronous>, transform_indices = @transform_16, window_bounds = array<i64: 1, 128>}, {transform_indices = @transform_17, window_bounds = array<i64: 8, 128>}, {transform_indices = @transform_18, window_bounds = array<i64: 2, 8, 128>}, {transform_indices = @transform_19, window_bounds = array<i64: 2, 8, 128>}, {transform_indices = @transform_20, window_bounds = array<i64: 8, 128>}]} {
    %c0 = arith.constant 0 : index
    %c0_0 = arith.constant 0 : index
    %0 = vector.load %arg1[%c0, %c0_0] : memref<8x128xf32, #tpu.memory_space<vmem>>, vector<8x128xf32>
    %1 = arith.truncf %0 : vector<8x128xf32> to vector<8x128xbf16>
    %c0_1 = arith.constant 0 : index
    %c0_2 = arith.constant 0 : index
    %2 = vector.load %arg5[%c0_1, %c0_2] : memref<128x128xbf16, #tpu.memory_space<vmem>>, vector<128x128xbf16>
    %cst = arith.constant dense<0.000000e+00> : vector<8x128xf32>
    %3 = tpu.matmul %1, %2, %cst {dimension_numbers = #tpu.dot_dimension_numbers<[1], [0], [0], [1], [0, 0, 1, 1], [], []>} : vector<8x128xbf16>, vector<128x128xbf16>, vector<8x128xf32> -> vector<8x128xf32>
    %c0_3 = arith.constant 0 : index
    %c0_4 = arith.constant 0 : index
    %4 = vector.load %arg6[%c0_3, %c0_4] : memref<1x128xf32, #tpu.memory_space<vmem>>, vector<1x128xf32>
    %5 = vector.broadcast %4 : vector<1x128xf32> to vector<8x128xf32>
    %6 = arith.addf %3, %5 : vector<8x128xf32>
    %7 = arith.truncf %6 : vector<8x128xf32> to vector<8x128xbf16>
    %c0_5 = arith.constant 0 : index
    %c0_6 = arith.constant 0 : index
    %c0_7 = arith.constant 0 : index
    %8 = vector.load %arg2[%c0_5, %c0_6, %c0_7] : memref<2x8x128xf32, #tpu.memory_space<vmem>>, vector<1x8x128xf32>
    %9 = vector.shape_cast %8 : vector<1x8x128xf32> to vector<8x128xf32>
    %10 = arith.truncf %9 : vector<8x128xf32> to vector<8x128xbf16>
    %c0_8 = arith.constant 0 : index
    %c0_9 = arith.constant 0 : index
    %11 = vector.load %arg7[%c0_8, %c0_9] : memref<128x128xbf16, #tpu.memory_space<vmem>>, vector<128x128xbf16>
    %cst_10 = arith.constant dense<0.000000e+00> : vector<8x128xf32>
    %12 = tpu.matmul %7, %11, %cst_10 {dimension_numbers = #tpu.dot_dimension_numbers<[1], [0], [0], [1], [0, 0, 1, 1], [], []>} : vector<8x128xbf16>, vector<128x128xbf16>, vector<8x128xf32> -> vector<8x128xf32>
    %c0_11 = arith.constant 0 : index
    %c0_12 = arith.constant 0 : index
    %13 = vector.load %arg8[%c0_11, %c0_12] : memref<128x128xbf16, #tpu.memory_space<vmem>>, vector<128x128xbf16>
    %cst_13 = arith.constant dense<0.000000e+00> : vector<8x128xf32>
    %14 = tpu.matmul %10, %13, %cst_13 {dimension_numbers = #tpu.dot_dimension_numbers<[1], [0], [0], [1], [0, 0, 1, 1], [], []>} : vector<8x128xbf16>, vector<128x128xbf16>, vector<8x128xf32> -> vector<8x128xf32>
    %15 = arith.addf %12, %14 : vector<8x128xf32>
    %c0_14 = arith.constant 0 : index
    %c0_15 = arith.constant 0 : index
    %16 = vector.load %arg9[%c0_14, %c0_15] : memref<1x128xf32, #tpu.memory_space<vmem>>, vector<1x128xf32>
    %17 = vector.broadcast %16 : vector<1x128xf32> to vector<8x128xf32>
    %18 = arith.addf %15, %17 : vector<8x128xf32>
    %cst_16 = arith.constant dense<0xFF800000> : vector<8xf32>
    %19 = vector.multi_reduction <maximumf>, %18, %cst_16 [1] : vector<8x128xf32> to vector<8xf32>
    %20 = vector.shape_cast %19 : vector<8xf32> to vector<8x1xf32>
    %21 = vector.broadcast %20 : vector<8x1xf32> to vector<8x128xf32>
    %22 = arith.subf %18, %21 : vector<8x128xf32>
    %23 = math.exp %22 : vector<8x128xf32>
    %cst_17 = arith.constant dense<0.000000e+00> : vector<8xf32>
    %24 = vector.multi_reduction <add>, %23, %cst_17 [1] : vector<8x128xf32> to vector<8xf32>
    %25 = vector.shape_cast %24 : vector<8xf32> to vector<8x1xf32>
    %26 = tpu.reciprocal %25 {approx = true} : vector<8x1xf32> -> vector<8x1xf32>
    %27 = vector.broadcast %26 : vector<8x1xf32> to vector<8x128xf32>
    %28 = arith.mulf %23, %27 : vector<8x128xf32>
    %c0_18 = arith.constant 0 : index
    %c0_19 = arith.constant 0 : index
    %29 = vector.load %arg21[%c0_18, %c0_19] : memref<8x128xf32, #tpu.memory_space<vmem>>, vector<8x128xf32>
    tpu.vector_store %arg21[%c0_18, %c0_19], %28 {strides = array<i32>} : memref<8x128xf32, #tpu.memory_space<vmem>>, vector<8x128xf32>,
    %30 = vector.shape_cast %28 : vector<8x128xf32> to vector<8x1x128xf32>
    %31 = arith.truncf %30 : vector<8x1x128xf32> to vector<8x1x128xbf16>
    %c0_20 = arith.constant 0 : index
    %c0_21 = arith.constant 0 : index
    %c0_22 = arith.constant 0 : index
    %32 = vector.load %arg4[%c0_20, %c0_21, %c0_22] : memref<8x128x128xbf16, #tpu.memory_space<vmem>>, vector<8x128x128xbf16>
    "tpu.trace_start"() <{level = 10 : i32, message = "bql,blh->bqh"}> : () -> ()
    %cst_23 = arith.constant dense<0.000000e+00> : vector<8x1x128xf32>
    %33 = tpu.matmul %31, %32, %cst_23 {dimension_numbers = #tpu.dot_dimension_numbers<[2], [1], [1], [2], [0, 0, 0, 1, 1, 2], [0], [0]>} : vector<8x1x128xbf16>, vector<8x128x128xbf16>, vector<8x1x128xf32> -> vector<8x1x128xf32>
    "tpu.trace_stop"() : () -> ()
    %34 = vector.shape_cast %33 : vector<8x1x128xf32> to vector<8x128xf32>
    %c0_24 = arith.constant 0 : index
    %c0_25 = arith.constant 0 : index
    %35 = vector.load %arg10[%c0_24, %c0_25] : memref<128x128xbf16, #tpu.memory_space<vmem>>, vector<128x128xbf16>
    %cst_26 = arith.constant dense<0.000000e+00> : vector<8x128xf32>
    %36 = tpu.matmul %7, %35, %cst_26 {dimension_numbers = #tpu.dot_dimension_numbers<[1], [0], [0], [1], [0, 0, 1, 1], [], []>} : vector<8x128xbf16>, vector<128x128xbf16>, vector<8x128xf32> -> vector<8x128xf32>
    %37 = arith.truncf %34 : vector<8x128xf32> to vector<8x128xbf16>
    %c0_27 = arith.constant 0 : index
    %c0_28 = arith.constant 0 : index
    %38 = vector.load %arg11[%c0_27, %c0_28] : memref<128x128xbf16, #tpu.memory_space<vmem>>, vector<128x128xbf16>
    %cst_29 = arith.constant dense<0.000000e+00> : vector<8x128xf32>
    %39 = tpu.matmul %37, %38, %cst_29 {dimension_numbers = #tpu.dot_dimension_numbers<[1], [0], [0], [1], [0, 0, 1, 1], [], []>} : vector<8x128xbf16>, vector<128x128xbf16>, vector<8x128xf32> -> vector<8x128xf32>
    %40 = arith.addf %36, %39 : vector<8x128xf32>
    %c0_30 = arith.constant 0 : index
    %c0_31 = arith.constant 0 : index
    %41 = vector.load %arg12[%c0_30, %c0_31] : memref<1x128xf32, #tpu.memory_space<vmem>>, vector<1x128xf32>
    %42 = vector.broadcast %41 : vector<1x128xf32> to vector<8x128xf32>
    %43 = arith.addf %40, %42 : vector<8x128xf32>
    %cst_32 = arith.constant 0.000000e+00 : f32
    %44 = vector.broadcast %cst_32 : f32 to vector<8x128xf32>
    %45 = arith.maximumf %43, %44 : vector<8x128xf32>
    %c0_33 = arith.constant 0 : index
    %c0_34 = arith.constant 0 : index
    %c0_35 = arith.constant 0 : index
    %46 = vector.load %arg2[%c0_33, %c0_34, %c0_35] : memref<2x8x128xf32, #tpu.memory_space<vmem>>, vector<1x8x128xf32>
    %47 = vector.shape_cast %46 : vector<1x8x128xf32> to vector<8x128xf32>
    %c0_36 = arith.constant 0 : index
    %c0_37 = arith.constant 0 : index
    %c0_38 = arith.constant 0 : index
    %48 = vector.load %arg3[%c0_36, %c0_37, %c0_38] : memref<2x8x128xf32, #tpu.memory_space<vmem>>, vector<1x8x128xf32>
    %49 = vector.shape_cast %48 : vector<1x8x128xf32> to vector<8x128xf32>
    %50 = arith.truncf %45 : vector<8x128xf32> to vector<8x128xbf16>
    %c0_39 = arith.constant 0 : index
    %c0_40 = arith.constant 0 : index
    %c0_41 = arith.constant 0 : index
    %51 = vector.load %arg13[%c0_39, %c0_40, %c0_41] : memref<2x128x512xbf16, #tpu.memory_space<vmem>>, vector<1x128x512xbf16>
    %52 = vector.shape_cast %51 : vector<1x128x512xbf16> to vector<128x512xbf16>
    %cst_42 = arith.constant dense<0.000000e+00> : vector<8x512xf32>
    %53 = tpu.matmul %50, %52, %cst_42 {dimension_numbers = #tpu.dot_dimension_numbers<[1], [0], [0], [1], [0, 0, 1, 1], [], []>} : vector<8x128xbf16>, vector<128x512xbf16>, vector<8x512xf32> -> vector<8x512xf32>
    %54 = arith.truncf %47 : vector<8x128xf32> to vector<8x128xbf16>
    %c0_43 = arith.constant 0 : index
    %c0_44 = arith.constant 0 : index
    %c0_45 = arith.constant 0 : index
    %55 = vector.load %arg14[%c0_43, %c0_44, %c0_45] : memref<2x128x512xbf16, #tpu.memory_space<vmem>>, vector<1x128x512xbf16>
    %56 = vector.shape_cast %55 : vector<1x128x512xbf16> to vector<128x512xbf16>
    %cst_46 = arith.constant dense<0.000000e+00> : vector<8x512xf32>
    %57 = tpu.matmul %54, %56, %cst_46 {dimension_numbers = #tpu.dot_dimension_numbers<[1], [0], [0], [1], [0, 0, 1, 1], [], []>} : vector<8x128xbf16>, vector<128x512xbf16>, vector<8x512xf32> -> vector<8x512xf32>
    %58 = arith.addf %53, %57 : vector<8x512xf32>
    %c0_47 = arith.constant 0 : index
    %c0_48 = arith.constant 0 : index
    %c0_49 = arith.constant 0 : index
    %59 = vector.load %arg15[%c0_47, %c0_48, %c0_49] : memref<2x1x512xf32, #tpu.memory_space<vmem>>, vector<1x1x512xf32>
    %60 = vector.shape_cast %59 : vector<1x1x512xf32> to vector<1x512xf32>
    %61 = vector.broadcast %60 : vector<1x512xf32> to vector<8x512xf32>
    %62 = arith.addf %58, %61 : vector<8x512xf32>
    %63 = vector.extract_strided_slice %62 {offsets = [0, 0], sizes = [8, 256], strides = [1, 1]} : vector<8x512xf32> to vector<8x256xf32>
    %64 = arith.negf %63 : vector<8x256xf32>
    %65 = math.exp %64 : vector<8x256xf32>
    %cst_50 = arith.constant 1.000000e+00 : f32
    %66 = vector.broadcast %cst_50 : f32 to vector<8x256xf32>
    %67 = arith.addf %66, %65 : vector<8x256xf32>
    %68 = arith.divf %66, %67 : vector<8x256xf32>
    %69 = vector.extract_strided_slice %68 {offsets = [0, 0], sizes = [8, 128], strides = [1, 1]} : vector<8x256xf32> to vector<8x128xf32>
    %70 = vector.extract_strided_slice %68 {offsets = [0, 128], sizes = [8, 128], strides = [1, 1]} : vector<8x256xf32> to vector<8x128xf32>
    %71 = vector.extract_strided_slice %62 {offsets = [0, 256], sizes = [8, 128], strides = [1, 1]} : vector<8x512xf32> to vector<8x128xf32>
    %72 = math.tanh %71 : vector<8x128xf32>
    %73 = vector.extract_strided_slice %62 {offsets = [0, 384], sizes = [8, 128], strides = [1, 1]} : vector<8x512xf32> to vector<8x128xf32>
    %74 = arith.negf %73 : vector<8x128xf32>
    %75 = math.exp %74 : vector<8x128xf32>
    %cst_51 = arith.constant 1.000000e+00 : f32
    %76 = vector.broadcast %cst_51 : f32 to vector<8x128xf32>
    %77 = arith.addf %76, %75 : vector<8x128xf32>
    %78 = arith.divf %76, %77 : vector<8x128xf32>
    %79 = arith.mulf %70, %49 : vector<8x128xf32>
    %80 = arith.mulf %69, %72 : vector<8x128xf32>
    %81 = arith.addf %79, %80 : vector<8x128xf32>
    %82 = math.tanh %81 : vector<8x128xf32>
    %83 = arith.mulf %78, %82 : vector<8x128xf32>
    %c0_52 = arith.constant 0 : index
    %c0_53 = arith.constant 0 : index
    %c0_54 = arith.constant 0 : index
    %84 = vector.load %arg19[%c0_52, %c0_53, %c0_54] : memref<2x8x128xf32, #tpu.memory_space<vmem>>, vector<1x8x128xf32>
    %85 = vector.shape_cast %84 : vector<1x8x128xf32> to vector<8x128xf32>
    %86 = vector.shape_cast %83 : vector<8x128xf32> to vector<1x8x128xf32>
    tpu.vector_store %arg19[%c0_52, %c0_53, %c0_54], %86 {strides = array<i32>} : memref<2x8x128xf32, #tpu.memory_space<vmem>>, vector<1x8x128xf32>,
    %c0_55 = arith.constant 0 : index
    %c0_56 = arith.constant 0 : index
    %c0_57 = arith.constant 0 : index
    %87 = vector.load %arg20[%c0_55, %c0_56, %c0_57] : memref<2x8x128xf32, #tpu.memory_space<vmem>>, vector<1x8x128xf32>
    %88 = vector.shape_cast %87 : vector<1x8x128xf32> to vector<8x128xf32>
    %89 = vector.shape_cast %81 : vector<8x128xf32> to vector<1x8x128xf32>
    tpu.vector_store %arg20[%c0_55, %c0_56, %c0_57], %89 {strides = array<i32>} : memref<2x8x128xf32, #tpu.memory_space<vmem>>, vector<1x8x128xf32>,
    %c1 = arith.constant 1 : index
    %c0_58 = arith.constant 0 : index
    %c0_59 = arith.constant 0 : index
    %90 = vector.load %arg2[%c1, %c0_58, %c0_59] : memref<2x8x128xf32, #tpu.memory_space<vmem>>, vector<1x8x128xf32>
    %91 = vector.shape_cast %90 : vector<1x8x128xf32> to vector<8x128xf32>
    %c1_60 = arith.constant 1 : index
    %c0_61 = arith.constant 0 : index
    %c0_62 = arith.constant 0 : index
    %92 = vector.load %arg3[%c1_60, %c0_61, %c0_62] : memref<2x8x128xf32, #tpu.memory_space<vmem>>, vector<1x8x128xf32>
    %93 = vector.shape_cast %92 : vector<1x8x128xf32> to vector<8x128xf32>
    %94 = arith.truncf %83 : vector<8x128xf32> to vector<8x128xbf16>
    %c1_63 = arith.constant 1 : index
    %c0_64 = arith.constant 0 : index
    %c0_65 = arith.constant 0 : index
    %95 = vector.load %arg13[%c1_63, %c0_64, %c0_65] : memref<2x128x512xbf16, #tpu.memory_space<vmem>>, vector<1x128x512xbf16>
    %96 = vector.shape_cast %95 : vector<1x128x512xbf16> to vector<128x512xbf16>
    %cst_66 = arith.constant dense<0.000000e+00> : vector<8x512xf32>
    %97 = tpu.matmul %94, %96, %cst_66 {dimension_numbers = #tpu.dot_dimension_numbers<[1], [0], [0], [1], [0, 0, 1, 1], [], []>} : vector<8x128xbf16>, vector<128x512xbf16>, vector<8x512xf32> -> vector<8x512xf32>
    %98 = arith.truncf %91 : vector<8x128xf32> to vector<8x128xbf16>
    %c1_67 = arith.constant 1 : index
    %c0_68 = arith.constant 0 : index
    %c0_69 = arith.constant 0 : index
    %99 = vector.load %arg14[%c1_67, %c0_68, %c0_69] : memref<2x128x512xbf16, #tpu.memory_space<vmem>>, vector<1x128x512xbf16>
    %100 = vector.shape_cast %99 : vector<1x128x512xbf16> to vector<128x512xbf16>
    %cst_70 = arith.constant dense<0.000000e+00> : vector<8x512xf32>
    %101 = tpu.matmul %98, %100, %cst_70 {dimension_numbers = #tpu.dot_dimension_numbers<[1], [0], [0], [1], [0, 0, 1, 1], [], []>} : vector<8x128xbf16>, vector<128x512xbf16>, vector<8x512xf32> -> vector<8x512xf32>
    %102 = arith.addf %97, %101 : vector<8x512xf32>
    %c1_71 = arith.constant 1 : index
    %c0_72 = arith.constant 0 : index
    %c0_73 = arith.constant 0 : index
    %103 = vector.load %arg15[%c1_71, %c0_72, %c0_73] : memref<2x1x512xf32, #tpu.memory_space<vmem>>, vector<1x1x512xf32>
    %104 = vector.shape_cast %103 : vector<1x1x512xf32> to vector<1x512xf32>
    %105 = vector.broadcast %104 : vector<1x512xf32> to vector<8x512xf32>
    %106 = arith.addf %102, %105 : vector<8x512xf32>
    %107 = vector.extract_strided_slice %106 {offsets = [0, 0], sizes = [8, 256], strides = [1, 1]} : vector<8x512xf32> to vector<8x256xf32>
    %108 = arith.negf %107 : vector<8x256xf32>
    %109 = math.exp %108 : vector<8x256xf32>
    %cst_74 = arith.constant 1.000000e+00 : f32
    %110 = vector.broadcast %cst_74 : f32 to vector<8x256xf32>
    %111 = arith.addf %110, %109 : vector<8x256xf32>
    %112 = arith.divf %110, %111 : vector<8x256xf32>
    %113 = vector.extract_strided_slice %112 {offsets = [0, 0], sizes = [8, 128], strides = [1, 1]} : vector<8x256xf32> to vector<8x128xf32>
    %114 = vector.extract_strided_slice %112 {offsets = [0, 128], sizes = [8, 128], strides = [1, 1]} : vector<8x256xf32> to vector<8x128xf32>
    %115 = vector.extract_strided_slice %106 {offsets = [0, 256], sizes = [8, 128], strides = [1, 1]} : vector<8x512xf32> to vector<8x128xf32>
    %116 = math.tanh %115 : vector<8x128xf32>
    %117 = vector.extract_strided_slice %106 {offsets = [0, 384], sizes = [8, 128], strides = [1, 1]} : vector<8x512xf32> to vector<8x128xf32>
    %118 = arith.negf %117 : vector<8x128xf32>
    %119 = math.exp %118 : vector<8x128xf32>
    %cst_75 = arith.constant 1.000000e+00 : f32
    %120 = vector.broadcast %cst_75 : f32 to vector<8x128xf32>
    %121 = arith.addf %120, %119 : vector<8x128xf32>
    %122 = arith.divf %120, %121 : vector<8x128xf32>
    %123 = arith.mulf %114, %93 : vector<8x128xf32>
    %124 = arith.mulf %113, %116 : vector<8x128xf32>
    %125 = arith.addf %123, %124 : vector<8x128xf32>
    %126 = math.tanh %125 : vector<8x128xf32>
    %127 = arith.mulf %122, %126 : vector<8x128xf32>
    %c1_76 = arith.constant 1 : index
    %c0_77 = arith.constant 0 : index
    %c0_78 = arith.constant 0 : index
    %128 = vector.load %arg19[%c1_76, %c0_77, %c0_78] : memref<2x8x128xf32, #tpu.memory_space<vmem>>, vector<1x8x128xf32>
    %129 = vector.shape_cast %128 : vector<1x8x128xf32> to vector<8x128xf32>
    %130 = vector.shape_cast %127 : vector<8x128xf32> to vector<1x8x128xf32>
    tpu.vector_store %arg19[%c1_76, %c0_77, %c0_78], %130 {strides = array<i32>} : memref<2x8x128xf32, #tpu.memory_space<vmem>>, vector<1x8x128xf32>,
    %c1_79 = arith.constant 1 : index
    %c0_80 = arith.constant 0 : index
    %c0_81 = arith.constant 0 : index
    %131 = vector.load %arg20[%c1_79, %c0_80, %c0_81] : memref<2x8x128xf32, #tpu.memory_space<vmem>>, vector<1x8x128xf32>
    %132 = vector.shape_cast %131 : vector<1x8x128xf32> to vector<8x128xf32>
    %133 = vector.shape_cast %125 : vector<8x128xf32> to vector<1x8x128xf32>
    tpu.vector_store %arg20[%c1_79, %c0_80, %c0_81], %133 {strides = array<i32>} : memref<2x8x128xf32, #tpu.memory_space<vmem>>, vector<1x8x128xf32>,
    %134 = arith.truncf %127 : vector<8x128xf32> to vector<8x128xbf16>
    %c0_82 = arith.constant 0 : index
    %c0_83 = arith.constant 0 : index
    %135 = vector.load %arg16[%c0_82, %c0_83] : memref<128x128xbf16, #tpu.memory_space<vmem>>, vector<128x128xbf16>
    %cst_84 = arith.constant dense<0.000000e+00> : vector<8x128xf32>
    %136 = tpu.matmul %134, %135, %cst_84 {dimension_numbers = #tpu.dot_dimension_numbers<[1], [0], [0], [1], [0, 0, 1, 1], [], []>} : vector<8x128xbf16>, vector<128x128xbf16>, vector<8x128xf32> -> vector<8x128xf32>
    %c0_85 = arith.constant 0 : index
    %c0_86 = arith.constant 0 : index
    %137 = vector.load %arg17[%c0_85, %c0_86] : memref<1x128xf32, #tpu.memory_space<vmem>>, vector<1x128xf32>
    %138 = vector.broadcast %137 : vector<1x128xf32> to vector<8x128xf32>
    %139 = arith.addf %136, %138 : vector<8x128xf32>
    %cst_87 = arith.constant 0.000000e+00 : f32
    %140 = vector.broadcast %cst_87 : f32 to vector<8x128xf32>
    %141 = arith.maximumf %139, %140 : vector<8x128xf32>
    %c0_88 = arith.constant 0 : index
    %c0_89 = arith.constant 0 : index
    %142 = vector.load %arg18[%c0_88, %c0_89] : memref<8x128xf32, #tpu.memory_space<vmem>>, vector<8x128xf32>
    tpu.vector_store %arg18[%c0_88, %c0_89], %141 {strides = array<i32>} : memref<8x128xf32, #tpu.memory_space<vmem>>, vector<8x128xf32>,
    return
  }
  func.func @transform_0(%arg0: i32) -> (i32, i32) {
    %c0_i32 = arith.constant 0 : i32
    %c0_i32_0 = arith.constant 0 : i32
    return %arg0, %c0_i32 : i32, i32
  }
  func.func @transform_1(%arg0: i32) -> (i32, i32, i32) {
    %c0_i32 = arith.constant 0 : i32
    %c0_i32_0 = arith.constant 0 : i32
    %c0_i32_1 = arith.constant 0 : i32
    return %c0_i32, %arg0, %c0_i32_0 : i32, i32, i32
  }
  func.func @transform_2(%arg0: i32) -> (i32, i32, i32) {
    %c0_i32 = arith.constant 0 : i32
    %c0_i32_0 = arith.constant 0 : i32
    %c0_i32_1 = arith.constant 0 : i32
    return %c0_i32, %arg0, %c0_i32_0 : i32, i32, i32
  }
  func.func @transform_3(%arg0: i32) -> (i32, i32, i32) {
    %c0_i32 = arith.constant 0 : i32
    %c0_i32_0 = arith.constant 0 : i32
    %c0_i32_1 = arith.constant 0 : i32
    return %arg0, %c0_i32, %c0_i32_0 : i32, i32, i32
  }
  func.func @transform_4(%arg0: i32) -> (i32, i32) {
    %c0_i32 = arith.constant 0 : i32
    %c0_i32_0 = arith.constant 0 : i32
    %c0_i32_1 = arith.constant 0 : i32
    return %c0_i32, %c0_i32_0 : i32, i32
  }
  func.func @transform_5(%arg0: i32) -> (i32, i32) {
    %c0_i32 = arith.constant 0 : i32
    %c0_i32_0 = arith.constant 0 : i32
    %c0_i32_1 = arith.constant 0 : i32
    return %c0_i32, %c0_i32_0 : i32, i32
  }
  func.func @transform_6(%arg0: i32) -> (i32, i32) {
    %c0_i32 = arith.constant 0 : i32
    %c0_i32_0 = arith.constant 0 : i32
    %c0_i32_1 = arith.constant 0 : i32
    return %c0_i32, %c0_i32_0 : i32, i32
  }
  func.func @transform_7(%arg0: i32) -> (i32, i32) {
    %c0_i32 = arith.constant 0 : i32
    %c0_i32_0 = arith.constant 0 : i32
    %c0_i32_1 = arith.constant 0 : i32
    return %c0_i32, %c0_i32_0 : i32, i32
  }
  func.func @transform_8(%arg0: i32) -> (i32, i32) {
    %c0_i32 = arith.constant 0 : i32
    %c0_i32_0 = arith.constant 0 : i32
    %c0_i32_1 = arith.constant 0 : i32
    return %c0_i32, %c0_i32_0 : i32, i32
  }
  func.func @transform_9(%arg0: i32) -> (i32, i32) {
    %c0_i32 = arith.constant 0 : i32
    %c0_i32_0 = arith.constant 0 : i32
    %c0_i32_1 = arith.constant 0 : i32
    return %c0_i32, %c0_i32_0 : i32, i32
  }
  func.func @transform_10(%arg0: i32) -> (i32, i32) {
    %c0_i32 = arith.constant 0 : i32
    %c0_i32_0 = arith.constant 0 : i32
    %c0_i32_1 = arith.constant 0 : i32
    return %c0_i32, %c0_i32_0 : i32, i32
  }
  func.func @transform_11(%arg0: i32) -> (i32, i32) {
    %c0_i32 = arith.constant 0 : i32
    %c0_i32_0 = arith.constant 0 : i32
    %c0_i32_1 = arith.constant 0 : i32
    return %c0_i32, %c0_i32_0 : i32, i32
  }
  func.func @transform_12(%arg0: i32) -> (i32, i32, i32) {
    %c0_i32 = arith.constant 0 : i32
    %c0_i32_0 = arith.constant 0 : i32
    %c0_i32_1 = arith.constant 0 : i32
    %c0_i32_2 = arith.constant 0 : i32
    return %c0_i32, %c0_i32_0, %c0_i32_1 : i32, i32, i32
  }
  func.func @transform_13(%arg0: i32) -> (i32, i32, i32) {
    %c0_i32 = arith.constant 0 : i32
    %c0_i32_0 = arith.constant 0 : i32
    %c0_i32_1 = arith.constant 0 : i32
    %c0_i32_2 = arith.constant 0 : i32
    return %c0_i32, %c0_i32_0, %c0_i32_1 : i32, i32, i32
  }
  func.func @transform_14(%arg0: i32) -> (i32, i32, i32) {
    %c0_i32 = arith.constant 0 : i32
    %c0_i32_0 = arith.constant 0 : i32
    %c0_i32_1 = arith.constant 0 : i32
    %c0_i32_2 = arith.constant 0 : i32
    return %c0_i32, %c0_i32_0, %c0_i32_1 : i32, i32, i32
  }
  func.func @transform_15(%arg0: i32) -> (i32, i32) {
    %c0_i32 = arith.constant 0 : i32
    %c0_i32_0 = arith.constant 0 : i32
    %c0_i32_1 = arith.constant 0 : i32
    return %c0_i32, %c0_i32_0 : i32, i32
  }
  func.func @transform_16(%arg0: i32) -> (i32, i32) {
    %c0_i32 = arith.constant 0 : i32
    %c0_i32_0 = arith.constant 0 : i32
    %c0_i32_1 = arith.constant 0 : i32
    return %c0_i32, %c0_i32_0 : i32, i32
  }
  func.func @transform_17(%arg0: i32) -> (i32, i32) {
    %c0_i32 = arith.constant 0 : i32
    %c0_i32_0 = arith.constant 0 : i32
    return %arg0, %c0_i32 : i32, i32
  }
  func.func @transform_18(%arg0: i32) -> (i32, i32, i32) {
    %c0_i32 = arith.constant 0 : i32
    %c0_i32_0 = arith.constant 0 : i32
    %c0_i32_1 = arith.constant 0 : i32
    return %c0_i32, %arg0, %c0_i32_0 : i32, i32, i32
  }
  func.func @transform_19(%arg0: i32) -> (i32, i32, i32) {
    %c0_i32 = arith.constant 0 : i32
    %c0_i32_0 = arith.constant 0 : i32
    %c0_i32_1 = arith.constant 0 : i32
    return %c0_i32, %arg0, %c0_i32_0 : i32, i32, i32
  }
  func.func @transform_20(%arg0: i32) -> (i32, i32) {
    %c0_i32 = arith.constant 0 : i32
    %c0_i32_0 = arith.constant 0 : i32
    return %arg0, %c0_i32 : i32, i32
  }
}

</mosaic_0001>

<bundles_post_ra>
// kernel: attn_decoder_forward.1
= control target key start
LH: loop header
LB: loop body
LE: loop exit
PB: predicated region body
PF: predicated region fallthrough
CT: control target
= control target key end

     0   :  { %v3979_v0 = vmov 0.0   ;;  %vm3980_vm0 = vmmov 0   ;;  %vm1358_vm1 = vcmask 1041409   ;;  %vm1361_vm2 = vcmask 1042434   ;;  %s5070_s4 = inlined_call_operand.vmem [shape: bf16[128,128], index: 4, kind: input, shape index: {}]   ;;  %s5071_s7 = inlined_call_operand.vmem [shape: bf16[128,128], index: 7, kind: input, shape index: {}]   ;;  %s5072_s6 = inlined_call_operand.vmem [shape: bf16[128,128], index: 6, kind: input, shape index: {}]   ;;  %s5073_s0 = inlined_call_operand.vmem [shape: f32[8,128], index: 0, kind: input, shape index: {}]   ;;  %s5074_s1 = inlined_call_operand.vmem [shape: f32[2,8,128], index: 1, kind: input, shape index: {}]   ;;  %s5075_s5 = inlined_call_operand.vmem [shape: f32[1,128], index: 5, kind: input, shape index: {}]   ;;  %s5076_s8 = inlined_call_operand.vmem [shape: f32[1,128], index: 8, kind: input, shape index: {}]   ;;  %s5077_s3 = inlined_call_operand.vmem [shape: bf16[8,128,128], index: 3, kind: input, shape index: {}]   ;;  %s5078_s9 = inlined_call_operand.vmem [shape: bf16[128,128], index: 9, kind: input, shape index: {}]   ;;  %s5079_s20 = inlined_call_operand.vmem [shape: f32[8,128], index: 20, kind: output, shape index: {3}]   ;;  %s5080_s10 = inlined_call_operand.vmem [shape: bf16[128,128], index: 10, kind: input, shape index: {}]   ;;  %s5081_s13 = inlined_call_operand.vmem [shape: bf16[2,128,512], index: 13, kind: input, shape index: {}]   ;;  %s5082_s12 = inlined_call_operand.vmem [shape: bf16[2,128,512], index: 12, kind: input, shape index: {}]   ;;  %s5083_s11 = inlined_call_operand.vmem [shape: f32[1,128], index: 11, kind: input, shape index: {}]   ;;  %s5084_s14 = inlined_call_operand.vmem [shape: f32[2,1,512], index: 14, kind: input, shape index: {}]   ;;  %s5085_s2 = inlined_call_operand.vmem [shape: f32[2,8,128], index: 2, kind: input, shape index: {}]   ;;  %s5086_s19 = inlined_call_operand.vmem [shape: f32[2,8,128], index: 19, kind: output, shape index: {2}]   ;;  %s5087_s18 = inlined_call_operand.vmem [shape: f32[2,8,128], index: 18, kind: output, shape index: {1}]   ;;  %s5088_s15 = inlined_call_operand.vmem [shape: bf16[128,128], index: 15, kind: input, shape index: {}]   ;;  %s5089_s16 = inlined_call_operand.vmem [shape: f32[1,128], index: 16, kind: input, shape index: {}]   ;;  %s5090_s17 = inlined_call_operand.vmem [shape: f32[8,128], index: 17, kind: output, shape index: {0}]  }
   0x1   :  { %5095 = sst [smem:[#allocation2_spill]] %s5070_s4  ;;  %3355 = vmatprep.subr.bf16.mxu0 %v3979_v0  ;;  %3371 = vmatprep.mubr.msk.bf16.mxu0 %vm3980_vm0, %v3979_v0  ;;  %v2910_v29 = vld [vmem:[%s5075_s5] ss:$0 sm:$0xff]  ;;  %v3665_v49 = vld [vmem:[%s5077_s3 + $0x8] sm:$0xff]   ;;  %v3667_v51 = vld [vmem:[%s5077_s3 + $0x10] sm:$0xff]   ;;  %vm1364_vm3 = vcmask 1043459  }
   0x2   :  { %5096 = sst [smem:[#allocation3_spill]] %s5071_s7  ;;  %s5100_s23 = sld [smem:[#allocation2_spill]]  ;;  %3375 = vmatprep.subr.bf16.mxu1 %v3979_v0  ;;  %3391 = vmatprep.mubr.msk.bf16.mxu1 %vm3980_vm0, %v3979_v0  ;;  %v2935_v41 = vld [vmem:[%s5076_s8] ss:$0 sm:$0xff]  ;;  %v3666_v50 = vld [vmem:[%s5077_s3 + $0x48] sm:$0xff]   ;;  %v3668_v52 = vld [vmem:[%s5077_s3 + $0x50] sm:$0xff]  }
   0x3   :  { %5097 = sst [smem:[#allocation4_spill]] %s5072_s6  ;;  %s5101_s28 = sld [smem:[#allocation3_spill]]  ;;  %v3663_v47 = vld [vmem:[%s5077_s3] sm:$0xff]   ;;  %v3669_v53 = vld [vmem:[%s5077_s3 + $0x18] sm:$0xff]   ;;  %v3673_v61 = vld [vmem:[%s5077_s3 + $0x28] sm:$0xff]   ;;  %vm1367_vm4 = vcmask 1044484  }
   0x4   :  { %5098 = sst [smem:[#allocation5_spill]] %s5073_s0  ;;  %s5103_s27 = sld [smem:[#allocation4_spill]]  ;;  %v3664_v48 = vld [vmem:[%s5077_s3 + $0x40] sm:$0xff]   ;;  %v3670_v58 = vld [vmem:[%s5077_s3 + $0x58] sm:$0xff]   ;;  %v3674_v62 = vld [vmem:[%s5077_s3 + $0x68] sm:$0xff]   ;;  %vm1370_vm5 = vcmask 1045509  }
   0x5   :  { %5099 = sst [smem:[#allocation6_spill]] %s5074_s1  ;;  %s5102_s24 = sld [smem:[#allocation5_spill]]  ;;  %v3671_v59 = vld [vmem:[%s5077_s3 + $0x20] sm:$0xff]   ;;  %v3675_v63 = vld [vmem:[%s5077_s3 + $0x30] sm:$0xff]   ;;  %vm1373_vm6 = vcmask 1046534   ;;  %vm1376_vm7 = vcmask 1047559  }
   0x6   :  { %s5104_s4 = sld [smem:[#allocation6_spill]]  ;;  %v3672_v60 = vld [vmem:[%s5077_s3 + $0x60] sm:$0xff]  }
   0x8   :  { %v3639_v1 = vld [vmem:[%s5100_s23] sm:$0xff]   ;;  %v3640_v2 = vld [vmem:[%s5100_s23 + $0x8] sm:$0xff]   ;;  %v3641_v3 = vld [vmem:[%s5100_s23 + $0x10] sm:$0xff]  }
   0x9   :  { %3356 = vmatpush3.bf16.msra.mxu0 %v3639_v1  ;;  %v3647_v4 = vld [vmem:[%s5101_s28] sm:$0xff]   ;;  %v3642_v5 = vld [vmem:[%s5100_s23 + $0x18] sm:$0xff]   ;;  %v3649_v6 = vld [vmem:[%s5101_s28 + $0x8] sm:$0xff]  }
   0xa   :  { %3357 = vmatprep.subr.bf16.mxu0 %v3979_v0  ;;  %3376 = vmatpush3.bf16.msra.mxu1 %v3647_v4  ;;  %v3643_v7 = vld [vmem:[%s5100_s23 + $0x20] sm:$0xff]   ;;  %v3651_v8 = vld [vmem:[%s5101_s28 + $0x10] sm:$0xff]   ;;  %v3644_v9 = vld [vmem:[%s5100_s23 + $0x28] sm:$0xff]  }
   0xb   :  { %3377 = vmatprep.subr.bf16.mxu1 %v3979_v0  ;;  %v3653_v10 = vld [vmem:[%s5101_s28 + $0x18] sm:$0xff]   ;;  %v3645_v11 = vld [vmem:[%s5100_s23 + $0x30] sm:$0xff]   ;;  %v3655_v12 = vld [vmem:[%s5101_s28 + $0x20] sm:$0xff]  }
   0xc   :  { %v3646_v13 = vld [vmem:[%s5100_s23 + $0x38] sm:$0xff]   ;;  %v61_v14 = vld [vmem:[%s5102_s24] sm:$0xff]  ;;  %v3657_v15 = vld [vmem:[%s5101_s28 + $0x28] sm:$0xff]  }
   0xd   :  { %3358 = vmatpush3.bf16.msra.mxu0 %v3640_v2  ;;  %v62_v16 = vpack.c.bf16 %v61_v14, %v61_v14  ;;  %v3648_v17 = vld [vmem:[%s5103_s27] sm:$0xff]   ;;  %v3659_v18 = vld [vmem:[%s5101_s28 + $0x30] sm:$0xff]   ;;  %v3650_v19 = vld [vmem:[%s5103_s27 + $0x8] sm:$0xff]  }
   0xe   :  { %3359 = vmatprep.subr.bf16.mxu0 %v3979_v0  ;;  %3378 = vmatpush3.bf16.msra.mxu1 %v3649_v6  ;;  %v3661_v20 = vld [vmem:[%s5101_s28 + $0x38] sm:$0xff]   ;;  %v3652_v21 = vld [vmem:[%s5103_s27 + $0x10] sm:$0xff]   ;;  %v3656_v23 = vld [vmem:[%s5103_s27 + $0x20] sm:$0xff]  }
   0xf   :  { %3379 = vmatprep.subr.bf16.mxu1 %v3979_v0  ;;  %v3654_v22 = vld [vmem:[%s5103_s27 + $0x18] sm:$0xff]   ;;  %v3658_v24 = vld [vmem:[%s5103_s27 + $0x28] sm:$0xff]   ;;  %v3660_v25 = vld [vmem:[%s5103_s27 + $0x30] sm:$0xff]  }
  0x10   :  { %v175_v26 = vld [vmem:[%s5104_s4] sm:$0xff]  ;;  %v3662_v28 = vld [vmem:[%s5103_s27 + $0x38] sm:$0xff]   ;;  %v3676_v1 = vld [vmem:[%s5077_s3 + $0x70] sm:$0xff]  }
  0x11   :  { %3360 = vmatpush3.bf16.msra.mxu0 %v3641_v3  ;;  %v176_v27 = vpack.c.bf16 %v175_v26, %v175_v26  ;;  %v3677_v2 = vld [vmem:[%s5077_s3 + $0x38] sm:$0xff]  }
  0x12   :  { %3361 = vmatprep.subr.bf16.mxu0 %v3979_v0  ;;  %3380 = vmatpush3.bf16.msra.mxu1 %v3651_v8  ;;  %v3678_v3 = vld [vmem:[%s5077_s3 + $0x78] sm:$0xff]  }
  0x13   :  { %3381 = vmatprep.subr.bf16.mxu1 %v3979_v0  ;;  %v3686_v26 = vld [vmem:[%s5077_s3 + $0xd8] sm:$0xff]  }
  0x15   :  { %3362 = vmatpush3.bf16.msra.mxu0 %v3642_v5  ;;  %v3981_v5 = vmov 1966171168  }
  0x16   :  { %3363 = vmatprep.subr.bf16.mxu0 %v3979_v0  ;;  %3382 = vmatpush3.bf16.msra.mxu1 %v3653_v10  ;;  %v406_v6 = vunpack.c.l.s4 %v3981_v5  ;;  %v3716_v5 = vld [vmem:[%s5077_s3 + $0x1d0] sm:$0xff]  }
  0x17   :  { %3383 = vmatprep.subr.bf16.mxu1 %v3979_v0 }
  0x18   :  { %v407_v8 = vunpack.c.0.s8 %v406_v6  ;;  %v3717_v6 = vld [vmem:[%s5077_s3 + $0x198] sm:$0xff]  }
  0x19   :  { %3364 = vmatpush3.bf16.msra.mxu0 %v3643_v7  ;;  %v408_v7 = vlaneseq }
  0x1a   :  { %3365 = vmatprep.subr.bf16.mxu0 %v3979_v0  ;;  %3384 = vmatpush3.bf16.msra.mxu1 %v3655_v12 }
  0x1b   :  { %3385 = vmatprep.subr.bf16.mxu1 %v3979_v0 }
  0x1d   :  { %3366 = vmatpush3.bf16.msra.mxu0 %v3644_v9  ;;  %v4275_v9 = vshrl.u32 %v408_v7, 7  ;;  %v3718_v7 = vld [vmem:[%s5077_s3 + $0x1d8] sm:$0xff]  }
  0x1e   :  { %3367 = vmatprep.subr.bf16.mxu0 %v3979_v0  ;;  %3386 = vmatpush3.bf16.msra.mxu1 %v3657_v15 }
  0x1f   :  { %3387 = vmatprep.subr.bf16.mxu1 %v3979_v0  ;;  %v4278_v10 = vsub.s32 %v407_v8, %v4275_v9  ;;  %v3719_v8 = vld [vmem:[%s5077_s3 + $0x1a0] sm:$0xff]  }
  0x21   :  { %3368 = vmatpush3.bf16.msra.mxu0 %v3645_v11 }
  0x22   :  { %3369 = vmatprep.subr.bf16.mxu0 %v3979_v0  ;;  %3388 = vmatpush3.bf16.msra.mxu1 %v3659_v18 }
  0x23   :  { %3389 = vmatprep.subr.bf16.mxu1 %v3979_v0 }
  0x25   :  { %3370 = vmatpush3.bf16.msra.mxu0 %v3646_v13 }
  0x26   :  { %3395 = vmatprep.subr.bf16.mxu0 %v3979_v0  ;;  %3390 = vmatpush3.bf16.msra.mxu1 %v3661_v20 }
  0x27   :  { %3415 = vmatprep.subr.bf16.mxu1 %v3979_v0 }
  0x28   :  { %3372 = vmatmul.mubr.bf16.vlgmr.msra.gmra.mrb[0].mxu0 %v62_v16  ;;  %v3679_v16 = vld [vmem:[%s5077_s3 + $0x80] sm:$0xff]  }
  0x29   :  { %3396 = vmatpush3.bf16.msra.mxu0 %v3648_v17  ;;  %3411 = vmatprep.mubr.msk.bf16.mxu0 %vm3980_vm0, %v3979_v0 }
  0x2a   :  { %3397 = vmatprep.subr.bf16.mxu0 %v3979_v0  ;;  %3392 = vmatmul.mubr.bf16.vlgmr.msra.gmra.mrb[0].mxu1 %v176_v27  ;;  %v3687_v27 = vld [vmem:[%s5077_s3 + $0xa0] sm:$0xff]  }
  0x2b   :  { %3431 = vmatprep.mubr.msk.bf16.mxu1 %vm3980_vm0, %v3979_v0  ;;  %3416 = vmatpush3.bf16.msra.mxu1 %v3663_v47  ;;  %v3702_v47 = vld [vmem:[%s5077_s3 + $0x158] sm:$0xff]  }
  0x2c   :  { %3417 = vmatprep.subr.bf16.mxu1 %v3979_v0 }
  0x2d   :  { %3398 = vmatpush3.bf16.msra.mxu0 %v3650_v19  ;;  %v3680_v19 = vld [vmem:[%s5077_s3 + $0xc0] sm:$0xff]  }
  0x2e   :  { %3399 = vmatprep.subr.bf16.mxu0 %v3979_v0 }
  0x2f   :  { %3418 = vmatpush3.bf16.msra.mxu1 %v3665_v49  ;;  %v3704_v49 = vld [vmem:[%s5077_s3 + $0x160] sm:$0xff]  }
  0x30   :  { %3419 = vmatprep.subr.bf16.mxu1 %v3979_v0 }
  0x31   :  { %3400 = vmatpush3.bf16.msra.mxu0 %v3652_v21  ;;  %v3681_v21 = vld [vmem:[%s5077_s3 + $0x88] sm:$0xff]  }
  0x32   :  { %3401 = vmatprep.subr.bf16.mxu0 %v3979_v0 }
  0x33   :  { %3420 = vmatpush3.bf16.msra.mxu1 %v3667_v51  ;;  %v3705_v51 = vld [vmem:[%s5077_s3 + $0x128] sm:$0xff]  }
  0x34   :  { %3421 = vmatprep.subr.bf16.mxu1 %v3979_v0 }
  0x35   :  { %3402 = vmatpush3.bf16.msra.mxu0 %v3654_v22  ;;  %v3682_v22 = vld [vmem:[%s5077_s3 + $0xc8] sm:$0xff]  }
  0x36   :  { %3403 = vmatprep.subr.bf16.mxu0 %v3979_v0 }
  0x37   :  { %3422 = vmatpush3.bf16.msra.mxu1 %v3669_v53 }
  0x38   :  { %3423 = vmatprep.subr.bf16.mxu1 %v3979_v0 }
  0x39   :  { %3404 = vmatpush3.bf16.msra.mxu0 %v3656_v23  ;;  %v3683_v23 = vld [vmem:[%s5077_s3 + $0x90] sm:$0xff]  }
  0x3a   :  { %3405 = vmatprep.subr.bf16.mxu0 %v3979_v0 }
  0x3b   :  { %3424 = vmatpush3.bf16.msra.mxu1 %v3671_v59  ;;  %v3710_v59 = vld [vmem:[%s5077_s3 + $0x178] sm:$0xff]  }
  0x3c   :  { %3425 = vmatprep.subr.bf16.mxu1 %v3979_v0 }
  0x3d   :  { %3406 = vmatpush3.bf16.msra.mxu0 %v3658_v24  ;;  %v3684_v24 = vld [vmem:[%s5077_s3 + $0xd0] sm:$0xff]  }
  0x3e   :  { %3407 = vmatprep.subr.bf16.mxu0 %v3979_v0 }
  0x3f   :  { %3426 = vmatpush3.bf16.msra.mxu1 %v3673_v61  ;;  %v3711_v61 = vld [vmem:[%s5077_s3 + $0x180] sm:$0xff]  }
  0x40   :  { %3427 = vmatprep.subr.bf16.mxu1 %v3979_v0 }
  0x41   :  { %3408 = vmatpush3.bf16.msra.mxu0 %v3660_v25  ;;  %v3685_v25 = vld [vmem:[%s5077_s3 + $0x98] sm:$0xff]  }
  0x42   :  { %3409 = vmatprep.subr.bf16.mxu0 %v3979_v0 }
  0x43   :  { %3428 = vmatpush3.bf16.msra.mxu1 %v3675_v63  ;;  %v3712_v63 = vld [vmem:[%s5077_s3 + $0x1c0] sm:$0xff]  }
  0x44   :  { %3429 = vmatprep.subr.bf16.mxu1 %v3979_v0 }
  0x45   :  { %3410 = vmatpush3.bf16.msra.mxu0 %v3662_v28  ;;  %v3688_v28 = vld [vmem:[%s5077_s3 + $0xe0] sm:$0xff]  }
  0x46   :  { %3435 = vmatprep.subr.bf16.mxu0 %v3979_v0 }
  0x47   :  { %3430 = vmatpush3.bf16.msra.mxu1 %v3677_v2  ;;  %v3713_v2 = vld [vmem:[%s5077_s3 + $0x188] sm:$0xff]  }
  0x48   :  { %3455 = vmatprep.subr.bf16.mxu1 %v3979_v0 }
  0xfb   :  { %v168_v30 = vpop.f32.mrb[0].mxu0 }
  0xfc   :  { %v169_v31 = vadd.f32 %v2910_v29, %v168_v30  ;;  %v3373_v32 = vpop.f32.mrb[1].mxu0  ;;  %v3689_v29 = vld [vmem:[%s5077_s3 + $0xa8] sm:$0xff]  }
  0xfd   :  { %v171_v33 = vpop.f32.mrb[2].mxu0  ;;  %v291_v36 = vpop.f32.mrb[0].mxu1  ;;  %v3690_v30 = vld [vmem:[%s5077_s3 + $0xe8] sm:$0xff]   ;;  %v3692_v32 = vld [vmem:[%s5077_s3 + $0xf0] sm:$0xff]  }
  0xfe   :  { %v4203_v34 = vpack.c.bf16 %v169_v31, %v169_v31  ;;  %v3374_v35 = vpop.f32.mrb[3].mxu0  ;;  %v3393_v37 = vpop.f32.mrb[1].mxu1  ;;  %v3691_v31 = vld [vmem:[%s5077_s3 + $0xb0] sm:$0xff]   ;;  %v3693_v33 = vld [vmem:[%s5077_s3 + $0xb8] sm:$0xff]  }
  0xff   :  { %v294_v38 = vpop.f32.mrb[2].mxu1 }
 0x100   :  { %3412 = vmatmul.mubr.bf16.vlgmr.msra.gmra.mrb[4].mxu0 %v4203_v34  ;;  %v3394_v39 = vpop.f32.mrb[3].mxu1  ;;  %v3695_v38 = vld [vmem:[%s5077_s3 + $0x100] sm:$0xff]  }
 0x101   :  { %3451 = vmatprep.mubr.msk.bf16.mxu0 %vm3980_vm0, %v3979_v0  ;;  %3436 = vmatpush3.bf16.msra.mxu0 %v3664_v48  ;;  %v3703_v48 = vld [vmem:[%s5077_s3 + $0x120] sm:$0xff]  }
 0x102   :  { %3437 = vmatprep.subr.bf16.mxu0 %v3979_v0 }
 0x105   :  { %3438 = vmatpush3.bf16.msra.mxu0 %v3666_v50 }
 0x106   :  { %3439 = vmatprep.subr.bf16.mxu0 %v3979_v0 }
 0x109   :  { %3440 = vmatpush3.bf16.msra.mxu0 %v3668_v52  ;;  %v3706_v52 = vld [vmem:[%s5077_s3 + $0x168] sm:$0xff]  }
 0x10a   :  { %3441 = vmatprep.subr.bf16.mxu0 %v3979_v0 }
 0x10d   :  { %3442 = vmatpush3.bf16.msra.mxu0 %v3670_v58 }
 0x10e   :  { %3443 = vmatprep.subr.bf16.mxu0 %v3979_v0 }
 0x111   :  { %3444 = vmatpush3.bf16.msra.mxu0 %v3672_v60 }
 0x112   :  { %3445 = vmatprep.subr.bf16.mxu0 %v3979_v0 }
 0x115   :  { %3446 = vmatpush3.bf16.msra.mxu0 %v3674_v62 }
 0x116   :  { %3447 = vmatprep.subr.bf16.mxu0 %v3979_v0 }
 0x119   :  { %3448 = vmatpush3.bf16.msra.mxu0 %v3676_v1 }
 0x11a   :  { %3449 = vmatprep.subr.bf16.mxu0 %v3979_v0 }
 0x11d   :  { %3450 = vmatpush3.bf16.msra.mxu0 %v3678_v3  ;;  %v3714_v3 = vld [vmem:[%s5077_s3 + $0x1c8] sm:$0xff]  }
 0x11e   :  { %3475 = vmatprep.subr.bf16.mxu0 %v3979_v0 }
 0x1d3   :  { %v379_v40 = vpop.f32.mrb[4].mxu0 }
 0x1d4   :  { %v380_v42 = vadd.f32 %v379_v40, %v291_v36  ;;  %v3413_v43 = vpop.f32.mrb[5].mxu0  ;;  %v3694_v36 = vld [vmem:[%s5077_s3 + $0xf8] sm:$0xff]   ;;  %v3696_v40 = vld [vmem:[%s5077_s3 + $0x140] sm:$0xff]  }
 0x1d5   :  { %v382_v44 = vpop.f32.mrb[6].mxu0  ;;  %v3698_v43 = vld [vmem:[%s5077_s3 + $0x148] sm:$0xff]  }
 0x1d6   :  { %v3414_v45 = vpop.f32.mrb[7].mxu0  ;;  %v392_v46 = vadd.f32 %v2935_v41, %v380_v42  ;;  %v3697_v42 = vld [vmem:[%s5077_s3 + $0x108] sm:$0xff]   ;;  %v3699_v44 = vld [vmem:[%s5077_s3 + $0x110] sm:$0xff]  }
 0x1d7   :  { %v3700_v45 = vld [vmem:[%s5077_s3 + $0x150] sm:$0xff]  }
 0x1d8   :  { %393 = vmax.xlane.f32.xlu0 %v392_v46 }
 0x265   :  { %v394_v54 = vpop.xlane.xlu0 %393 }
 0x266   :  { %v395_v55 = vsub.f32 %v392_v46, %v394_v54  ;;  %v3701_v46 = vld [vmem:[%s5077_s3 + $0x118] sm:$0xff]   ;;  %v3707_v54 = vld [vmem:[%s5077_s3 + $0x130] sm:$0xff]  }
 0x268   :  { %v396_v56 = vmul.f32 1.442695, %v395_v55  ;;  %v3708_v55 = vld [vmem:[%s5077_s3 + $0x170] sm:$0xff]  }
 0x26a   :  { %3943 = vpow2.f32 %v396_v56 }
 0x274   :  { %v3944_v57 = vpop.eup %3943 }
 0x275   :  { %398 = vadd.xlane.f32.xlu0 %v3944_v57 }
 0x302   :  { %v399_v4 = vpop.xlane.xlu0 %398 }
 0x303   :  { %3945 = vrcp.f32 %v399_v4  ;;  %v3715_v4 = vld [vmem:[%s5077_s3 + $0x190] sm:$0xff]  }
 0x30d   :  { %v3946_v11 = vpop.eup %3945 }
 0x30e   :  { %v4280_v12 = vmul.f32 %v3946_v11, %v3944_v57  ;;  %v3709_v57 = vld [vmem:[%s5077_s3 + $0x138] sm:$0xff]   ;;  %v3721_v11 = vld [vmem:[%s5077_s3 + $0x1a8] sm:$0xff]  }
 0x310   :  { %402 = vst [vmem:[%s5079_s20] sm:$0xff] %v4280_v12  ;;  %v411_v13 = vrot.slane %v4280_v12, %v4278_v10  ;;  %v404_v50 = vcombine.high %v4280_v12, %v4280_v12  ;;  %v3722_v12 = vld [vmem:[%s5077_s3 + $0x1e8] sm:$0xff]  }
 0x312   :  { %v427_v14 = vrot.slane %v411_v13, %v4278_v10  ;;  %v419_v15 = vcombine.high %v411_v13, %v411_v13  ;;  %v418_v53 = vrot.slane %v404_v50, %v4278_v10  ;;  %v3723_v13 = vld [vmem:[%s5077_s3 + $0x1b0] sm:$0xff]  }
 0x313   :  { %v3745_v50 = vld [vmem:[%s5081_s13 + $0x4] ss:$16 sps:$4 sm:$0xff]  }
 0x314   :  { %v461_v17 = vpack.c.bf16 %v427_v14, %v427_v14  ;;  %v441_v18 = vrot.slane %v419_v15, %v4278_v10  ;;  %v449_v35 = vcombine.high %v427_v14, %v427_v14  ;;  %v420_v56 = vcombine.high %v418_v53, %v418_v53  ;;  %v3724_v14 = vld [vmem:[%s5077_s3 + $0x1f0] sm:$0xff]   ;;  %v3725_v15 = vld [vmem:[%s5077_s3 + $0x1b8] sm:$0xff]  }
 0x315   :  { %v434_v58 = vrot.slane %v418_v53, %v4278_v10 }
 0x316   :  { %3432 = vmatmul.mubr.bf16.vlgmr.msra.gmra.mrb[4].mxu1 %v461_v17  ;;  %v462_v20 = vpack.c.bf16 %v441_v18, %v441_v18  ;;  %v451_v37 = vcombine.high %v441_v18, %v441_v18  ;;  %v463_v39 = vpack.c.bf16 %v449_v35, %v449_v35  ;;  %v448_v60 = vrot.slane %v420_v56, %v4278_v10  ;;  %v3720_v10 = vld [vmem:[%s5077_s3 + $0x1e0] sm:$0xff]   ;;  %v3726_v17 = vld [vmem:[%s5077_s3 + $0x1f8] sm:$0xff]   ;;  %v3741_v35 = vld [vmem:[%s5080_s10 + $0x30] sm:$0xff]  }
 0x317   :  { %3456 = vmatpush3.bf16.msra.mxu1 %v3679_v16  ;;  %3471 = vmatprep.mubr.msk.bf16.mxu1 %vm3980_vm0, %v3979_v0  ;;  %v465_v62 = vpack.c.bf16 %v434_v58, %v434_v58  ;;  %v450_v16 = vcombine.high %v434_v58, %v434_v58  ;;  %v3754_v56 = vld [vmem:[%s5081_s13 + $0x2c] ss:$16 sps:$4 sm:$0xff]   ;;  %v3758_v58 = vld [vmem:[%s5081_s13 + $0x48] ss:$16 sps:$4 sm:$0xff]  }
 0x318   :  { %3452 = vmatmul.mubr.bf16.vlgmr.msra.gmra.mrb[8].mxu0 %v462_v20  ;;  %3457 = vmatprep.subr.bf16.mxu1 %v3979_v0  ;;  %v464_v41 = vpack.c.bf16 %v451_v37, %v451_v37  ;;  %v466_v1 = vpack.c.bf16 %v448_v60, %v448_v60  ;;  %v452_v18 = vcombine.high %v448_v60, %v448_v60  ;;  %v3727_v20 = vld [vmem:[%s5078_s9] sm:$0xff]   ;;  %v3764_v60 = vld [vmem:[%s5081_s13 + $0x68] ss:$16 sps:$4 sm:$0xff]  }
 0x319   :  { %3476 = vmatpush3.bf16.msra.mxu0 %v3680_v19  ;;  %3491 = vmatprep.mubr.msk.bf16.mxu0 %vm3980_vm0, %v3979_v0  ;;  %v467_v19 = vpack.c.bf16 %v450_v16, %v450_v16 }
 0x31a   :  { %3477 = vmatprep.subr.bf16.mxu0 %v3979_v0 }
 0x31b   :  { %3458 = vmatpush3.bf16.msra.mxu1 %v3681_v21  ;;  %v468_v21 = vpack.c.bf16 %v452_v18, %v452_v18 }
 0x31c   :  { %3459 = vmatprep.subr.bf16.mxu1 %v3979_v0 }
 0x31d   :  { %3478 = vmatpush3.bf16.msra.mxu0 %v3682_v22  ;;  %v3728_v22 = vld [vmem:[%s5078_s9 + $0x8] sm:$0xff]  }
 0x31e   :  { %3479 = vmatprep.subr.bf16.mxu0 %v3979_v0 }
 0x31f   :  { %3460 = vmatpush3.bf16.msra.mxu1 %v3683_v23  ;;  %v3729_v23 = vld [vmem:[%s5078_s9 + $0x10] sm:$0xff]  }
 0x320   :  { %3461 = vmatprep.subr.bf16.mxu1 %v3979_v0 }
 0x321   :  { %3480 = vmatpush3.bf16.msra.mxu0 %v3684_v24  ;;  %v3730_v24 = vld [vmem:[%s5078_s9 + $0x18] sm:$0xff]  }
 0x322   :  { %3481 = vmatprep.subr.bf16.mxu0 %v3979_v0 }
 0x323   :  { %3462 = vmatpush3.bf16.msra.mxu1 %v3685_v25  ;;  %v3731_v25 = vld [vmem:[%s5078_s9 + $0x20] sm:$0xff]  }
 0x324   :  { %3463 = vmatprep.subr.bf16.mxu1 %v3979_v0 }
 0x325   :  { %3482 = vmatpush3.bf16.msra.mxu0 %v3686_v26  ;;  %v3732_v26 = vld [vmem:[%s5078_s9 + $0x28] sm:$0xff]  }
 0x326   :  { %3483 = vmatprep.subr.bf16.mxu0 %v3979_v0 }
 0x327   :  { %3464 = vmatpush3.bf16.msra.mxu1 %v3687_v27  ;;  %v3733_v27 = vld [vmem:[%s5078_s9 + $0x30] sm:$0xff]  }
 0x328   :  { %3465 = vmatprep.subr.bf16.mxu1 %v3979_v0 }
 0x329   :  { %3484 = vmatpush3.bf16.msra.mxu0 %v3688_v28  ;;  %v3734_v28 = vld [vmem:[%s5078_s9 + $0x38] sm:$0xff]  }
 0x32a   :  { %3485 = vmatprep.subr.bf16.mxu0 %v3979_v0 }
 0x32b   :  { %3466 = vmatpush3.bf16.msra.mxu1 %v3689_v29  ;;  %v3735_v29 = vld [vmem:[%s5080_s10] sm:$0xff]  }
 0x32c   :  { %3467 = vmatprep.subr.bf16.mxu1 %v3979_v0 }
 0x32d   :  { %3486 = vmatpush3.bf16.msra.mxu0 %v3690_v30  ;;  %v3736_v30 = vld [vmem:[%s5080_s10 + $0x8] sm:$0xff]  }
 0x32e   :  { %3487 = vmatprep.subr.bf16.mxu0 %v3979_v0 }
 0x32f   :  { %3468 = vmatpush3.bf16.msra.mxu1 %v3691_v31  ;;  %v3737_v31 = vld [vmem:[%s5080_s10 + $0x10] sm:$0xff]  }
 0x330   :  { %3469 = vmatprep.subr.bf16.mxu1 %v3979_v0 }
 0x331   :  { %3488 = vmatpush3.bf16.msra.mxu0 %v3692_v32  ;;  %v3739_v32 = vld [vmem:[%s5080_s10 + $0x20] sm:$0xff]  }
 0x332   :  { %3489 = vmatprep.subr.bf16.mxu0 %v3979_v0 }
 0x333   :  { %3470 = vmatpush3.bf16.msra.mxu1 %v3693_v33  ;;  %v3740_v33 = vld [vmem:[%s5080_s10 + $0x28] sm:$0xff]  }
 0x334   :  { %3495 = vmatprep.subr.bf16.mxu1 %v3979_v0 }
 0x335   :  { %3490 = vmatpush3.bf16.msra.mxu0 %v3694_v36  ;;  %v3742_v36 = vld [vmem:[%s5080_s10 + $0x38] sm:$0xff]  }
 0x336   :  { %3472 = vmatmul.mubr.bf16.vlgmr.msra.gmra.mrb[8].mxu1 %v463_v39  ;;  %3515 = vmatprep.subr.bf16.mxu0 %v3979_v0 }
 0x337   :  { %3496 = vmatpush3.bf16.msra.mxu1 %v3695_v38  ;;  %3511 = vmatprep.mubr.msk.bf16.mxu1 %vm3980_vm0, %v3979_v0 }
 0x338   :  { %3492 = vmatmul.mubr.bf16.vlgmr.msra.gmra.mrb[12].mxu0 %v464_v41  ;;  %3497 = vmatprep.subr.bf16.mxu1 %v3979_v0 }
 0x339   :  { %3516 = vmatpush3.bf16.msra.mxu0 %v3696_v40  ;;  %3531 = vmatprep.mubr.msk.bf16.mxu0 %vm3980_vm0, %v3979_v0 }
 0x33a   :  { %3517 = vmatprep.subr.bf16.mxu0 %v3979_v0 }
 0x33b   :  { %3498 = vmatpush3.bf16.msra.mxu1 %v3697_v42 }
 0x33c   :  { %3499 = vmatprep.subr.bf16.mxu1 %v3979_v0 }
 0x33d   :  { %3518 = vmatpush3.bf16.msra.mxu0 %v3698_v43 }
 0x33e   :  { %3519 = vmatprep.subr.bf16.mxu0 %v3979_v0 }
 0x33f   :  { %3500 = vmatpush3.bf16.msra.mxu1 %v3699_v44 }
 0x340   :  { %3501 = vmatprep.subr.bf16.mxu1 %v3979_v0 }
 0x341   :  { %3520 = vmatpush3.bf16.msra.mxu0 %v3700_v45 }
 0x342   :  { %3521 = vmatprep.subr.bf16.mxu0 %v3979_v0 }
 0x343   :  { %3502 = vmatpush3.bf16.msra.mxu1 %v3701_v46 }
 0x344   :  { %3503 = vmatprep.subr.bf16.mxu1 %v3979_v0 }
 0x345   :  { %3522 = vmatpush3.bf16.msra.mxu0 %v3702_v47 }
 0x346   :  { %3523 = vmatprep.subr.bf16.mxu0 %v3979_v0 }
 0x347   :  { %3504 = vmatpush3.bf16.msra.mxu1 %v3703_v48 }
 0x348   :  { %3505 = vmatprep.subr.bf16.mxu1 %v3979_v0 }
 0x349   :  { %3524 = vmatpush3.bf16.msra.mxu0 %v3704_v49 }
 0x34a   :  { %3525 = vmatprep.subr.bf16.mxu0 %v3979_v0 }
 0x34b   :  { %3506 = vmatpush3.bf16.msra.mxu1 %v3705_v51  ;;  %v3746_v51 = vld [vmem:[%s5081_s13 + $0x8] ss:$16 sps:$4 sm:$0xff]  }
 0x34c   :  { %3507 = vmatprep.subr.bf16.mxu1 %v3979_v0 }
 0x34d   :  { %3526 = vmatpush3.bf16.msra.mxu0 %v3706_v52  ;;  %v3748_v52 = vld [vmem:[%s5081_s13 + $0xc] ss:$16 sps:$4 sm:$0xff]  }
 0x34e   :  { %3527 = vmatprep.subr.bf16.mxu0 %v3979_v0 }
 0x34f   :  { %3508 = vmatpush3.bf16.msra.mxu1 %v3707_v54  ;;  %v3752_v54 = vld [vmem:[%s5081_s13 + $0x28] ss:$16 sps:$4 sm:$0xff]  }
 0x350   :  { %3509 = vmatprep.subr.bf16.mxu1 %v3979_v0 }
 0x351   :  { %3528 = vmatpush3.bf16.msra.mxu0 %v3708_v55  ;;  %v3982_v55 = vmov 0  }
 0x352   :  { %3529 = vmatprep.subr.bf16.mxu0 %v3979_v0 }
 0x353   :  { %3510 = vmatpush3.bf16.msra.mxu1 %v3709_v57  ;;  %v3760_v57 = vld [vmem:[%s5081_s13 + $0x4c] ss:$16 sps:$4 sm:$0xff]  }
 0x354   :  { %3535 = vmatprep.subr.bf16.mxu1 %v3979_v0 }
 0x355   :  { %3530 = vmatpush3.bf16.msra.mxu0 %v3710_v59  ;;  %v3766_v59 = vld [vmem:[%s5081_s13 + $0x6c] ss:$16 sps:$4 sm:$0xff]  }
 0x356   :  { %3512 = vmatmul.mubr.bf16.vlgmr.msra.gmra.mrb[12].mxu1 %v465_v62  ;;  %3555 = vmatprep.subr.bf16.mxu0 %v3979_v0  ;;  %v3770_v62 = vld [vmem:[%s5081_s13 + $0x88] ss:$16 sps:$4 sm:$0xff]  }
 0x357   :  { %3536 = vmatpush3.bf16.msra.mxu1 %v3711_v61  ;;  %3551 = vmatprep.mubr.msk.bf16.mxu1 %vm3980_vm0, %v3979_v0  ;;  %v3772_v61 = vld [vmem:[%s5081_s13 + $0x8c] ss:$16 sps:$4 sm:$0xff]  }
 0x358   :  { %3532 = vmatmul.mubr.bf16.vlgmr.msra.gmra.mrb[16].mxu0 %v466_v1  ;;  %3537 = vmatprep.subr.bf16.mxu1 %v3979_v0  ;;  %v3776_v1 = vld [vmem:[%s5081_s13 + $0xa8] ss:$16 sps:$4 sm:$0xff]  }
 0x359   :  { %3556 = vmatpush3.bf16.msra.mxu0 %v3712_v63  ;;  %3571 = vmatprep.mubr.msk.bf16.mxu0 %vm3980_vm0, %v3979_v0  ;;  %v3778_v63 = vld [vmem:[%s5081_s13 + $0xac] ss:$16 sps:$4 sm:$0xff]  }
 0x35a   :  { %3557 = vmatprep.subr.bf16.mxu0 %v3979_v0 }
 0x35b   :  { %3538 = vmatpush3.bf16.msra.mxu1 %v3713_v2  ;;  %v3784_v2 = vld [vmem:[%s5081_s13 + $0xcc] ss:$16 sps:$4 sm:$0xff]  }
 0x35c   :  { %3539 = vmatprep.subr.bf16.mxu1 %v3979_v0 }
 0x35d   :  { %3558 = vmatpush3.bf16.msra.mxu0 %v3714_v3  ;;  %v3782_v3 = vld [vmem:[%s5081_s13 + $0xc8] ss:$16 sps:$4 sm:$0xff]  }
 0x35e   :  { %3559 = vmatprep.subr.bf16.mxu0 %v3979_v0 }
 0x35f   :  { %3540 = vmatpush3.bf16.msra.mxu1 %v3715_v4 }
 0x360   :  { %3541 = vmatprep.subr.bf16.mxu1 %v3979_v0 }
 0x361   :  { %3560 = vmatpush3.bf16.msra.mxu0 %v3716_v5  ;;  %v3790_v5 = vld [vmem:[%s5081_s13 + $0xec] ss:$16 sps:$4 sm:$0xff]  }
 0x362   :  { %3561 = vmatprep.subr.bf16.mxu0 %v3979_v0 }
 0x363   :  { %3542 = vmatpush3.bf16.msra.mxu1 %v3717_v6 }
 0x364   :  { %3543 = vmatprep.subr.bf16.mxu1 %v3979_v0 }
 0x365   :  { %3562 = vmatpush3.bf16.msra.mxu0 %v3718_v7 }
 0x366   :  { %3563 = vmatprep.subr.bf16.mxu0 %v3979_v0 }
 0x367   :  { %3544 = vmatpush3.bf16.msra.mxu1 %v3719_v8 }
 0x368   :  { %3545 = vmatprep.subr.bf16.mxu1 %v3979_v0 }
 0x369   :  { %3564 = vmatpush3.bf16.msra.mxu0 %v3720_v10 }
 0x36a   :  { %3565 = vmatprep.subr.bf16.mxu0 %v3979_v0 }
 0x36b   :  { %3546 = vmatpush3.bf16.msra.mxu1 %v3721_v11 }
 0x36c   :  { %3547 = vmatprep.subr.bf16.mxu1 %v3979_v0 }
 0x36d   :  { %3566 = vmatpush3.bf16.msra.mxu0 %v3722_v12 }
 0x36e   :  { %3567 = vmatprep.subr.bf16.mxu0 %v3979_v0 }
 0x36f   :  { %3548 = vmatpush3.bf16.msra.mxu1 %v3723_v13 }
 0x370   :  { %3549 = vmatprep.subr.bf16.mxu1 %v3979_v0 }
 0x371   :  { %3568 = vmatpush3.bf16.msra.mxu0 %v3724_v14 }
 0x372   :  { %3569 = vmatprep.subr.bf16.mxu0 %v3979_v0 }
 0x373   :  { %3550 = vmatpush3.bf16.msra.mxu1 %v3725_v15  ;;  %v3788_v15 = vld [vmem:[%s5081_s13 + $0xe8] ss:$16 sps:$4 sm:$0xff]  }
 0x374   :  { %3575 = vmatprep.subr.bf16.mxu1 %v3979_v0 }
 0x375   :  { %3570 = vmatpush3.bf16.msra.mxu0 %v3726_v17  ;;  %v3796_v17 = vld [vmem:[%s5082_s12 + $0xc] ss:$16 sps:$4 sm:$0xff]  }
 0x376   :  { %3552 = vmatmul.mubr.bf16.vlgmr.msra.gmra.mrb[16].mxu1 %v467_v19  ;;  %3595 = vmatprep.subr.bf16.mxu0 %v3979_v0 }
 0x377   :  { %3591 = vmatprep.mubr.msk.bf16.mxu1 %vm3980_vm0, %v3979_v0  ;;  %3576 = vmatpush3.bf16.msra.mxu1 %v3735_v29  ;;  %v3808_v29 = vld [vmem:[%s5082_s12 + $0x4c] ss:$16 sps:$4 sm:$0xff]  }
 0x378   :  { %3572 = vmatmul.mubr.bf16.vlgmr.msra.gmra.mrb[20].mxu0 %v468_v21  ;;  %3577 = vmatprep.subr.bf16.mxu1 %v3979_v0  ;;  %v1565_v21 = vld [vmem:[%s5104_s4] sm:$0xff] }
 0x379   :  { %3596 = vmatpush3.bf16.msra.mxu0 %v3727_v20  ;;  %3611 = vmatprep.mubr.msk.bf16.mxu0 %vm3980_vm0, %v3979_v0 }
 0x37a   :  { %3597 = vmatprep.subr.bf16.mxu0 %v3979_v0 }
 0x37b   :  { %3578 = vmatpush3.bf16.msra.mxu1 %v3736_v30  ;;  %v3806_v30 = vld [vmem:[%s5082_s12 + $0x48] ss:$16 sps:$4 sm:$0xff]  }
 0x37c   :  { %3579 = vmatprep.subr.bf16.mxu1 %v3979_v0 }
 0x37d   :  { %3598 = vmatpush3.bf16.msra.mxu0 %v3728_v22 }
 0x37e   :  { %3599 = vmatprep.subr.bf16.mxu0 %v3979_v0 }
 0x37f   :  { %3580 = vmatpush3.bf16.msra.mxu1 %v3737_v31  ;;  %v3814_v31 = vld [vmem:[%s5082_s12 + $0x6c] ss:$16 sps:$4 sm:$0xff]  }
 0x380   :  { %3581 = vmatprep.subr.bf16.mxu1 %v3979_v0 }
 0x381   :  { %3600 = vmatpush3.bf16.msra.mxu0 %v3729_v23 }
 0x382   :  { %3601 = vmatprep.subr.bf16.mxu0 %v3979_v0 }
 0x385   :  { %3602 = vmatpush3.bf16.msra.mxu0 %v3730_v24  ;;  %v3794_v24 = vld [vmem:[%s5082_s12 + $0x8] ss:$16 sps:$4 sm:$0xff]  }
 0x386   :  { %3603 = vmatprep.subr.bf16.mxu0 %v3979_v0 }
 0x389   :  { %3604 = vmatpush3.bf16.msra.mxu0 %v3731_v25  ;;  %v4627_v25 = vpack.c.bf16 %v1565_v21, %v1565_v21  ;;  %v3779_v21 = vld [vmem:[%s5081_s13 + $0xc0] ss:$16 sps:$4 sm:$0xff]  }
 0x38a   :  { %3605 = vmatprep.subr.bf16.mxu0 %v3979_v0 }
 0x38d   :  { %3606 = vmatpush3.bf16.msra.mxu0 %v3732_v26  ;;  %v3802_v26 = vld [vmem:[%s5082_s12 + $0x2c] ss:$16 sps:$4 sm:$0xff]  }
 0x38e   :  { %3607 = vmatprep.subr.bf16.mxu0 %v3979_v0 }
 0x391   :  { %3608 = vmatpush3.bf16.msra.mxu0 %v3733_v27 }
 0x392   :  { %3609 = vmatprep.subr.bf16.mxu0 %v3979_v0 }
 0x395   :  { %3610 = vmatpush3.bf16.msra.mxu0 %v3734_v28  ;;  %v3800_v28 = vld [vmem:[%s5082_s12 + $0x28] ss:$16 sps:$4 sm:$0xff]  }
 0x396   :  { %1834 = vmatprep.subr.bf16.mxu0 %v3748_v52 }
 0x398   :  { %3612 = vmatmul.mubr.bf16.vlgmr.msra.gmra.mrb[24].mxu0 %v4203_v34  ;;  %v3738_v34 = vld [vmem:[%s5080_s10 + $0x18] sm:$0xff]  }
 0x399   :  { %3582 = vmatpush3.bf16.msra.mxu1 %v3738_v34  ;;  %1866 = vmatprep.mubr.bf16.mxu0 %v3982_v55  ;;  %v3812_v34 = vld [vmem:[%s5082_s12 + $0x68] ss:$16 sps:$4 sm:$0xff]  }
 0x39a   :  { %3583 = vmatprep.subr.bf16.mxu1 %v3979_v0  ;;  %1835 = vmatpush1.bf16.msra.mxu0 %v3746_v51 }
 0x39b   :  { %1836 = vmatprep.subr.bf16.mxu0 %v3754_v56 }
 0x39d   :  { %3584 = vmatpush3.bf16.msra.mxu1 %v3739_v32  ;;  %v3820_v32 = vld [vmem:[%s5082_s12 + $0x8c] ss:$16 sps:$4 sm:$0xff]  }
 0x39e   :  { %3585 = vmatprep.subr.bf16.mxu1 %v3979_v0  ;;  %1837 = vmatpush1.bf16.msra.mxu0 %v3752_v54 }
 0x39f   :  { %1838 = vmatprep.subr.bf16.mxu0 %v3760_v57 }
 0x3a1   :  { %3586 = vmatpush3.bf16.msra.mxu1 %v3740_v33  ;;  %v3818_v33 = vld [vmem:[%s5082_s12 + $0x88] ss:$16 sps:$4 sm:$0xff]  }
 0x3a2   :  { %3587 = vmatprep.subr.bf16.mxu1 %v3979_v0  ;;  %1839 = vmatpush1.bf16.msra.mxu0 %v3758_v58 }
 0x3a3   :  { %1840 = vmatprep.subr.bf16.mxu0 %v3766_v59 }
 0x3a5   :  { %3588 = vmatpush3.bf16.msra.mxu1 %v3741_v35  ;;  %v3826_v35 = vld [vmem:[%s5082_s12 + $0xac] ss:$16 sps:$4 sm:$0xff]  }
 0x3a6   :  { %3589 = vmatprep.subr.bf16.mxu1 %v3979_v0  ;;  %1841 = vmatpush1.bf16.msra.mxu0 %v3764_v60 }
 0x3a7   :  { %1842 = vmatprep.subr.bf16.mxu0 %v3772_v61 }
 0x3a9   :  { %3590 = vmatpush3.bf16.msra.mxu1 %v3742_v36  ;;  %v3824_v36 = vld [vmem:[%s5082_s12 + $0xa8] ss:$16 sps:$4 sm:$0xff]  }
 0x3aa   :  { %1793 = vmatprep.subr.bf16.mxu1 %v3745_v50  ;;  %1843 = vmatpush1.bf16.msra.mxu0 %v3770_v62 }
 0x3ab   :  { %1844 = vmatprep.subr.bf16.mxu0 %v3778_v63 }
 0x3ae   :  { %1845 = vmatpush1.bf16.msra.mxu0 %v3776_v1 }
 0x3af   :  { %1846 = vmatprep.subr.bf16.mxu0 %v3784_v2 }
 0x3b2   :  { %1847 = vmatpush1.bf16.msra.mxu0 %v3782_v3 }
 0x3b3   :  { %1848 = vmatprep.subr.bf16.mxu0 %v3790_v5 }
 0x3b6   :  { %1849 = vmatpush1.bf16.msra.mxu0 %v3788_v15  ;;  %v3761_v15 = vld [vmem:[%s5081_s13 + $0x60] ss:$16 sps:$4 sm:$0xff]  }
 0x3b7   :  { %2076 = vmatprep.subr.bf16.mxu0 %v3796_v17  ;;  %v3767_v17 = vld [vmem:[%s5081_s13 + $0x80] ss:$16 sps:$4 sm:$0xff]  }
 0x3b9   :  { %1867 = vmatmul.mubr.bf16.vlgmr.msra.gmra.mrb[28].mxu0 %v4627_v25 }
 0x3ba   :  { %2077 = vmatpush1.bf16.msra.mxu0 %v3794_v24  ;;  %2108 = vmatprep.mubr.bf16.mxu0 %v3982_v55 }
 0x3bb   :  { %2078 = vmatprep.subr.bf16.mxu0 %v3802_v26 }
 0x3be   :  { %2079 = vmatpush1.bf16.msra.mxu0 %v3800_v28  ;;  %v3785_v28 = vld [vmem:[%s5081_s13 + $0xe0] ss:$16 sps:$4 sm:$0xff]  }
 0x3bf   :  { %2080 = vmatprep.subr.bf16.mxu0 %v3808_v29  ;;  %v3793_v29 = vld [vmem:[%s5082_s12 + $0x4] ss:$16 sps:$4 sm:$0xff]  }
 0x3c2   :  { %2081 = vmatpush1.bf16.msra.mxu0 %v3806_v30  ;;  %v3791_v30 = vld [vmem:[%s5082_s12] ss:$16 sps:$4 sm:$0xff]  }
 0x3c3   :  { %2082 = vmatprep.subr.bf16.mxu0 %v3814_v31  ;;  %v3799_v31 = vld [vmem:[%s5082_s12 + $0x24] ss:$16 sps:$4 sm:$0xff]  }
 0x3c6   :  { %2083 = vmatpush1.bf16.msra.mxu0 %v3812_v34  ;;  %v3797_v34 = vld [vmem:[%s5082_s12 + $0x20] ss:$16 sps:$4 sm:$0xff]  }
 0x3c7   :  { %2084 = vmatprep.subr.bf16.mxu0 %v3820_v32  ;;  %v3805_v32 = vld [vmem:[%s5082_s12 + $0x44] ss:$16 sps:$4 sm:$0xff]  }
 0x3ca   :  { %2085 = vmatpush1.bf16.msra.mxu0 %v3818_v33  ;;  %v3803_v33 = vld [vmem:[%s5082_s12 + $0x40] ss:$16 sps:$4 sm:$0xff]  }
 0x3cb   :  { %2086 = vmatprep.subr.bf16.mxu0 %v3826_v35  ;;  %v3809_v35 = vld [vmem:[%s5082_s12 + $0x60] ss:$16 sps:$4 sm:$0xff]  }
 0x3ce   :  { %2087 = vmatpush1.bf16.msra.mxu0 %v3824_v36  ;;  %v3817_v36 = vld [vmem:[%s5082_s12 + $0x84] ss:$16 sps:$4 sm:$0xff]  }
 0x3e9   :  { %v679_v37 = vpop.f32.mrb[4].mxu1 }
 0x3ea   :  { %v3433_v38 = vpop.f32.mrb[5].mxu1  ;;  %v1317_v41 = vpack.c.bf16 %v679_v37, %v679_v37 }
 0x3eb   :  { %v682_v39 = vpop.f32.mrb[6].mxu1  ;;  %v767_v40 = vpop.f32.mrb[8].mxu0 }
 0x3ec   :  { %v1318_v42 = vpack.c.bf16 %v767_v40, %v767_v40  ;;  %v3434_v43 = vpop.f32.mrb[7].mxu1  ;;  %v3453_v44 = vpop.f32.mrb[9].mxu0  ;;  %v1349_v48 = vunpack.c.l.b16 %v1317_v41 }
 0x3ed   :  { %v770_v45 = vpop.f32.mrb[10].mxu0 }
 0x3ee   :  { %v1350_v46 = vunpack.c.l.b16 %v1318_v42  ;;  %v3454_v47 = vpop.f32.mrb[11].mxu0 }
 0x3f0   :  { %v1357_v49 = vrot.slane %v1350_v46, 7 }
 0x3f2   :  { %v1359_v53 = vsel %vm1358_vm1, %v1357_v49, %v1349_v48 }
 0x409   :  { %v855_v4 = vpop.f32.mrb[8].mxu1 }
 0x40a   :  { %v1319_v6 = vpack.c.bf16 %v855_v4, %v855_v4  ;;  %v3473_v7 = vpop.f32.mrb[9].mxu1 }
 0x40b   :  { %v858_v8 = vpop.f32.mrb[10].mxu1  ;;  %v943_v10 = vpop.f32.mrb[12].mxu0  ;;  %v3743_v7 = vld [vmem:[%s5081_s13] ss:$16 sps:$4 sm:$0xff]  }
 0x40c   :  { %v1351_v11 = vunpack.c.l.b16 %v1319_v6  ;;  %v1320_v12 = vpack.c.bf16 %v943_v10, %v943_v10  ;;  %v3474_v13 = vpop.f32.mrb[11].mxu1  ;;  %v3493_v14 = vpop.f32.mrb[13].mxu0  ;;  %v3751_v10 = vld [vmem:[%s5081_s13 + $0x24] ss:$16 sps:$4 sm:$0xff]  }
 0x40d   :  { %v946_v16 = vpop.f32.mrb[14].mxu0  ;;  %v3755_v13 = vld [vmem:[%s5081_s13 + $0x40] ss:$16 sps:$4 sm:$0xff]   ;;  %v3763_v14 = vld [vmem:[%s5081_s13 + $0x64] ss:$16 sps:$4 sm:$0xff]  }
 0x40e   :  { %v1360_v18 = vrot.slane %v1351_v11, 6  ;;  %v1352_v19 = vunpack.c.l.b16 %v1320_v12  ;;  %v3494_v20 = vpop.f32.mrb[15].mxu0  ;;  %v3749_v11 = vld [vmem:[%s5081_s13 + $0x20] ss:$16 sps:$4 sm:$0xff]   ;;  %v3757_v12 = vld [vmem:[%s5081_s13 + $0x44] ss:$16 sps:$4 sm:$0xff]  }
 0x40f   :  { %v3769_v16 = vld [vmem:[%s5081_s13 + $0x84] ss:$16 sps:$4 sm:$0xff]  }
 0x410   :  { %v1362_v22 = vsel %vm1361_vm2, %v1360_v18, %v1359_v53  ;;  %v1363_v23 = vrot.slane %v1352_v19, 5  ;;  %v3775_v18 = vld [vmem:[%s5081_s13 + $0xa4] ss:$16 sps:$4 sm:$0xff]   ;;  %v3773_v19 = vld [vmem:[%s5081_s13 + $0xa0] ss:$16 sps:$4 sm:$0xff]  }
 0x411   :  { %v3781_v20 = vld [vmem:[%s5081_s13 + $0xc4] ss:$16 sps:$4 sm:$0xff]  }
 0x412   :  { %v1365_v27 = vsel %vm1364_vm3, %v1363_v23, %v1362_v22  ;;  %v3787_v23 = vld [vmem:[%s5081_s13 + $0xe4] ss:$16 sps:$4 sm:$0xff]  }
 0x429   :  { %v1031_v37 = vpop.f32.mrb[12].mxu1 }
 0x42a   :  { %v1321_v38 = vpack.c.bf16 %v1031_v37, %v1031_v37  ;;  %v3513_v39 = vpop.f32.mrb[13].mxu1  ;;  %v3815_v37 = vld [vmem:[%s5082_s12 + $0x80] ss:$16 sps:$4 sm:$0xff]  }
 0x42b   :  { %v1034_v40 = vpop.f32.mrb[14].mxu1  ;;  %v1119_v41 = vpop.f32.mrb[16].mxu0  ;;  %v3821_v39 = vld [vmem:[%s5082_s12 + $0xa0] ss:$16 sps:$4 sm:$0xff]  }
 0x42c   :  { %v1353_v42 = vunpack.c.l.b16 %v1321_v38  ;;  %v1322_v43 = vpack.c.bf16 %v1119_v41, %v1119_v41  ;;  %v3514_v44 = vpop.f32.mrb[15].mxu1  ;;  %v3533_v45 = vpop.f32.mrb[17].mxu0  ;;  %v3823_v38 = vld [vmem:[%s5082_s12 + $0xa4] ss:$16 sps:$4 sm:$0xff]   ;;  %v3832_v41 = vld [vmem:[%s5082_s12 + $0xcc] ss:$16 sps:$4 sm:$0xff]  }
 0x42d   :  { %v1122_v46 = vpop.f32.mrb[18].mxu0  ;;  %v3829_v40 = vld [vmem:[%s5082_s12 + $0xc4] ss:$16 sps:$4 sm:$0xff]   ;;  %2088 = vmatprep.subr.bf16.mxu0 %v3832_v41  ;;  %v3838_v45 = vld [vmem:[%s5082_s12 + $0xec] ss:$16 sps:$4 sm:$0xff]  }
 0x42e   :  { %v1366_v47 = vrot.slane %v1353_v42, 4  ;;  %v1354_v48 = vunpack.c.l.b16 %v1322_v43  ;;  %v3534_v49 = vpop.f32.mrb[19].mxu0  ;;  %v3827_v42 = vld [vmem:[%s5082_s12 + $0xc0] ss:$16 sps:$4 sm:$0xff]   ;;  %v3830_v43 = vld [vmem:[%s5082_s12 + $0xc8] ss:$16 sps:$4 sm:$0xff]  }
 0x42f   :  { %2089 = vmatpush1.bf16.msra.mxu0 %v3830_v43  ;;  %v3835_v44 = vld [vmem:[%s5082_s12 + $0xe4] ss:$16 sps:$4 sm:$0xff]   ;;  %v3833_v46 = vld [vmem:[%s5082_s12 + $0xe0] ss:$16 sps:$4 sm:$0xff]   ;;  %v3844_v49 = vld [vmem:[%s5081_s13 + $0x10c] ss:$16 sps:$4 sm:$0xff]  }
 0x430   :  { %v1368_v50 = vsel %vm1367_vm4, %v1366_v47, %v1365_v27  ;;  %v1369_v51 = vrot.slane %v1354_v48, 3  ;;  %v3836_v47 = vld [vmem:[%s5082_s12 + $0xe8] ss:$16 sps:$4 sm:$0xff]   ;;  %2090 = vmatprep.subr.bf16.mxu0 %v3838_v45  ;;  %v3841_v48 = vld [vmem:[%s5081_s13 + $0x104] ss:$16 sps:$4 sm:$0xff]  }
 0x431   :  { %v3890_v41 = vld [vmem:[%s5082_s12 + $0x108] ss:$16 sps:$4 sm:$0xff]   ;;  %v3898_v43 = vld [vmem:[%s5082_s12 + $0x12c] ss:$16 sps:$4 sm:$0xff]  }
 0x432   :  { %v1371_v52 = vsel %vm1370_vm5, %v1369_v51, %v1368_v50  ;;  %v3896_v45 = vld [vmem:[%s5082_s12 + $0x128] ss:$16 sps:$4 sm:$0xff]  }
 0x433   :  { %2091 = vmatpush1.bf16.msra.mxu0 %v3836_v47  ;;  %v3899_v47 = vld [vmem:[%s5082_s12 + $0x140] ss:$16 sps:$4 sm:$0xff]  }
 0x434   :  { %2442 = vmatprep.subr.bf16.mxu0 %v3844_v49  ;;  %v3907_v49 = vld [vmem:[%s5082_s12 + $0x164] ss:$16 sps:$4 sm:$0xff]  }
 0x449   :  { %v1207_v53 = vpop.f32.mrb[16].mxu1 }
 0x44a   :  { %v1323_v54 = vpack.c.bf16 %v1207_v53, %v1207_v53  ;;  %v3553_v56 = vpop.f32.mrb[17].mxu1 }
 0x44b   :  { %v1210_v57 = vpop.f32.mrb[18].mxu1  ;;  %v1295_v58 = vpop.f32.mrb[20].mxu0  ;;  %v3016_v56 = vld [vmem:[%s5083_s11] ss:$0 sm:$0xff] }
 0x44c   :  { %v1355_v59 = vunpack.c.l.b16 %v1323_v54  ;;  %v1324_v60 = vpack.c.bf16 %v1295_v58, %v1295_v58  ;;  %v3554_v61 = vpop.f32.mrb[19].mxu1  ;;  %v3573_v62 = vpop.f32.mrb[21].mxu0 }
 0x44d   :  { %v1298_v63 = vpop.f32.mrb[22].mxu0 }
 0x44e   :  { %v1372_v1 = vrot.slane %v1355_v59, 2  ;;  %v1356_v2 = vunpack.c.l.b16 %v1324_v60  ;;  %v3574_v3 = vpop.f32.mrb[23].mxu0  ;;  %v3839_v63 = vld [vmem:[%s5081_s13 + $0x100] ss:$16 sps:$4 sm:$0xff]  }
 0x44f   :  { %v3847_v3 = vld [vmem:[%s5081_s13 + $0x124] ss:$16 sps:$4 sm:$0xff]  }
 0x450   :  { %v1374_v4 = vsel %vm1373_vm6, %v1372_v1, %v1371_v52  ;;  %v1375_v5 = vrot.slane %v1356_v2, 1  ;;  %v3842_v1 = vld [vmem:[%s5081_s13 + $0x108] ss:$16 sps:$4 sm:$0xff]  }
 0x452   :  { %v1377_v6 = vsel %vm1376_vm7, %v1375_v5, %v1374_v4  ;;  %v3850_v4 = vld [vmem:[%s5081_s13 + $0x12c] ss:$16 sps:$4 sm:$0xff]   ;;  %v3845_v5 = vld [vmem:[%s5081_s13 + $0x120] ss:$16 sps:$4 sm:$0xff]  }
 0x453   :  { %v1378_v8 = vpack.c.b16 %v1377_v6, %v1377_v6  ;;  %v3848_v6 = vld [vmem:[%s5081_s13 + $0x128] ss:$16 sps:$4 sm:$0xff]  }
 0x455   :  { %3592 = vmatmul.mubr.bf16.vlgmr.msra.gmra.mrb[20].mxu1 %v1378_v8  ;;  %v3856_v8 = vld [vmem:[%s5081_s13 + $0x14c] ss:$16 sps:$4 sm:$0xff]  }
 0x456   :  { %1794 = vmatpush1.bf16.msra.mxu1 %v3743_v7  ;;  %1825 = vmatprep.mubr.bf16.mxu1 %v3982_v55  ;;  %v3853_v7 = vld [vmem:[%s5081_s13 + $0x144] ss:$16 sps:$4 sm:$0xff]  }
 0x457   :  { %1795 = vmatprep.subr.bf16.mxu1 %v3751_v10  ;;  %v3851_v10 = vld [vmem:[%s5081_s13 + $0x140] ss:$16 sps:$4 sm:$0xff]  }
 0x45a   :  { %1796 = vmatpush1.bf16.msra.mxu1 %v3749_v11  ;;  %v3854_v11 = vld [vmem:[%s5081_s13 + $0x148] ss:$16 sps:$4 sm:$0xff]  }
 0x45b   :  { %1797 = vmatprep.subr.bf16.mxu1 %v3757_v12  ;;  %v3859_v12 = vld [vmem:[%s5081_s13 + $0x164] ss:$16 sps:$4 sm:$0xff]  }
 0x45e   :  { %1798 = vmatpush1.bf16.msra.mxu1 %v3755_v13  ;;  %v3862_v13 = vld [vmem:[%s5081_s13 + $0x16c] ss:$16 sps:$4 sm:$0xff]  }
 0x45f   :  { %1799 = vmatprep.subr.bf16.mxu1 %v3763_v14  ;;  %v3857_v14 = vld [vmem:[%s5081_s13 + $0x160] ss:$16 sps:$4 sm:$0xff]  }
 0x462   :  { %1800 = vmatpush1.bf16.msra.mxu1 %v3761_v15  ;;  %v3860_v15 = vld [vmem:[%s5081_s13 + $0x168] ss:$16 sps:$4 sm:$0xff]  }
 0x463   :  { %1801 = vmatprep.subr.bf16.mxu1 %v3769_v16 }
 0x466   :  { %1802 = vmatpush1.bf16.msra.mxu1 %v3767_v17 }
 0x467   :  { %1803 = vmatprep.subr.bf16.mxu1 %v3775_v18 }
 0x46a   :  { %1804 = vmatpush1.bf16.msra.mxu1 %v3773_v19 }
 0x46b   :  { %v4701_v22 = vpop.f32.mrb[24].mxu0  ;;  %1805 = vmatprep.subr.bf16.mxu1 %v3781_v20  ;;  %v3865_v20 = vld [vmem:[%s5081_s13 + $0x184] ss:$16 sps:$4 sm:$0xff]  }
 0x46c   :  { %v3613_v24 = vpop.f32.mrb[25].mxu0 }
 0x46d   :  { %v1553_v26 = vpop.f32.mrb[26].mxu0  ;;  %v3871_v24 = vld [vmem:[%s5081_s13 + $0x1a4] ss:$16 sps:$4 sm:$0xff]  }
 0x46e   :  { %v3614_v27 = vpop.f32.mrb[27].mxu0  ;;  %1806 = vmatpush1.bf16.msra.mxu1 %v3779_v21  ;;  %v3863_v21 = vld [vmem:[%s5081_s13 + $0x180] ss:$16 sps:$4 sm:$0xff]  }
 0x46f   :  { %1807 = vmatprep.subr.bf16.mxu1 %v3787_v23  ;;  %v3866_v23 = vld [vmem:[%s5081_s13 + $0x188] ss:$16 sps:$4 sm:$0xff]   ;;  %v3869_v26 = vld [vmem:[%s5081_s13 + $0x1a0] ss:$16 sps:$4 sm:$0xff]   ;;  %v3874_v27 = vld [vmem:[%s5081_s13 + $0x1ac] ss:$16 sps:$4 sm:$0xff]  }
 0x472   :  { %1808 = vmatpush1.bf16.msra.mxu1 %v3785_v28  ;;  %v3872_v28 = vld [vmem:[%s5081_s13 + $0x1a8] ss:$16 sps:$4 sm:$0xff]  }
 0x473   :  { %2035 = vmatprep.subr.bf16.mxu1 %v3793_v29  ;;  %v3877_v29 = vld [vmem:[%s5081_s13 + $0x1c4] ss:$16 sps:$4 sm:$0xff]  }
 0x475   :  { %1826 = vmatmul.mubr.bf16.vlgmr.msra.gmra.mrb[24].mxu1 %v4627_v25  ;;  %v3811_v25 = vld [vmem:[%s5082_s12 + $0x64] ss:$16 sps:$4 sm:$0xff]  }
 0x476   :  { %2036 = vmatpush1.bf16.msra.mxu1 %v3791_v30  ;;  %2067 = vmatprep.mubr.bf16.mxu1 %v3982_v55  ;;  %v3875_v30 = vld [vmem:[%s5081_s13 + $0x1c0] ss:$16 sps:$4 sm:$0xff]  }
 0x477   :  { %2037 = vmatprep.subr.bf16.mxu1 %v3799_v31  ;;  %v3880_v31 = vld [vmem:[%s5081_s13 + $0x1cc] ss:$16 sps:$4 sm:$0xff]  }
 0x47a   :  { %2038 = vmatpush1.bf16.msra.mxu1 %v3797_v34  ;;  %v3878_v34 = vld [vmem:[%s5081_s13 + $0x1c8] ss:$16 sps:$4 sm:$0xff]  }
 0x47b   :  { %2039 = vmatprep.subr.bf16.mxu1 %v3805_v32  ;;  %v3883_v32 = vld [vmem:[%s5081_s13 + $0x1e4] ss:$16 sps:$4 sm:$0xff]  }
 0x47e   :  { %2040 = vmatpush1.bf16.msra.mxu1 %v3803_v33  ;;  %v3881_v33 = vld [vmem:[%s5081_s13 + $0x1e0] ss:$16 sps:$4 sm:$0xff]  }
 0x47f   :  { %2041 = vmatprep.subr.bf16.mxu1 %v3811_v25  ;;  %v3886_v25 = vld [vmem:[%s5081_s13 + $0x1ec] ss:$16 sps:$4 sm:$0xff]  }
 0x482   :  { %2042 = vmatpush1.bf16.msra.mxu1 %v3809_v35  ;;  %v3884_v35 = vld [vmem:[%s5081_s13 + $0x1e8] ss:$16 sps:$4 sm:$0xff]  }
 0x483   :  { %2043 = vmatprep.subr.bf16.mxu1 %v3817_v36  ;;  %v3084_v36 = vld [vmem:[%s5104_s4 + $0x8] sm:$0xff] }
 0x486   :  { %2044 = vmatpush1.bf16.msra.mxu1 %v3815_v37  ;;  %v2207_v37 = vpack.c.bf16 %v3084_v36, %v3084_v36 }
 0x487   :  { %2045 = vmatprep.subr.bf16.mxu1 %v3823_v38  ;;  %v3889_v38 = vld [vmem:[%s5082_s12 + $0x104] ss:$16 sps:$4 sm:$0xff]  }
 0x48a   :  { %2046 = vmatpush1.bf16.msra.mxu1 %v3821_v39  ;;  %v3892_v39 = vld [vmem:[%s5082_s12 + $0x10c] ss:$16 sps:$4 sm:$0xff]  }
 0x48b   :  { %2047 = vmatprep.subr.bf16.mxu1 %v3829_v40  ;;  %v3887_v40 = vld [vmem:[%s5082_s12 + $0x100] ss:$16 sps:$4 sm:$0xff]  }
 0x48c   :  { %v4777_v50 = vpop.f32.mrb[28].mxu0 }
 0x48d   :  { %v4779_v51 = vpop.f32.mrb[29].mxu0 }
 0x48e   :  { %2048 = vmatpush1.bf16.msra.mxu1 %v3827_v42  ;;  %v1872_v52 = vpop.f32.mrb[30].mxu0  ;;  %v3895_v42 = vld [vmem:[%s5082_s12 + $0x124] ss:$16 sps:$4 sm:$0xff]  }
 0x48f   :  { %2049 = vmatprep.subr.bf16.mxu1 %v3835_v44  ;;  %v1873_v53 = vpop.f32.mrb[31].mxu0  ;;  %v3893_v44 = vld [vmem:[%s5082_s12 + $0x120] ss:$16 sps:$4 sm:$0xff]   ;;  %v3910_v52 = vld [vmem:[%s5082_s12 + $0x16c] ss:$16 sps:$4 sm:$0xff]  }
 0x490   :  { %v3905_v53 = vld [vmem:[%s5082_s12 + $0x160] ss:$16 sps:$4 sm:$0xff]  }
 0x492   :  { %2050 = vmatpush1.bf16.msra.mxu1 %v3833_v46  ;;  %v3901_v46 = vld [vmem:[%s5082_s12 + $0x144] ss:$16 sps:$4 sm:$0xff]  }
 0x493   :  { %2401 = vmatprep.subr.bf16.mxu1 %v3841_v48  ;;  %v3902_v48 = vld [vmem:[%s5082_s12 + $0x148] ss:$16 sps:$4 sm:$0xff]  }
 0x528   :  { %v1462_v54 = vpop.f32.mrb[20].mxu1 }
 0x529   :  { %v1551_v57 = vadd.f32 %v4701_v22, %v1462_v54  ;;  %v3593_v58 = vpop.f32.mrb[21].mxu1  ;;  %v3868_v22 = vld [vmem:[%s5081_s13 + $0x18c] ss:$16 sps:$4 sm:$0xff]   ;;  %v3908_v54 = vld [vmem:[%s5082_s12 + $0x168] ss:$16 sps:$4 sm:$0xff]  }
 0x52a   :  { %v1465_v59 = vpop.f32.mrb[22].mxu1  ;;  %v3911_v58 = vld [vmem:[%s5082_s12 + $0x180] ss:$16 sps:$4 sm:$0xff]  }
 0x52b   :  { %v1563_v60 = vadd.f32 %v3016_v56, %v1551_v57  ;;  %v3594_v61 = vpop.f32.mrb[23].mxu1  ;;  %v3913_v56 = vld [vmem:[%s5082_s12 + $0x184] ss:$16 sps:$4 sm:$0xff]   ;;  %v3916_v57 = vld [vmem:[%s5082_s12 + $0x18c] ss:$16 sps:$4 sm:$0xff]  }
 0x52c   :  { %v3914_v59 = vld [vmem:[%s5082_s12 + $0x188] ss:$16 sps:$4 sm:$0xff]   ;;  %v3917_v61 = vld [vmem:[%s5082_s12 + $0x1a0] ss:$16 sps:$4 sm:$0xff]  }
 0x52d   :  { %v1564_v62 = vmax.f32 %v1563_v60, 0.0  ;;  %v3919_v60 = vld [vmem:[%s5082_s12 + $0x1a4] ss:$16 sps:$4 sm:$0xff]  }
 0x52f   :  { %v1567_v2 = vpack.c.bf16 %v1564_v62, %v1564_v62  ;;  %v3922_v62 = vld [vmem:[%s5082_s12 + $0x1ac] ss:$16 sps:$4 sm:$0xff]  }
 0x531   :  { %2068 = vmatmul.mubr.bf16.vlgmr.msra.gmra.mrb[28].mxu1 %v1567_v2  ;;  %2109 = vmatmul.mubr.bf16.vlgmr.msra.gmra.mrb[32].mxu0 %v1567_v2  ;;  %v3928_v2 = vld [vmem:[%s5082_s12 + $0x1cc] ss:$16 sps:$4 sm:$0xff]  }
 0x532   :  { %2402 = vmatpush1.bf16.msra.mxu1 %v3839_v63  ;;  %2443 = vmatpush1.bf16.msra.mxu0 %v3842_v1  ;;  %v3920_v63 = vld [vmem:[%s5082_s12 + $0x1a8] ss:$16 sps:$4 sm:$0xff]   ;;  %v3925_v1 = vld [vmem:[%s5082_s12 + $0x1c4] ss:$16 sps:$4 sm:$0xff]  }
 0x533   :  { %2403 = vmatprep.subr.bf16.mxu1 %v3847_v3  ;;  %2444 = vmatprep.subr.bf16.mxu0 %v3850_v4  ;;  %v3923_v3 = vld [vmem:[%s5082_s12 + $0x1c0] ss:$16 sps:$4 sm:$0xff]   ;;  %v3926_v4 = vld [vmem:[%s5082_s12 + $0x1c8] ss:$16 sps:$4 sm:$0xff]  }
 0x534   :  { %2433 = vmatprep.mubr.bf16.mxu1 %v3982_v55  ;;  %2474 = vmatprep.mubr.bf16.mxu0 %v3982_v55 }
 0x536   :  { %2404 = vmatpush1.bf16.msra.mxu1 %v3845_v5  ;;  %2445 = vmatpush1.bf16.msra.mxu0 %v3848_v6  ;;  %v3931_v5 = vld [vmem:[%s5082_s12 + $0x1e4] ss:$16 sps:$4 sm:$0xff]   ;;  %v3934_v6 = vld [vmem:[%s5082_s12 + $0x1ec] ss:$16 sps:$4 sm:$0xff]  }
 0x537   :  { %2405 = vmatprep.subr.bf16.mxu1 %v3853_v7  ;;  %2446 = vmatprep.subr.bf16.mxu0 %v3856_v8  ;;  %v3929_v7 = vld [vmem:[%s5082_s12 + $0x1e0] ss:$16 sps:$4 sm:$0xff]   ;;  %v3932_v8 = vld [vmem:[%s5082_s12 + $0x1e8] ss:$16 sps:$4 sm:$0xff]  }
 0x53a   :  { %2406 = vmatpush1.bf16.msra.mxu1 %v3851_v10  ;;  %2447 = vmatpush1.bf16.msra.mxu0 %v3854_v11  ;;  %v2121_v10 = vsub.s32 0, %v4275_v9  ;;  %v2117_v11 = vld [vmem:[%s5084_s14] sm:$0xf] }
 0x53b   :  { %2407 = vmatprep.subr.bf16.mxu1 %v3859_v12  ;;  %2448 = vmatprep.subr.bf16.mxu0 %v3862_v13  ;;  %v2125_v12 = vsub.s32 1, %v4275_v9 }
 0x53c   :  { %v2122_v13 = vrot.slane %v2117_v11, %v2121_v10 }
 0x53e   :  { %2408 = vmatpush1.bf16.msra.mxu1 %v3857_v14  ;;  %2449 = vmatpush1.bf16.msra.mxu0 %v3860_v15 }
 0x53f   :  { %2409 = vmatprep.subr.bf16.mxu1 %v3865_v20  ;;  %2450 = vmatprep.subr.bf16.mxu0 %v3868_v22 }
 0x542   :  { %2410 = vmatpush1.bf16.msra.mxu1 %v3863_v21  ;;  %2451 = vmatpush1.bf16.msra.mxu0 %v3866_v23 }
 0x543   :  { %2411 = vmatprep.subr.bf16.mxu1 %v3871_v24  ;;  %2452 = vmatprep.subr.bf16.mxu0 %v3874_v27 }
 0x546   :  { %2412 = vmatpush1.bf16.msra.mxu1 %v3869_v26  ;;  %2453 = vmatpush1.bf16.msra.mxu0 %v3872_v28  ;;  %v2133_v26 = vsub.s32 3, %v4275_v9 }
 0x547   :  { %2413 = vmatprep.subr.bf16.mxu1 %v3877_v29  ;;  %2454 = vmatprep.subr.bf16.mxu0 %v3880_v31 }
 0x548   :  { %v4829_v16 = vpop.f32.mrb[24].mxu1 }
 0x549   :  { %v4831_v17 = vpop.f32.mrb[25].mxu1 }
 0x54a   :  { %v1831_v18 = vpop.f32.mrb[26].mxu1  ;;  %2414 = vmatpush1.bf16.msra.mxu1 %v3875_v30  ;;  %2455 = vmatpush1.bf16.msra.mxu0 %v3878_v34 }
 0x54b   :  { %v1832_v19 = vpop.f32.mrb[27].mxu1  ;;  %2415 = vmatprep.subr.bf16.mxu1 %v3883_v32  ;;  %2456 = vmatprep.subr.bf16.mxu0 %v3886_v25  ;;  %v2126_v18 = vrot.slane %v2117_v11, %v2125_v12 }
 0x54e   :  { %2416 = vmatpush1.bf16.msra.mxu1 %v3881_v33  ;;  %2457 = vmatpush1.bf16.msra.mxu0 %v3884_v35 }
 0x54f   :  { %2643 = vmatprep.subr.bf16.mxu1 %v3889_v38  ;;  %2684 = vmatprep.subr.bf16.mxu0 %v3892_v39 }
 0x551   :  { %2434 = vmatmul.mubr.bf16.vlgmr.msra.gmra.mrb[32].mxu1 %v2207_v37  ;;  %2475 = vmatmul.mubr.bf16.vlgmr.msra.gmra.mrb[36].mxu0 %v2207_v37 }
 0x552   :  { %2675 = vmatprep.mubr.bf16.mxu1 %v3982_v55  ;;  %2644 = vmatpush1.bf16.msra.mxu1 %v3887_v40 }
 0x553   :  { %2685 = vmatpush1.bf16.msra.mxu0 %v3890_v41  ;;  %2716 = vmatprep.mubr.bf16.mxu0 %v3982_v55  ;;  %v3904_v55 = vld [vmem:[%s5082_s12 + $0x14c] ss:$16 sps:$4 sm:$0xff]  }
 0x554   :  { %2645 = vmatprep.subr.bf16.mxu1 %v3895_v42  ;;  %2686 = vmatprep.subr.bf16.mxu0 %v3898_v43  ;;  %v1566_v42 = vld [vmem:[%s5085_s2] sm:$0xff] }
 0x556   :  { %2646 = vmatpush1.bf16.msra.mxu1 %v3893_v44 }
 0x557   :  { %2687 = vmatpush1.bf16.msra.mxu0 %v3896_v45  ;;  %2647 = vmatprep.subr.bf16.mxu1 %v3901_v46 }
 0x558   :  { %2688 = vmatprep.subr.bf16.mxu0 %v3904_v55 }
 0x55a   :  { %2648 = vmatpush1.bf16.msra.mxu1 %v3899_v47 }
 0x55b   :  { %2689 = vmatpush1.bf16.msra.mxu0 %v3902_v48  ;;  %2649 = vmatprep.subr.bf16.mxu1 %v3907_v49 }
 0x55c   :  { %2690 = vmatprep.subr.bf16.mxu0 %v3910_v52 }
 0x55e   :  { %2650 = vmatpush1.bf16.msra.mxu1 %v3905_v53 }
 0x55f   :  { %2691 = vmatpush1.bf16.msra.mxu0 %v3908_v54  ;;  %2651 = vmatprep.subr.bf16.mxu1 %v3913_v56 }
 0x560   :  { %2692 = vmatprep.subr.bf16.mxu0 %v3916_v57 }
 0x562   :  { %2652 = vmatpush1.bf16.msra.mxu1 %v3911_v58 }
 0x563   :  { %2693 = vmatpush1.bf16.msra.mxu0 %v3914_v59  ;;  %2653 = vmatprep.subr.bf16.mxu1 %v3919_v60 }
 0x564   :  { %2694 = vmatprep.subr.bf16.mxu0 %v3922_v62 }
 0x566   :  { %2654 = vmatpush1.bf16.msra.mxu1 %v3917_v61 }
 0x567   :  { %2695 = vmatpush1.bf16.msra.mxu0 %v3920_v63  ;;  %2655 = vmatprep.subr.bf16.mxu1 %v3925_v1  ;;  %v3935_v63 = vld [vmem:[%s5088_s15] sm:$0xff]   ;;  %v3936_v1 = vld [vmem:[%s5088_s15 + $0x8] sm:$0xff]  }
 0x568   :  { %2696 = vmatprep.subr.bf16.mxu0 %v3928_v2  ;;  %v3937_v2 = vld [vmem:[%s5088_s15 + $0x10] sm:$0xff]  }
 0x56a   :  { %2656 = vmatpush1.bf16.msra.mxu1 %v3923_v3  ;;  %v3938_v3 = vld [vmem:[%s5088_s15 + $0x18] sm:$0xff]  }
 0x56b   :  { %2697 = vmatpush1.bf16.msra.mxu0 %v3926_v4  ;;  %2657 = vmatprep.subr.bf16.mxu1 %v3931_v5  ;;  %v3939_v4 = vld [vmem:[%s5088_s15 + $0x20] sm:$0xff]   ;;  %v3940_v5 = vld [vmem:[%s5088_s15 + $0x28] sm:$0xff]  }
 0x56c   :  { %2698 = vmatprep.subr.bf16.mxu0 %v3934_v6  ;;  %v3941_v6 = vld [vmem:[%s5088_s15 + $0x30] sm:$0xff]  }
 0x56e   :  { %2658 = vmatpush1.bf16.msra.mxu1 %v3929_v7  ;;  %v3942_v7 = vld [vmem:[%s5088_s15 + $0x38] sm:$0xff]  }
 0x56f   :  { %2699 = vmatpush1.bf16.msra.mxu0 %v3932_v8  ;;  %3615 = vmatprep.subr.bf16.mxu1 %v3979_v0  ;;  %v3214_v8 = vld [vmem:[%s5084_s14 + $0x4] sm:$0xf] }
 0x604   :  { %v2069_v14 = vpop.f32.mrb[28].mxu1  ;;  %v2110_v15 = vpop.f32.mrb[32].mxu0 }
 0x605   :  { %v2070_v19 = vadd.f32 %v2069_v14, %v4829_v16  ;;  %v2111_v20 = vadd.f32 %v2110_v15, %v4777_v50  ;;  %v2071_v21 = vpop.f32.mrb[29].mxu1  ;;  %v2112_v22 = vpop.f32.mrb[33].mxu0  ;;  %v2134_v16 = vrot.slane %v2117_v11, %v2133_v26  ;;  %v2129_v50 = vsub.s32 2, %v4275_v9 }
 0x606   :  { %v2072_v23 = vadd.f32 %v2071_v21, %v4831_v17  ;;  %v2113_v24 = vadd.f32 %v2112_v22, %v4779_v51  ;;  %v2073_v27 = vpop.f32.mrb[30].mxu1  ;;  %v2114_v28 = vpop.f32.mrb[34].mxu0  ;;  %v2735_v15 = vrot.slane %v3214_v8, %v2125_v12 }
 0x607   :  { %v2139_v29 = vadd.f32 %v2122_v13, %v2070_v19  ;;  %v2074_v30 = vpop.f32.mrb[31].mxu1  ;;  %v2115_v31 = vpop.f32.mrb[35].mxu0  ;;  %v2130_v51 = vrot.slane %v2117_v11, %v2129_v50  ;;  %v2731_v11 = vrot.slane %v3214_v8, %v2121_v10  ;;  %v2743_v10 = vrot.slane %v3214_v8, %v2133_v26  ;;  %v3085_v26 = vld [vmem:[%s5085_s2 + $0x8] sm:$0xff] }
 0x608   :  { %v2140_v34 = vadd.f32 %v2126_v18, %v2072_v23  ;;  %v2142_v17 = vadd.f32 %v2134_v16, %v2113_v24 }
 0x609   :  { %v3081_v32 = vmul.f32 -1.442695, %v2139_v29  ;;  %v2141_v35 = vadd.f32 %v2130_v51, %v2111_v20 }
 0x60a   :  { %v3082_v33 = vmul.f32 -1.442695, %v2140_v34  ;;  %v3083_v25 = vmul.f32 -1.442695, %v2142_v17 }
 0x60b   :  { %3947 = vpow2.f32 %v3081_v32  ;;  %v2739_v32 = vrot.slane %v3214_v8, %v2129_v50 }
 0x60c   :  { %3949 = vpow2.f32 %v3082_v33 }
 0x60d   :  { %3951 = vpow2.f32 %v3083_v25 }
 0x60e   :  { %3953 = vtanh.f32 %v2141_v35 }
 0x615   :  { %v3948_v36 = vpop.eup %3947 }
 0x616   :  { %v3950_v37 = vpop.eup %3949  ;;  %v2149_v38 = vadd.f32 1.0, %v3948_v36 }
 0x617   :  { %v2150_v39 = vadd.f32 1.0, %v3950_v37  ;;  %v3952_v40 = vpop.eup %3951 }
 0x618   :  { %3955 = vrcp.f32 %v2149_v38  ;;  %v3954_v41 = vpop.eup %3953  ;;  %v2159_v46 = vadd.f32 1.0, %v3952_v40 }
 0x619   :  { %3957 = vrcp.f32 %v2150_v39 }
 0x61a   :  { %3959 = vrcp.f32 %v2159_v46  ;;  %v3220_v46 = vld [vmem:[%s5089_s16] ss:$0 sm:$0xff] }
 0x622   :  { %v3956_v43 = vpop.eup %3955 }
 0x623   :  { %v3958_v44 = vpop.eup %3957  ;;  %v2163_v45 = vmul.f32 %v3956_v43, %v3954_v41 }
 0x624   :  { %v2162_v55 = vmul.f32 %v3958_v44, %v1566_v42  ;;  %v3960_v48 = vpop.eup %3959  ;;  %v2435_v54 = vpop.f32.mrb[32].mxu1 }
 0x625   :  { %v2437_v56 = vpop.f32.mrb[33].mxu1  ;;  %v2476_v59 = vpop.f32.mrb[36].mxu0 }
 0x626   :  { %v2164_v47 = vadd.f32 %v2163_v45, %v2162_v55  ;;  %v2439_v57 = vpop.f32.mrb[34].mxu1  ;;  %v2478_v60 = vpop.f32.mrb[37].mxu0 }
 0x627   :  { %v2440_v58 = vpop.f32.mrb[35].mxu1  ;;  %v2480_v61 = vpop.f32.mrb[38].mxu0 }
 0x628   :  { %2168 = vst [vmem:[%s5086_s19] sm:$0xff] %v2164_v47  ;;  %3961 = vtanh.f32 %v2164_v47  ;;  %v2481_v62 = vpop.f32.mrb[39].mxu0 }
 0x632   :  { %v3962_v49 = vpop.eup %3961 }
 0x633   :  { %v2166_v52 = vmul.f32 %v3962_v49, %v3960_v48 }
 0x635   :  { %2167 = vst [vmem:[%s5087_s18] sm:$0xff] %v2166_v52  ;;  %v2173_v53 = vpack.c.bf16 %v2166_v52, %v2166_v52 }
 0x637   :  { %2676 = vmatmul.mubr.bf16.vlgmr.msra.gmra.mrb[36].mxu1 %v2173_v53  ;;  %2717 = vmatmul.mubr.bf16.vlgmr.msra.gmra.mrb[40].mxu0 %v2173_v53 }
 0x638   :  { %3631 = vmatprep.mubr.msk.bf16.mxu1 %vm3980_vm0, %v3979_v0  ;;  %3616 = vmatpush3.bf16.msra.mxu1 %v3935_v63 }
 0x639   :  { %3617 = vmatprep.subr.bf16.mxu1 %v3979_v0 }
 0x63c   :  { %3618 = vmatpush3.bf16.msra.mxu1 %v3936_v1 }
 0x63d   :  { %3619 = vmatprep.subr.bf16.mxu1 %v3979_v0 }
 0x640   :  { %3620 = vmatpush3.bf16.msra.mxu1 %v3937_v2 }
 0x641   :  { %3621 = vmatprep.subr.bf16.mxu1 %v3979_v0 }
 0x644   :  { %3622 = vmatpush3.bf16.msra.mxu1 %v3938_v3 }
 0x645   :  { %3623 = vmatprep.subr.bf16.mxu1 %v3979_v0 }
 0x648   :  { %3624 = vmatpush3.bf16.msra.mxu1 %v3939_v4 }
 0x649   :  { %3625 = vmatprep.subr.bf16.mxu1 %v3979_v0 }
 0x64c   :  { %3626 = vmatpush3.bf16.msra.mxu1 %v3940_v5 }
 0x64d   :  { %3627 = vmatprep.subr.bf16.mxu1 %v3979_v0 }
 0x650   :  { %3628 = vmatpush3.bf16.msra.mxu1 %v3941_v6 }
 0x651   :  { %3629 = vmatprep.subr.bf16.mxu1 %v3979_v0 }
 0x654   :  { %3630 = vmatpush3.bf16.msra.mxu1 %v3942_v7 }
 0x70a   :  { %v2677_v13 = vpop.f32.mrb[36].mxu1  ;;  %v2718_v14 = vpop.f32.mrb[40].mxu0 }
 0x70b   :  { %v2678_v18 = vadd.f32 %v2677_v13, %v2435_v54  ;;  %v2719_v19 = vadd.f32 %v2718_v14, %v2476_v59  ;;  %v2679_v20 = vpop.f32.mrb[37].mxu1  ;;  %v2720_v21 = vpop.f32.mrb[41].mxu0 }
 0x70c   :  { %v2680_v22 = vadd.f32 %v2679_v20, %v2437_v56  ;;  %v2721_v23 = vadd.f32 %v2720_v21, %v2478_v60  ;;  %v2681_v0 = vpop.f32.mrb[38].mxu1  ;;  %v2722_v24 = vpop.f32.mrb[42].mxu0 }
 0x70d   :  { %v2748_v27 = vadd.f32 %v2731_v11, %v2678_v18  ;;  %v2682_v28 = vpop.f32.mrb[39].mxu1  ;;  %v2723_v29 = vpop.f32.mrb[43].mxu0  ;;  %v2750_v16 = vadd.f32 %v2739_v32, %v2719_v19 }
 0x70e   :  { %v2749_v30 = vadd.f32 %v2735_v15, %v2680_v22  ;;  %v2751_v12 = vadd.f32 %v2743_v10, %v2721_v23 }
 0x70f   :  { %v3215_v31 = vmul.f32 -1.442695, %v2748_v27 }
 0x710   :  { %v3216_v34 = vmul.f32 -1.442695, %v2749_v30  ;;  %v3217_v33 = vmul.f32 -1.442695, %v2751_v12 }
 0x711   :  { %3963 = vpow2.f32 %v3215_v31 }
 0x712   :  { %3965 = vpow2.f32 %v3216_v34 }
 0x713   :  { %3967 = vpow2.f32 %v3217_v33 }
 0x714   :  { %3969 = vtanh.f32 %v2750_v16 }
 0x71b   :  { %v3964_v17 = vpop.eup %3963 }
 0x71c   :  { %v3966_v51 = vpop.eup %3965  ;;  %v2758_v25 = vadd.f32 1.0, %v3964_v17 }
 0x71d   :  { %v2759_v35 = vadd.f32 1.0, %v3966_v51  ;;  %v3968_v36 = vpop.eup %3967 }
 0x71e   :  { %3971 = vrcp.f32 %v2758_v25  ;;  %v3970_v37 = vpop.eup %3969  ;;  %v2768_v50 = vadd.f32 1.0, %v3968_v36 }
 0x71f   :  { %3973 = vrcp.f32 %v2759_v35 }
 0x720   :  { %3975 = vrcp.f32 %v2768_v50 }
 0x728   :  { %v3972_v38 = vpop.eup %3971 }
 0x729   :  { %v3974_v39 = vpop.eup %3973  ;;  %v2772_v9 = vmul.f32 %v3972_v38, %v3970_v37 }
 0x72a   :  { %v2771_v40 = vmul.f32 %v3974_v39, %v3085_v26  ;;  %v3976_v42 = vpop.eup %3975 }
 0x72c   :  { %v2773_v41 = vadd.f32 %v2772_v9, %v2771_v40 }
 0x72e   :  { %3219 = vst [vmem:[%s5086_s19 + $0x8] sm:$0xff] %v2773_v41  ;;  %3977 = vtanh.f32 %v2773_v41 }
 0x738   :  { %v3978_v43 = vpop.eup %3977 }
 0x739   :  { %v2775_v44 = vmul.f32 %v3978_v43, %v3976_v42 }
 0x73b   :  { %3218 = vst [vmem:[%s5087_s18 + $0x8] sm:$0xff] %v2775_v44  ;;  %v2780_v45 = vpack.c.bf16 %v2775_v44, %v2775_v44 }
 0x73d   :  { %3632 = vmatmul.mubr.bf16.vlgmr.msra.gmra.mrb[40].mxu1 %v2780_v45 }
 0x810   :  { %v2886_v55 = vpop.f32.mrb[40].mxu1 }
 0x811   :  { %v2887_v47 = vadd.f32 %v3220_v46, %v2886_v55  ;;  %v3633_v48 = vpop.f32.mrb[41].mxu1 }
 0x812   :  { %v2889_v49 = vpop.f32.mrb[42].mxu1 }
 0x813   :  { %v2892_v52 = vmax.f32 %v2887_v47, 0.0  ;;  %v3634_v53 = vpop.f32.mrb[43].mxu1 }
 0x815   :  { %2893 = vst [vmem:[%s5090_s17] sm:$0xff] %v2892_v52 }

// kernel: attn_decoder_forward.1
= control target key start
LH: loop header
LB: loop body
LE: loop exit
PB: predicated region body
PF: predicated region fallthrough
CT: control target
= control target key end

     0   :  { %v3979_v0 = vmov 0.0   ;;  %vm3980_vm0 = vmmov 0   ;;  %vm1358_vm1 = vcmask 1041409   ;;  %vm1361_vm2 = vcmask 1042434   ;;  %s5070_s4 = inlined_call_operand.vmem [shape: bf16[128,128], index: 4, kind: input, shape index: {}]   ;;  %s5071_s7 = inlined_call_operand.vmem [shape: bf16[128,128], index: 7, kind: input, shape index: {}]   ;;  %s5072_s6 = inlined_call_operand.vmem [shape: bf16[128,128], index: 6, kind: input, shape index: {}]   ;;  %s5073_s0 = inlined_call_operand.vmem [shape: f32[8,128], index: 0, kind: input, shape index: {}]   ;;  %s5074_s1 = inlined_call_operand.vmem [shape: f32[2,8,128], index: 1, kind: input, shape index: {}]   ;;  %s5075_s5 = inlined_call_operand.vmem [shape: f32[1,128], index: 5, kind: input, shape index: {}]   ;;  %s5076_s8 = inlined_call_operand.vmem [shape: f32[1,128], index: 8, kind: input, shape index: {}]   ;;  %s5077_s3 = inlined_call_operand.vmem [shape: bf16[8,128,128], index: 3, kind: input, shape index: {}]   ;;  %s5078_s9 = inlined_call_operand.vmem [shape: bf16[128,128], index: 9, kind: input, shape index: {}]   ;;  %s5079_s20 = inlined_call_operand.vmem [shape: f32[8,128], index: 20, kind: output, shape index: {3}]   ;;  %s5080_s10 = inlined_call_operand.vmem [shape: bf16[128,128], index: 10, kind: input, shape index: {}]   ;;  %s5081_s13 = inlined_call_operand.vmem [shape: bf16[2,128,512], index: 13, kind: input, shape index: {}]   ;;  %s5082_s12 = inlined_call_operand.vmem [shape: bf16[2,128,512], index: 12, kind: input, shape index: {}]   ;;  %s5083_s11 = inlined_call_operand.vmem [shape: f32[1,128], index: 11, kind: input, shape index: {}]   ;;  %s5084_s14 = inlined_call_operand.vmem [shape: f32[2,1,512], index: 14, kind: input, shape index: {}]   ;;  %s5085_s2 = inlined_call_operand.vmem [shape: f32[2,8,128], index: 2, kind: input, shape index: {}]   ;;  %s5086_s19 = inlined_call_operand.vmem [shape: f32[2,8,128], index: 19, kind: output, shape index: {2}]   ;;  %s5087_s18 = inlined_call_operand.vmem [shape: f32[2,8,128], index: 18, kind: output, shape index: {1}]   ;;  %s5088_s15 = inlined_call_operand.vmem [shape: bf16[128,128], index: 15, kind: input, shape index: {}]   ;;  %s5089_s16 = inlined_call_operand.vmem [shape: f32[1,128], index: 16, kind: input, shape index: {}]   ;;  %s5090_s17 = inlined_call_operand.vmem [shape: f32[8,128], index: 17, kind: output, shape index: {0}]  }
   0x1   :  { %5095 = sst [smem:[#allocation2_spill]] %s5070_s4  ;;  %3355 = vmatprep.subr.bf16.mxu0 %v3979_v0  ;;  %3371 = vmatprep.mubr.msk.bf16.mxu0 %vm3980_vm0, %v3979_v0  ;;  %v2910_v29 = vld [vmem:[%s5075_s5] ss:$0 sm:$0xff]  ;;  %v3665_v49 = vld [vmem:[%s5077_s3 + $0x8] sm:$0xff]   ;;  %v3667_v51 = vld [vmem:[%s5077_s3 + $0x10] sm:$0xff]   ;;  %vm1364_vm3 = vcmask 1043459  }
   0x2   :  { %5096 = sst [smem:[#allocation3_spill]] %s5071_s7  ;;  %s5100_s23 = sld [smem:[#allocation2_spill]]  ;;  %3375 = vmatprep.subr.bf16.mxu1 %v3979_v0  ;;  %3391 = vmatprep.mubr.msk.bf16.mxu1 %vm3980_vm0, %v3979_v0  ;;  %v2935_v41 = vld [vmem:[%s5076_s8] ss:$0 sm:$0xff]  ;;  %v3666_v50 = vld [vmem:[%s5077_s3 + $0x48] sm:$0xff]   ;;  %v3668_v52 = vld [vmem:[%s5077_s3 + $0x50] sm:$0xff]  }
   0x3   :  { %5097 = sst [smem:[#allocation4_spill]] %s5072_s6  ;;  %s5101_s28 = sld [smem:[#allocation3_spill]]  ;;  %v3663_v47 = vld [vmem:[%s5077_s3] sm:$0xff]   ;;  %v3669_v53 = vld [vmem:[%s5077_s3 + $0x18] sm:$0xff]   ;;  %v3673_v61 = vld [vmem:[%s5077_s3 + $0x28] sm:$0xff]   ;;  %vm1367_vm4 = vcmask 1044484  }
   0x4   :  { %5098 = sst [smem:[#allocation5_spill]] %s5073_s0  ;;  %s5103_s27 = sld [smem:[#allocation4_spill]]  ;;  %v3664_v48 = vld [vmem:[%s5077_s3 + $0x40] sm:$0xff]   ;;  %v3670_v58 = vld [vmem:[%s5077_s3 + $0x58] sm:$0xff]   ;;  %v3674_v62 = vld [vmem:[%s5077_s3 + $0x68] sm:$0xff]   ;;  %vm1370_vm5 = vcmask 1045509  }
   0x5   :  { %5099 = sst [smem:[#allocation6_spill]] %s5074_s1  ;;  %s5102_s24 = sld [smem:[#allocation5_spill]]  ;;  %v3671_v59 = vld [vmem:[%s5077_s3 + $0x20] sm:$0xff]   ;;  %v3675_v63 = vld [vmem:[%s5077_s3 + $0x30] sm:$0xff]   ;;  %vm1373_vm6 = vcmask 1046534   ;;  %vm1376_vm7 = vcmask 1047559  }
   0x6   :  { %s5104_s4 = sld [smem:[#allocation6_spill]]  ;;  %v3672_v60 = vld [vmem:[%s5077_s3 + $0x60] sm:$0xff]  }
   0x8   :  { %v3639_v1 = vld [vmem:[%s5100_s23] sm:$0xff]   ;;  %v3640_v2 = vld [vmem:[%s5100_s23 + $0x8] sm:$0xff]   ;;  %v3641_v3 = vld [vmem:[%s5100_s23 + $0x10] sm:$0xff]  }
   0x9   :  { %3356 = vmatpush3.bf16.msra.mxu0 %v3639_v1  ;;  %v3647_v4 = vld [vmem:[%s5101_s28] sm:$0xff]   ;;  %v3642_v5 = vld [vmem:[%s5100_s23 + $0x18] sm:$0xff]   ;;  %v3649_v6 = vld [vmem:[%s5101_s28 + $0x8] sm:$0xff]  }
   0xa   :  { %3357 = vmatprep.subr.bf16.mxu0 %v3979_v0  ;;  %3376 = vmatpush3.bf16.msra.mxu1 %v3647_v4  ;;  %v3643_v7 = vld [vmem:[%s5100_s23 + $0x20] sm:$0xff]   ;;  %v3651_v8 = vld [vmem:[%s5101_s28 + $0x10] sm:$0xff]   ;;  %v3644_v9 = vld [vmem:[%s5100_s23 + $0x28] sm:$0xff]  }
   0xb   :  { %3377 = vmatprep.subr.bf16.mxu1 %v3979_v0  ;;  %v3653_v10 = vld [vmem:[%s5101_s28 + $0x18] sm:$0xff]   ;;  %v3645_v11 = vld [vmem:[%s5100_s23 + $0x30] sm:$0xff]   ;;  %v3655_v12 = vld [vmem:[%s5101_s28 + $0x20] sm:$0xff]  }
   0xc   :  { %v3646_v13 = vld [vmem:[%s5100_s23 + $0x38] sm:$0xff]   ;;  %v61_v14 = vld [vmem:[%s5102_s24] sm:$0xff]  ;;  %v3657_v15 = vld [vmem:[%s5101_s28 + $0x28] sm:$0xff]  }
   0xd   :  { %3358 = vmatpush3.bf16.msra.mxu0 %v3640_v2  ;;  %v62_v16 = vpack.c.bf16 %v61_v14, %v61_v14  ;;  %v3648_v17 = vld [vmem:[%s5103_s27] sm:$0xff]   ;;  %v3659_v18 = vld [vmem:[%s5101_s28 + $0x30] sm:$0xff]   ;;  %v3650_v19 = vld [vmem:[%s5103_s27 + $0x8] sm:$0xff]  }
   0xe   :  { %3359 = vmatprep.subr.bf16.mxu0 %v3979_v0  ;;  %3378 = vmatpush3.bf16.msra.mxu1 %v3649_v6  ;;  %v3661_v20 = vld [vmem:[%s5101_s28 + $0x38] sm:$0xff]   ;;  %v3652_v21 = vld [vmem:[%s5103_s27 + $0x10] sm:$0xff]   ;;  %v3656_v23 = vld [vmem:[%s5103_s27 + $0x20] sm:$0xff]  }
   0xf   :  { %3379 = vmatprep.subr.bf16.mxu1 %v3979_v0  ;;  %v3654_v22 = vld [vmem:[%s5103_s27 + $0x18] sm:$0xff]   ;;  %v3658_v24 = vld [vmem:[%s5103_s27 + $0x28] sm:$0xff]   ;;  %v3660_v25 = vld [vmem:[%s5103_s27 + $0x30] sm:$0xff]  }
  0x10   :  { %v175_v26 = vld [vmem:[%s5104_s4] sm:$0xff]  ;;  %v3662_v28 = vld [vmem:[%s5103_s27 + $0x38] sm:$0xff]   ;;  %v3676_v1 = vld [vmem:[%s5077_s3 + $0x70] sm:$0xff]  }
  0x11   :  { %3360 = vmatpush3.bf16.msra.mxu0 %v3641_v3  ;;  %v176_v27 = vpack.c.bf16 %v175_v26, %v175_v26  ;;  %v3677_v2 = vld [vmem:[%s5077_s3 + $0x38] sm:$0xff]  }
  0x12   :  { %3361 = vmatprep.subr.bf16.mxu0 %v3979_v0  ;;  %3380 = vmatpush3.bf16.msra.mxu1 %v3651_v8  ;;  %v3678_v3 = vld [vmem:[%s5077_s3 + $0x78] sm:$0xff]  }
  0x13   :  { %3381 = vmatprep.subr.bf16.mxu1 %v3979_v0  ;;  %v3686_v26 = vld [vmem:[%s5077_s3 + $0xd8] sm:$0xff]  }
  0x15   :  { %3362 = vmatpush3.bf16.msra.mxu0 %v3642_v5  ;;  %v3981_v5 = vmov 1966171168  }
  0x16   :  { %3363 = vmatprep.subr.bf16.mxu0 %v3979_v0  ;;  %3382 = vmatpush3.bf16.msra.mxu1 %v3653_v10  ;;  %v406_v6 = vunpack.c.l.s4 %v3981_v5  ;;  %v3716_v5 = vld [vmem:[%s5077_s3 + $0x1d0] sm:$0xff]  }
  0x17   :  { %3383 = vmatprep.subr.bf16.mxu1 %v3979_v0 }
  0x18   :  { %v407_v8 = vunpack.c.0.s8 %v406_v6  ;;  %v3717_v6 = vld [vmem:[%s5077_s3 + $0x198] sm:$0xff]  }
  0x19   :  { %3364 = vmatpush3.bf16.msra.mxu0 %v3643_v7  ;;  %v408_v7 = vlaneseq }
  0x1a   :  { %3365 = vmatprep.subr.bf16.mxu0 %v3979_v0  ;;  %3384 = vmatpush3.bf16.msra.mxu1 %v3655_v12 }
  0x1b   :  { %3385 = vmatprep.subr.bf16.mxu1 %v3979_v0 }
  0x1d   :  { %3366 = vmatpush3.bf16.msra.mxu0 %v3644_v9  ;;  %v4275_v9 = vshrl.u32 %v408_v7, 7  ;;  %v3718_v7 = vld [vmem:[%s5077_s3 + $0x1d8] sm:$0xff]  }
  0x1e   :  { %3367 = vmatprep.subr.bf16.mxu0 %v3979_v0  ;;  %3386 = vmatpush3.bf16.msra.mxu1 %v3657_v15 }
  0x1f   :  { %3387 = vmatprep.subr.bf16.mxu1 %v3979_v0  ;;  %v4278_v10 = vsub.s32 %v407_v8, %v4275_v9  ;;  %v3719_v8 = vld [vmem:[%s5077_s3 + $0x1a0] sm:$0xff]  }
  0x21   :  { %3368 = vmatpush3.bf16.msra.mxu0 %v3645_v11 }
  0x22   :  { %3369 = vmatprep.subr.bf16.mxu0 %v3979_v0  ;;  %3388 = vmatpush3.bf16.msra.mxu1 %v3659_v18 }
  0x23   :  { %3389 = vmatprep.subr.bf16.mxu1 %v3979_v0 }
  0x25   :  { %3370 = vmatpush3.bf16.msra.mxu0 %v3646_v13 }
  0x26   :  { %3395 = vmatprep.subr.bf16.mxu0 %v3979_v0  ;;  %3390 = vmatpush3.bf16.msra.mxu1 %v3661_v20 }
  0x27   :  { %3415 = vmatprep.subr.bf16.mxu1 %v3979_v0 }
  0x28   :  { %3372 = vmatmul.mubr.bf16.vlgmr.msra.gmra.mrb[0].mxu0 %v62_v16  ;;  %v3679_v16 = vld [vmem:[%s5077_s3 + $0x80] sm:$0xff]  }
  0x29   :  { %3396 = vmatpush3.bf16.msra.mxu0 %v3648_v17  ;;  %3411 = vmatprep.mubr.msk.bf16.mxu0 %vm3980_vm0, %v3979_v0 }
  0x2a   :  { %3397 = vmatprep.subr.bf16.mxu0 %v3979_v0  ;;  %3392 = vmatmul.mubr.bf16.vlgmr.msra.gmra.mrb[0].mxu1 %v176_v27  ;;  %v3687_v27 = vld [vmem:[%s5077_s3 + $0xa0] sm:$0xff]  }
  0x2b   :  { %3431 = vmatprep.mubr.msk.bf16.mxu1 %vm3980_vm0, %v3979_v0  ;;  %3416 = vmatpush3.bf16.msra.mxu1 %v3663_v47  ;;  %v3702_v47 = vld [vmem:[%s5077_s3 + $0x158] sm:$0xff]  }
  0x2c   :  { %3417 = vmatprep.subr.bf16.mxu1 %v3979_v0 }
  0x2d   :  { %3398 = vmatpush3.bf16.msra.mxu0 %v3650_v19  ;;  %v3680_v19 = vld [vmem:[%s5077_s3 + $0xc0] sm:$0xff]  }
  0x2e   :  { %3399 = vmatprep.subr.bf16.mxu0 %v3979_v0 }
  0x2f   :  { %3418 = vmatpush3.bf16.msra.mxu1 %v3665_v49  ;;  %v3704_v49 = vld [vmem:[%s5077_s3 + $0x160] sm:$0xff]  }
  0x30   :  { %3419 = vmatprep.subr.bf16.mxu1 %v3979_v0 }
  0x31   :  { %3400 = vmatpush3.bf16.msra.mxu0 %v3652_v21  ;;  %v3681_v21 = vld [vmem:[%s5077_s3 + $0x88] sm:$0xff]  }
  0x32   :  { %3401 = vmatprep.subr.bf16.mxu0 %v3979_v0 }
  0x33   :  { %3420 = vmatpush3.bf16.msra.mxu1 %v3667_v51  ;;  %v3705_v51 = vld [vmem:[%s5077_s3 + $0x128] sm:$0xff]  }
  0x34   :  { %3421 = vmatprep.subr.bf16.mxu1 %v3979_v0 }
  0x35   :  { %3402 = vmatpush3.bf16.msra.mxu0 %v3654_v22  ;;  %v3682_v22 = vld [vmem:[%s5077_s3 + $0xc8] sm:$0xff]  }
  0x36   :  { %3403 = vmatprep.subr.bf16.mxu0 %v3979_v0 }
  0x37   :  { %3422 = vmatpush3.bf16.msra.mxu1 %v3669_v53 }
  0x38   :  { %3423 = vmatprep.subr.bf16.mxu1 %v3979_v0 }
  0x39   :  { %3404 = vmatpush3.bf16.msra.mxu0 %v3656_v23  ;;  %v3683_v23 = vld [vmem:[%s5077_s3 + $0x90] sm:$0xff]  }
  0x3a   :  { %3405 = vmatprep.subr.bf16.mxu0 %v3979_v0 }
  0x3b   :  { %3424 = vmatpush3.bf16.msra.mxu1 %v3671_v59  ;;  %v3710_v59 = vld [vmem:[%s5077_s3 + $0x178] sm:$0xff]  }
  0x3c   :  { %3425 = vmatprep.subr.bf16.mxu1 %v3979_v0 }
  0x3d   :  { %3406 = vmatpush3.bf16.msra.mxu0 %v3658_v24  ;;  %v3684_v24 = vld [vmem:[%s5077_s3 + $0xd0] sm:$0xff]  }
  0x3e   :  { %3407 = vmatprep.subr.bf16.mxu0 %v3979_v0 }
  0x3f   :  { %3426 = vmatpush3.bf16.msra.mxu1 %v3673_v61  ;;  %v3711_v61 = vld [vmem:[%s5077_s3 + $0x180] sm:$0xff]  }
  0x40   :  { %3427 = vmatprep.subr.bf16.mxu1 %v3979_v0 }
  0x41   :  { %3408 = vmatpush3.bf16.msra.mxu0 %v3660_v25  ;;  %v3685_v25 = vld [vmem:[%s5077_s3 + $0x98] sm:$0xff]  }
  0x42   :  { %3409 = vmatprep.subr.bf16.mxu0 %v3979_v0 }
  0x43   :  { %3428 = vmatpush3.bf16.msra.mxu1 %v3675_v63  ;;  %v3712_v63 = vld [vmem:[%s5077_s3 + $0x1c0] sm:$0xff]  }
  0x44   :  { %3429 = vmatprep.subr.bf16.mxu1 %v3979_v0 }
  0x45   :  { %3410 = vmatpush3.bf16.msra.mxu0 %v3662_v28  ;;  %v3688_v28 = vld [vmem:[%s5077_s3 + $0xe0] sm:$0xff]  }
  0x46   :  { %3435 = vmatprep.subr.bf16.mxu0 %v3979_v0 }
  0x47   :  { %3430 = vmatpush3.bf16.msra.mxu1 %v3677_v2  ;;  %v3713_v2 = vld [vmem:[%s5077_s3 + $0x188] sm:$0xff]  }
  0x48   :  { %3455 = vmatprep.subr.bf16.mxu1 %v3979_v0 }
  0xfb   :  { %v168_v30 = vpop.f32.mrb[0].mxu0 }
  0xfc   :  { %v169_v31 = vadd.f32 %v2910_v29, %v168_v30  ;;  %v3373_v32 = vpop.f32.mrb[1].mxu0  ;;  %v3689_v29 = vld [vmem:[%s5077_s3 + $0xa8] sm:$0xff]  }
  0xfd   :  { %v171_v33 = vpop.f32.mrb[2].mxu0  ;;  %v291_v36 = vpop.f32.mrb[0].mxu1  ;;  %v3690_v30 = vld [vmem:[%s5077_s3 + $0xe8] sm:$0xff]   ;;  %v3692_v32 = vld [vmem:[%s5077_s3 + $0xf0] sm:$0xff]  }
  0xfe   :  { %v4203_v34 = vpack.c.bf16 %v169_v31, %v169_v31  ;;  %v3374_v35 = vpop.f32.mrb[3].mxu0  ;;  %v3393_v37 = vpop.f32.mrb[1].mxu1  ;;  %v3691_v31 = vld [vmem:[%s5077_s3 + $0xb0] sm:$0xff]   ;;  %v3693_v33 = vld [vmem:[%s5077_s3 + $0xb8] sm:$0xff]  }
  0xff   :  { %v294_v38 = vpop.f32.mrb[2].mxu1 }
 0x100   :  { %3412 = vmatmul.mubr.bf16.vlgmr.msra.gmra.mrb[4].mxu0 %v4203_v34  ;;  %v3394_v39 = vpop.f32.mrb[3].mxu1  ;;  %v3695_v38 = vld [vmem:[%s5077_s3 + $0x100] sm:$0xff]  }
 0x101   :  { %3451 = vmatprep.mubr.msk.bf16.mxu0 %vm3980_vm0, %v3979_v0  ;;  %3436 = vmatpush3.bf16.msra.mxu0 %v3664_v48  ;;  %v3703_v48 = vld [vmem:[%s5077_s3 + $0x120] sm:$0xff]  }
 0x102   :  { %3437 = vmatprep.subr.bf16.mxu0 %v3979_v0 }
 0x105   :  { %3438 = vmatpush3.bf16.msra.mxu0 %v3666_v50 }
 0x106   :  { %3439 = vmatprep.subr.bf16.mxu0 %v3979_v0 }
 0x109   :  { %3440 = vmatpush3.bf16.msra.mxu0 %v3668_v52  ;;  %v3706_v52 = vld [vmem:[%s5077_s3 + $0x168] sm:$0xff]  }
 0x10a   :  { %3441 = vmatprep.subr.bf16.mxu0 %v3979_v0 }
 0x10d   :  { %3442 = vmatpush3.bf16.msra.mxu0 %v3670_v58 }
 0x10e   :  { %3443 = vmatprep.subr.bf16.mxu0 %v3979_v0 }
 0x111   :  { %3444 = vmatpush3.bf16.msra.mxu0 %v3672_v60 }
 0x112   :  { %3445 = vmatprep.subr.bf16.mxu0 %v3979_v0 }
 0x115   :  { %3446 = vmatpush3.bf16.msra.mxu0 %v3674_v62 }
 0x116   :  { %3447 = vmatprep.subr.bf16.mxu0 %v3979_v0 }
 0x119   :  { %3448 = vmatpush3.bf16.msra.mxu0 %v3676_v1 }
 0x11a   :  { %3449 = vmatprep.subr.bf16.mxu0 %v3979_v0 }
 0x11d   :  { %3450 = vmatpush3.bf16.msra.mxu0 %v3678_v3  ;;  %v3714_v3 = vld [vmem:[%s5077_s3 + $0x1c8] sm:$0xff]  }
 0x11e   :  { %3475 = vmatprep.subr.bf16.mxu0 %v3979_v0 }
 0x1d3   :  { %v379_v40 = vpop.f32.mrb[4].mxu0 }
 0x1d4   :  { %v380_v42 = vadd.f32 %v379_v40, %v291_v36  ;;  %v3413_v43 = vpop.f32.mrb[5].mxu0  ;;  %v3694_v36 = vld [vmem:[%s5077_s3 + $0xf8] sm:$0xff]   ;;  %v3696_v40 = vld [vmem:[%s5077_s3 + $0x140] sm:$0xff]  }
 0x1d5   :  { %v382_v44 = vpop.f32.mrb[6].mxu0  ;;  %v3698_v43 = vld [vmem:[%s5077_s3 + $0x148] sm:$0xff]  }
 0x1d6   :  { %v3414_v45 = vpop.f32.mrb[7].mxu0  ;;  %v392_v46 = vadd.f32 %v2935_v41, %v380_v42  ;;  %v3697_v42 = vld [vmem:[%s5077_s3 + $0x108] sm:$0xff]   ;;  %v3699_v44 = vld [vmem:[%s5077_s3 + $0x110] sm:$0xff]  }
 0x1d7   :  { %v3700_v45 = vld [vmem:[%s5077_s3 + $0x150] sm:$0xff]  }
 0x1d8   :  { %393 = vmax.xlane.f32.xlu0 %v392_v46 }
 0x265   :  { %v394_v54 = vpop.xlane.xlu0 %393 }
 0x266   :  { %v395_v55 = vsub.f32 %v392_v46, %v394_v54  ;;  %v3701_v46 = vld [vmem:[%s5077_s3 + $0x118] sm:$0xff]   ;;  %v3707_v54 = vld [vmem:[%s5077_s3 + $0x130] sm:$0xff]  }
 0x268   :  { %v396_v56 = vmul.f32 1.442695, %v395_v55  ;;  %v3708_v55 = vld [vmem:[%s5077_s3 + $0x170] sm:$0xff]  }
 0x26a   :  { %3943 = vpow2.f32 %v396_v56 }
 0x274   :  { %v3944_v57 = vpop.eup %3943 }
 0x275   :  { %398 = vadd.xlane.f32.xlu0 %v3944_v57 }
 0x302   :  { %v399_v4 = vpop.xlane.xlu0 %398 }
 0x303   :  { %3945 = vrcp.f32 %v399_v4  ;;  %v3715_v4 = vld [vmem:[%s5077_s3 + $0x190] sm:$0xff]  }
 0x30d   :  { %v3946_v11 = vpop.eup %3945 }
 0x30e   :  { %v4280_v12 = vmul.f32 %v3946_v11, %v3944_v57  ;;  %v3709_v57 = vld [vmem:[%s5077_s3 + $0x138] sm:$0xff]   ;;  %v3721_v11 = vld [vmem:[%s5077_s3 + $0x1a8] sm:$0xff]  }
 0x310   :  { %402 = vst [vmem:[%s5079_s20] sm:$0xff] %v4280_v12  ;;  %v411_v13 = vrot.slane %v4280_v12, %v4278_v10  ;;  %v404_v50 = vcombine.high %v4280_v12, %v4280_v12  ;;  %v3722_v12 = vld [vmem:[%s5077_s3 + $0x1e8] sm:$0xff]  }
 0x312   :  { %v427_v14 = vrot.slane %v411_v13, %v4278_v10  ;;  %v419_v15 = vcombine.high %v411_v13, %v411_v13  ;;  %v418_v53 = vrot.slane %v404_v50, %v4278_v10  ;;  %v3723_v13 = vld [vmem:[%s5077_s3 + $0x1b0] sm:$0xff]  }
 0x313   :  { %v3745_v50 = vld [vmem:[%s5081_s13 + $0x4] ss:$16 sps:$4 sm:$0xff]  }
 0x314   :  { %v461_v17 = vpack.c.bf16 %v427_v14, %v427_v14  ;;  %v441_v18 = vrot.slane %v419_v15, %v4278_v10  ;;  %v449_v35 = vcombine.high %v427_v14, %v427_v14  ;;  %v420_v56 = vcombine.high %v418_v53, %v418_v53  ;;  %v3724_v14 = vld [vmem:[%s5077_s3 + $0x1f0] sm:$0xff]   ;;  %v3725_v15 = vld [vmem:[%s5077_s3 + $0x1b8] sm:$0xff]  }
 0x315   :  { %v434_v58 = vrot.slane %v418_v53, %v4278_v10 }
 0x316   :  { %3432 = vmatmul.mubr.bf16.vlgmr.msra.gmra.mrb[4].mxu1 %v461_v17  ;;  %v462_v20 = vpack.c.bf16 %v441_v18, %v441_v18  ;;  %v451_v37 = vcombine.high %v441_v18, %v441_v18  ;;  %v463_v39 = vpack.c.bf16 %v449_v35, %v449_v35  ;;  %v448_v60 = vrot.slane %v420_v56, %v4278_v10  ;;  %v3720_v10 = vld [vmem:[%s5077_s3 + $0x1e0] sm:$0xff]   ;;  %v3726_v17 = vld [vmem:[%s5077_s3 + $0x1f8] sm:$0xff]   ;;  %v3741_v35 = vld [vmem:[%s5080_s10 + $0x30] sm:$0xff]  }
 0x317   :  { %3456 = vmatpush3.bf16.msra.mxu1 %v3679_v16  ;;  %3471 = vmatprep.mubr.msk.bf16.mxu1 %vm3980_vm0, %v3979_v0  ;;  %v465_v62 = vpack.c.bf16 %v434_v58, %v434_v58  ;;  %v450_v16 = vcombine.high %v434_v58, %v434_v58  ;;  %v3754_v56 = vld [vmem:[%s5081_s13 + $0x2c] ss:$16 sps:$4 sm:$0xff]   ;;  %v3758_v58 = vld [vmem:[%s5081_s13 + $0x48] ss:$16 sps:$4 sm:$0xff]  }
 0x318   :  { %3452 = vmatmul.mubr.bf16.vlgmr.msra.gmra.mrb[8].mxu0 %v462_v20  ;;  %3457 = vmatprep.subr.bf16.mxu1 %v3979_v0  ;;  %v464_v41 = vpack.c.bf16 %v451_v37, %v451_v37  ;;  %v466_v1 = vpack.c.bf16 %v448_v60, %v448_v60  ;;  %v452_v18 = vcombine.high %v448_v60, %v448_v60  ;;  %v3727_v20 = vld [vmem:[%s5078_s9] sm:$0xff]   ;;  %v3764_v60 = vld [vmem:[%s5081_s13 + $0x68] ss:$16 sps:$4 sm:$0xff]  }
 0x319   :  { %3476 = vmatpush3.bf16.msra.mxu0 %v3680_v19  ;;  %3491 = vmatprep.mubr.msk.bf16.mxu0 %vm3980_vm0, %v3979_v0  ;;  %v467_v19 = vpack.c.bf16 %v450_v16, %v450_v16 }
 0x31a   :  { %3477 = vmatprep.subr.bf16.mxu0 %v3979_v0 }
 0x31b   :  { %3458 = vmatpush3.bf16.msra.mxu1 %v3681_v21  ;;  %v468_v21 = vpack.c.bf16 %v452_v18, %v452_v18 }
 0x31c   :  { %3459 = vmatprep.subr.bf16.mxu1 %v3979_v0 }
 0x31d   :  { %3478 = vmatpush3.bf16.msra.mxu0 %v3682_v22  ;;  %v3728_v22 = vld [vmem:[%s5078_s9 + $0x8] sm:$0xff]  }
 0x31e   :  { %3479 = vmatprep.subr.bf16.mxu0 %v3979_v0 }
 0x31f   :  { %3460 = vmatpush3.bf16.msra.mxu1 %v3683_v23  ;;  %v3729_v23 = vld [vmem:[%s5078_s9 + $0x10] sm:$0xff]  }
 0x320   :  { %3461 = vmatprep.subr.bf16.mxu1 %v3979_v0 }
 0x321   :  { %3480 = vmatpush3.bf16.msra.mxu0 %v3684_v24  ;;  %v3730_v24 = vld [vmem:[%s5078_s9 + $0x18] sm:$0xff]  }
 0x322   :  { %3481 = vmatprep.subr.bf16.mxu0 %v3979_v0 }
 0x323   :  { %3462 = vmatpush3.bf16.msra.mxu1 %v3685_v25  ;;  %v3731_v25 = vld [vmem:[%s5078_s9 + $0x20] sm:$0xff]  }
 0x324   :  { %3463 = vmatprep.subr.bf16.mxu1 %v3979_v0 }
 0x325   :  { %3482 = vmatpush3.bf16.msra.mxu0 %v3686_v26  ;;  %v3732_v26 = vld [vmem:[%s5078_s9 + $0x28] sm:$0xff]  }
 0x326   :  { %3483 = vmatprep.subr.bf16.mxu0 %v3979_v0 }
 0x327   :  { %3464 = vmatpush3.bf16.msra.mxu1 %v3687_v27  ;;  %v3733_v27 = vld [vmem:[%s5078_s9 + $0x30] sm:$0xff]  }
 0x328   :  { %3465 = vmatprep.subr.bf16.mxu1 %v3979_v0 }
 0x329   :  { %3484 = vmatpush3.bf16.msra.mxu0 %v3688_v28  ;;  %v3734_v28 = vld [vmem:[%s5078_s9 + $0x38] sm:$0xff]  }
 0x32a   :  { %3485 = vmatprep.subr.bf16.mxu0 %v3979_v0 }
 0x32b   :  { %3466 = vmatpush3.bf16.msra.mxu1 %v3689_v29  ;;  %v3735_v29 = vld [vmem:[%s5080_s10] sm:$0xff]  }
 0x32c   :  { %3467 = vmatprep.subr.bf16.mxu1 %v3979_v0 }
 0x32d   :  { %3486 = vmatpush3.bf16.msra.mxu0 %v3690_v30  ;;  %v3736_v30 = vld [vmem:[%s5080_s10 + $0x8] sm:$0xff]  }
 0x32e   :  { %3487 = vmatprep.subr.bf16.mxu0 %v3979_v0 }
 0x32f   :  { %3468 = vmatpush3.bf16.msra.mxu1 %v3691_v31  ;;  %v3737_v31 = vld [vmem:[%s5080_s10 + $0x10] sm:$0xff]  }
 0x330   :  { %3469 = vmatprep.subr.bf16.mxu1 %v3979_v0 }
 0x331   :  { %3488 = vmatpush3.bf16.msra.mxu0 %v3692_v32  ;;  %v3739_v32 = vld [vmem:[%s5080_s10 + $0x20] sm:$0xff]  }
 0x332   :  { %3489 = vmatprep.subr.bf16.mxu0 %v3979_v0 }
 0x333   :  { %3470 = vmatpush3.bf16.msra.mxu1 %v3693_v33  ;;  %v3740_v33 = vld [vmem:[%s5080_s10 + $0x28] sm:$0xff]  }
 0x334   :  { %3495 = vmatprep.subr.bf16.mxu1 %v3979_v0 }
 0x335   :  { %3490 = vmatpush3.bf16.msra.mxu0 %v3694_v36  ;;  %v3742_v36 = vld [vmem:[%s5080_s10 + $0x38] sm:$0xff]  }
 0x336   :  { %3472 = vmatmul.mubr.bf16.vlgmr.msra.gmra.mrb[8].mxu1 %v463_v39  ;;  %3515 = vmatprep.subr.bf16.mxu0 %v3979_v0 }
 0x337   :  { %3496 = vmatpush3.bf16.msra.mxu1 %v3695_v38  ;;  %3511 = vmatprep.mubr.msk.bf16.mxu1 %vm3980_vm0, %v3979_v0 }
 0x338   :  { %3492 = vmatmul.mubr.bf16.vlgmr.msra.gmra.mrb[12].mxu0 %v464_v41  ;;  %3497 = vmatprep.subr.bf16.mxu1 %v3979_v0 }
 0x339   :  { %3516 = vmatpush3.bf16.msra.mxu0 %v3696_v40  ;;  %3531 = vmatprep.mubr.msk.bf16.mxu0 %vm3980_vm0, %v3979_v0 }
 0x33a   :  { %3517 = vmatprep.subr.bf16.mxu0 %v3979_v0 }
 0x33b   :  { %3498 = vmatpush3.bf16.msra.mxu1 %v3697_v42 }
 0x33c   :  { %3499 = vmatprep.subr.bf16.mxu1 %v3979_v0 }
 0x33d   :  { %3518 = vmatpush3.bf16.msra.mxu0 %v3698_v43 }
 0x33e   :  { %3519 = vmatprep.subr.bf16.mxu0 %v3979_v0 }
 0x33f   :  { %3500 = vmatpush3.bf16.msra.mxu1 %v3699_v44 }
 0x340   :  { %3501 = vmatprep.subr.bf16.mxu1 %v3979_v0 }
 0x341   :  { %3520 = vmatpush3.bf16.msra.mxu0 %v3700_v45 }
 0x342   :  { %3521 = vmatprep.subr.bf16.mxu0 %v3979_v0 }
 0x343   :  { %3502 = vmatpush3.bf16.msra.mxu1 %v3701_v46 }
 0x344   :  { %3503 = vmatprep.subr.bf16.mxu1 %v3979_v0 }
 0x345   :  { %3522 = vmatpush3.bf16.msra.mxu0 %v3702_v47 }
 0x346   :  { %3523 = vmatprep.subr.bf16.mxu0 %v3979_v0 }
 0x347   :  { %3504 = vmatpush3.bf16.msra.mxu1 %v3703_v48 }
 0x348   :  { %3505 = vmatprep.subr.bf16.mxu1 %v3979_v0 }
 0x349   :  { %3524 = vmatpush3.bf16.msra.mxu0 %v3704_v49 }
 0x34a   :  { %3525 = vmatprep.subr.bf16.mxu0 %v3979_v0 }
 0x34b   :  { %3506 = vmatpush3.bf16.msra.mxu1 %v3705_v51  ;;  %v3746_v51 = vld [vmem:[%s5081_s13 + $0x8] ss:$16 sps:$4 sm:$0xff]  }
 0x34c   :  { %3507 = vmatprep.subr.bf16.mxu1 %v3979_v0 }
 0x34d   :  { %3526 = vmatpush3.bf16.msra.mxu0 %v3706_v52  ;;  %v3748_v52 = vld [vmem:[%s5081_s13 + $0xc] ss:$16 sps:$4 sm:$0xff]  }
 0x34e   :  { %3527 = vmatprep.subr.bf16.mxu0 %v3979_v0 }
 0x34f   :  { %3508 = vmatpush3.bf16.msra.mxu1 %v3707_v54  ;;  %v3752_v54 = vld [vmem:[%s5081_s13 + $0x28] ss:$16 sps:$4 sm:$0xff]  }
 0x350   :  { %3509 = vmatprep.subr.bf16.mxu1 %v3979_v0 }
 0x351   :  { %3528 = vmatpush3.bf16.msra.mxu0 %v3708_v55  ;;  %v3982_v55 = vmov 0  }
 0x352   :  { %3529 = vmatprep.subr.bf16.mxu0 %v3979_v0 }
 0x353   :  { %3510 = vmatpush3.bf16.msra.mxu1 %v3709_v57  ;;  %v3760_v57 = vld [vmem:[%s5081_s13 + $0x4c] ss:$16 sps:$4 sm:$0xff]  }
 0x354   :  { %3535 = vmatprep.subr.bf16.mxu1 %v3979_v0 }
 0x355   :  { %3530 = vmatpush3.bf16.msra.mxu0 %v3710_v59  ;;  %v3766_v59 = vld [vmem:[%s5081_s13 + $0x6c] ss:$16 sps:$4 sm:$0xff]  }
 0x356   :  { %3512 = vmatmul.mubr.bf16.vlgmr.msra.gmra.mrb[12].mxu1 %v465_v62  ;;  %3555 = vmatprep.subr.bf16.mxu0 %v3979_v0  ;;  %v3770_v62 = vld [vmem:[%s5081_s13 + $0x88] ss:$16 sps:$4 sm:$0xff]  }
 0x357   :  { %3536 = vmatpush3.bf16.msra.mxu1 %v3711_v61  ;;  %3551 = vmatprep.mubr.msk.bf16.mxu1 %vm3980_vm0, %v3979_v0  ;;  %v3772_v61 = vld [vmem:[%s5081_s13 + $0x8c] ss:$16 sps:$4 sm:$0xff]  }
 0x358   :  { %3532 = vmatmul.mubr.bf16.vlgmr.msra.gmra.mrb[16].mxu0 %v466_v1  ;;  %3537 = vmatprep.subr.bf16.mxu1 %v3979_v0  ;;  %v3776_v1 = vld [vmem:[%s5081_s13 + $0xa8] ss:$16 sps:$4 sm:$0xff]  }
 0x359   :  { %3556 = vmatpush3.bf16.msra.mxu0 %v3712_v63  ;;  %3571 = vmatprep.mubr.msk.bf16.mxu0 %vm3980_vm0, %v3979_v0  ;;  %v3778_v63 = vld [vmem:[%s5081_s13 + $0xac] ss:$16 sps:$4 sm:$0xff]  }
 0x35a   :  { %3557 = vmatprep.subr.bf16.mxu0 %v3979_v0 }
 0x35b   :  { %3538 = vmatpush3.bf16.msra.mxu1 %v3713_v2  ;;  %v3784_v2 = vld [vmem:[%s5081_s13 + $0xcc] ss:$16 sps:$4 sm:$0xff]  }
 0x35c   :  { %3539 = vmatprep.subr.bf16.mxu1 %v3979_v0 }
 0x35d   :  { %3558 = vmatpush3.bf16.msra.mxu0 %v3714_v3  ;;  %v3782_v3 = vld [vmem:[%s5081_s13 + $0xc8] ss:$16 sps:$4 sm:$0xff]  }
 0x35e   :  { %3559 = vmatprep.subr.bf16.mxu0 %v3979_v0 }
 0x35f   :  { %3540 = vmatpush3.bf16.msra.mxu1 %v3715_v4 }
 0x360   :  { %3541 = vmatprep.subr.bf16.mxu1 %v3979_v0 }
 0x361   :  { %3560 = vmatpush3.bf16.msra.mxu0 %v3716_v5  ;;  %v3790_v5 = vld [vmem:[%s5081_s13 + $0xec] ss:$16 sps:$4 sm:$0xff]  }
 0x362   :  { %3561 = vmatprep.subr.bf16.mxu0 %v3979_v0 }
 0x363   :  { %3542 = vmatpush3.bf16.msra.mxu1 %v3717_v6 }
 0x364   :  { %3543 = vmatprep.subr.bf16.mxu1 %v3979_v0 }
 0x365   :  { %3562 = vmatpush3.bf16.msra.mxu0 %v3718_v7 }
 0x366   :  { %3563 = vmatprep.subr.bf16.mxu0 %v3979_v0 }
 0x367   :  { %3544 = vmatpush3.bf16.msra.mxu1 %v3719_v8 }
 0x368   :  { %3545 = vmatprep.subr.bf16.mxu1 %v3979_v0 }
 0x369   :  { %3564 = vmatpush3.bf16.msra.mxu0 %v3720_v10 }
 0x36a   :  { %3565 = vmatprep.subr.bf16.mxu0 %v3979_v0 }
 0x36b   :  { %3546 = vmatpush3.bf16.msra.mxu1 %v3721_v11 }
 0x36c   :  { %3547 = vmatprep.subr.bf16.mxu1 %v3979_v0 }
 0x36d   :  { %3566 = vmatpush3.bf16.msra.mxu0 %v3722_v12 }
 0x36e   :  { %3567 = vmatprep.subr.bf16.mxu0 %v3979_v0 }
 0x36f   :  { %3548 = vmatpush3.bf16.msra.mxu1 %v3723_v13 }
 0x370   :  { %3549 = vmatprep.subr.bf16.mxu1 %v3979_v0 }
 0x371   :  { %3568 = vmatpush3.bf16.msra.mxu0 %v3724_v14 }
 0x372   :  { %3569 = vmatprep.subr.bf16.mxu0 %v3979_v0 }
 0x373   :  { %3550 = vmatpush3.bf16.msra.mxu1 %v3725_v15  ;;  %v3788_v15 = vld [vmem:[%s5081_s13 + $0xe8] ss:$16 sps:$4 sm:$0xff]  }
 0x374   :  { %3575 = vmatprep.subr.bf16.mxu1 %v3979_v0 }
 0x375   :  { %3570 = vmatpush3.bf16.msra.mxu0 %v3726_v17  ;;  %v3796_v17 = vld [vmem:[%s5082_s12 + $0xc] ss:$16 sps:$4 sm:$0xff]  }
 0x376   :  { %3552 = vmatmul.mubr.bf16.vlgmr.msra.gmra.mrb[16].mxu1 %v467_v19  ;;  %3595 = vmatprep.subr.bf16.mxu0 %v3979_v0 }
 0x377   :  { %3591 = vmatprep.mubr.msk.bf16.mxu1 %vm3980_vm0, %v3979_v0  ;;  %3576 = vmatpush3.bf16.msra.mxu1 %v3735_v29  ;;  %v3808_v29 = vld [vmem:[%s5082_s12 + $0x4c] ss:$16 sps:$4 sm:$0xff]  }
 0x378   :  { %3572 = vmatmul.mubr.bf16.vlgmr.msra.gmra.mrb[20].mxu0 %v468_v21  ;;  %3577 = vmatprep.subr.bf16.mxu1 %v3979_v0  ;;  %v1565_v21 = vld [vmem:[%s5104_s4] sm:$0xff] }
 0x379   :  { %3596 = vmatpush3.bf16.msra.mxu0 %v3727_v20  ;;  %3611 = vmatprep.mubr.msk.bf16.mxu0 %vm3980_vm0, %v3979_v0 }
 0x37a   :  { %3597 = vmatprep.subr.bf16.mxu0 %v3979_v0 }
 0x37b   :  { %3578 = vmatpush3.bf16.msra.mxu1 %v3736_v30  ;;  %v3806_v30 = vld [vmem:[%s5082_s12 + $0x48] ss:$16 sps:$4 sm:$0xff]  }
 0x37c   :  { %3579 = vmatprep.subr.bf16.mxu1 %v3979_v0 }
 0x37d   :  { %3598 = vmatpush3.bf16.msra.mxu0 %v3728_v22 }
 0x37e   :  { %3599 = vmatprep.subr.bf16.mxu0 %v3979_v0 }
 0x37f   :  { %3580 = vmatpush3.bf16.msra.mxu1 %v3737_v31  ;;  %v3814_v31 = vld [vmem:[%s5082_s12 + $0x6c] ss:$16 sps:$4 sm:$0xff]  }
 0x380   :  { %3581 = vmatprep.subr.bf16.mxu1 %v3979_v0 }
 0x381   :  { %3600 = vmatpush3.bf16.msra.mxu0 %v3729_v23 }
 0x382   :  { %3601 = vmatprep.subr.bf16.mxu0 %v3979_v0 }
 0x385   :  { %3602 = vmatpush3.bf16.msra.mxu0 %v3730_v24  ;;  %v3794_v24 = vld [vmem:[%s5082_s12 + $0x8] ss:$16 sps:$4 sm:$0xff]  }
 0x386   :  { %3603 = vmatprep.subr.bf16.mxu0 %v3979_v0 }
 0x389   :  { %3604 = vmatpush3.bf16.msra.mxu0 %v3731_v25  ;;  %v4627_v25 = vpack.c.bf16 %v1565_v21, %v1565_v21  ;;  %v3779_v21 = vld [vmem:[%s5081_s13 + $0xc0] ss:$16 sps:$4 sm:$0xff]  }
 0x38a   :  { %3605 = vmatprep.subr.bf16.mxu0 %v3979_v0 }
 0x38d   :  { %3606 = vmatpush3.bf16.msra.mxu0 %v3732_v26  ;;  %v3802_v26 = vld [vmem:[%s5082_s12 + $0x2c] ss:$16 sps:$4 sm:$0xff]  }
 0x38e   :  { %3607 = vmatprep.subr.bf16.mxu0 %v3979_v0 }
 0x391   :  { %3608 = vmatpush3.bf16.msra.mxu0 %v3733_v27 }
 0x392   :  { %3609 = vmatprep.subr.bf16.mxu0 %v3979_v0 }
 0x395   :  { %3610 = vmatpush3.bf16.msra.mxu0 %v3734_v28  ;;  %v3800_v28 = vld [vmem:[%s5082_s12 + $0x28] ss:$16 sps:$4 sm:$0xff]  }
 0x396   :  { %1834 = vmatprep.subr.bf16.mxu0 %v3748_v52 }
 0x398   :  { %3612 = vmatmul.mubr.bf16.vlgmr.msra.gmra.mrb[24].mxu0 %v4203_v34  ;;  %v3738_v34 = vld [vmem:[%s5080_s10 + $0x18] sm:$0xff]  }
 0x399   :  { %3582 = vmatpush3.bf16.msra.mxu1 %v3738_v34  ;;  %1866 = vmatprep.mubr.bf16.mxu0 %v3982_v55  ;;  %v3812_v34 = vld [vmem:[%s5082_s12 + $0x68] ss:$16 sps:$4 sm:$0xff]  }
 0x39a   :  { %3583 = vmatprep.subr.bf16.mxu1 %v3979_v0  ;;  %1835 = vmatpush1.bf16.msra.mxu0 %v3746_v51 }
 0x39b   :  { %1836 = vmatprep.subr.bf16.mxu0 %v3754_v56 }
 0x39d   :  { %3584 = vmatpush3.bf16.msra.mxu1 %v3739_v32  ;;  %v3820_v32 = vld [vmem:[%s5082_s12 + $0x8c] ss:$16 sps:$4 sm:$0xff]  }
 0x39e   :  { %3585 = vmatprep.subr.bf16.mxu1 %v3979_v0  ;;  %1837 = vmatpush1.bf16.msra.mxu0 %v3752_v54 }
 0x39f   :  { %1838 = vmatprep.subr.bf16.mxu0 %v3760_v57 }
 0x3a1   :  { %3586 = vmatpush3.bf16.msra.mxu1 %v3740_v33  ;;  %v3818_v33 = vld [vmem:[%s5082_s12 + $0x88] ss:$16 sps:$4 sm:$0xff]  }
 0x3a2   :  { %3587 = vmatprep.subr.bf16.mxu1 %v3979_v0  ;;  %1839 = vmatpush1.bf16.msra.mxu0 %v3758_v58 }
 0x3a3   :  { %1840 = vmatprep.subr.bf16.mxu0 %v3766_v59 }
 0x3a5   :  { %3588 = vmatpush3.bf16.msra.mxu1 %v3741_v35  ;;  %v3826_v35 = vld [vmem:[%s5082_s12 + $0xac] ss:$16 sps:$4 sm:$0xff]  }
 0x3a6   :  { %3589 = vmatprep.subr.bf16.mxu1 %v3979_v0  ;;  %1841 = vmatpush1.bf16.msra.mxu0 %v3764_v60 }
 0x3a7   :  { %1842 = vmatprep.subr.bf16.mxu0 %v3772_v61 }
 0x3a9   :  { %3590 = vmatpush3.bf16.msra.mxu1 %v3742_v36  ;;  %v3824_v36 = vld [vmem:[%s5082_s12 + $0xa8] ss:$16 sps:$4 sm:$0xff]  }
 0x3aa   :  { %1793 = vmatprep.subr.bf16.mxu1 %v3745_v50  ;;  %1843 = vmatpush1.bf16.msra.mxu0 %v3770_v62 }
 0x3ab   :  { %1844 = vmatprep.subr.bf16.mxu0 %v3778_v63 }
 0x3ae   :  { %1845 = vmatpush1.bf16.msra.mxu0 %v3776_v1 }
 0x3af   :  { %1846 = vmatprep.subr.bf16.mxu0 %v3784_v2 }
 0x3b2   :  { %1847 = vmatpush1.bf16.msra.mxu0 %v3782_v3 }
 0x3b3   :  { %1848 = vmatprep.subr.bf16.mxu0 %v3790_v5 }
 0x3b6   :  { %1849 = vmatpush1.bf16.msra.mxu0 %v3788_v15  ;;  %v3761_v15 = vld [vmem:[%s5081_s13 + $0x60] ss:$16 sps:$4 sm:$0xff]  }
 0x3b7   :  { %2076 = vmatprep.subr.bf16.mxu0 %v3796_v17  ;;  %v3767_v17 = vld [vmem:[%s5081_s13 + $0x80] ss:$16 sps:$4 sm:$0xff]  }
 0x3b9   :  { %1867 = vmatmul.mubr.bf16.vlgmr.msra.gmra.mrb[28].mxu0 %v4627_v25 }
 0x3ba   :  { %2077 = vmatpush1.bf16.msra.mxu0 %v3794_v24  ;;  %2108 = vmatprep.mubr.bf16.mxu0 %v3982_v55 }
 0x3bb   :  { %2078 = vmatprep.subr.bf16.mxu0 %v3802_v26 }
 0x3be   :  { %2079 = vmatpush1.bf16.msra.mxu0 %v3800_v28  ;;  %v3785_v28 = vld [vmem:[%s5081_s13 + $0xe0] ss:$16 sps:$4 sm:$0xff]  }
 0x3bf   :  { %2080 = vmatprep.subr.bf16.mxu0 %v3808_v29  ;;  %v3793_v29 = vld [vmem:[%s5082_s12 + $0x4] ss:$16 sps:$4 sm:$0xff]  }
 0x3c2   :  { %2081 = vmatpush1.bf16.msra.mxu0 %v3806_v30  ;;  %v3791_v30 = vld [vmem:[%s5082_s12] ss:$16 sps:$4 sm:$0xff]  }
 0x3c3   :  { %2082 = vmatprep.subr.bf16.mxu0 %v3814_v31  ;;  %v3799_v31 = vld [vmem:[%s5082_s12 + $0x24] ss:$16 sps:$4 sm:$0xff]  }
 0x3c6   :  { %2083 = vmatpush1.bf16.msra.mxu0 %v3812_v34  ;;  %v3797_v34 = vld [vmem:[%s5082_s12 + $0x20] ss:$16 sps:$4 sm:$0xff]  }
 0x3c7   :  { %2084 = vmatprep.subr.bf16.mxu0 %v3820_v32  ;;  %v3805_v32 = vld [vmem:[%s5082_s12 + $0x44] ss:$16 sps:$4 sm:$0xff]  }
 0x3ca   :  { %2085 = vmatpush1.bf16.msra.mxu0 %v3818_v33  ;;  %v3803_v33 = vld [vmem:[%s5082_s12 + $0x40] ss:$16 sps:$4 sm:$0xff]  }
 0x3cb   :  { %2086 = vmatprep.subr.bf16.mxu0 %v3826_v35  ;;  %v3809_v35 = vld [vmem:[%s5082_s12 + $0x60] ss:$16 sps:$4 sm:$0xff]  }
 0x3ce   :  { %2087 = vmatpush1.bf16.msra.mxu0 %v3824_v36  ;;  %v3817_v36 = vld [vmem:[%s5082_s12 + $0x84] ss:$16 sps:$4 sm:$0xff]  }
 0x3e9   :  { %v679_v37 = vpop.f32.mrb[4].mxu1 }
 0x3ea   :  { %v3433_v38 = vpop.f32.mrb[5].mxu1  ;;  %v1317_v41 = vpack.c.bf16 %v679_v37, %v679_v37 }
 0x3eb   :  { %v682_v39 = vpop.f32.mrb[6].mxu1  ;;  %v767_v40 = vpop.f32.mrb[8].mxu0 }
 0x3ec   :  { %v1318_v42 = vpack.c.bf16 %v767_v40, %v767_v40  ;;  %v3434_v43 = vpop.f32.mrb[7].mxu1  ;;  %v3453_v44 = vpop.f32.mrb[9].mxu0  ;;  %v1349_v48 = vunpack.c.l.b16 %v1317_v41 }
 0x3ed   :  { %v770_v45 = vpop.f32.mrb[10].mxu0 }
 0x3ee   :  { %v1350_v46 = vunpack.c.l.b16 %v1318_v42  ;;  %v3454_v47 = vpop.f32.mrb[11].mxu0 }
 0x3f0   :  { %v1357_v49 = vrot.slane %v1350_v46, 7 }
 0x3f2   :  { %v1359_v53 = vsel %vm1358_vm1, %v1357_v49, %v1349_v48 }
 0x409   :  { %v855_v4 = vpop.f32.mrb[8].mxu1 }
 0x40a   :  { %v1319_v6 = vpack.c.bf16 %v855_v4, %v855_v4  ;;  %v3473_v7 = vpop.f32.mrb[9].mxu1 }
 0x40b   :  { %v858_v8 = vpop.f32.mrb[10].mxu1  ;;  %v943_v10 = vpop.f32.mrb[12].mxu0  ;;  %v3743_v7 = vld [vmem:[%s5081_s13] ss:$16 sps:$4 sm:$0xff]  }
 0x40c   :  { %v1351_v11 = vunpack.c.l.b16 %v1319_v6  ;;  %v1320_v12 = vpack.c.bf16 %v943_v10, %v943_v10  ;;  %v3474_v13 = vpop.f32.mrb[11].mxu1  ;;  %v3493_v14 = vpop.f32.mrb[13].mxu0  ;;  %v3751_v10 = vld [vmem:[%s5081_s13 + $0x24] ss:$16 sps:$4 sm:$0xff]  }
 0x40d   :  { %v946_v16 = vpop.f32.mrb[14].mxu0  ;;  %v3755_v13 = vld [vmem:[%s5081_s13 + $0x40] ss:$16 sps:$4 sm:$0xff]   ;;  %v3763_v14 = vld [vmem:[%s5081_s13 + $0x64] ss:$16 sps:$4 sm:$0xff]  }
 0x40e   :  { %v1360_v18 = vrot.slane %v1351_v11, 6  ;;  %v1352_v19 = vunpack.c.l.b16 %v1320_v12  ;;  %v3494_v20 = vpop.f32.mrb[15].mxu0  ;;  %v3749_v11 = vld [vmem:[%s5081_s13 + $0x20] ss:$16 sps:$4 sm:$0xff]   ;;  %v3757_v12 = vld [vmem:[%s5081_s13 + $0x44] ss:$16 sps:$4 sm:$0xff]  }
 0x40f   :  { %v3769_v16 = vld [vmem:[%s5081_s13 + $0x84] ss:$16 sps:$4 sm:$0xff]  }
 0x410   :  { %v1362_v22 = vsel %vm1361_vm2, %v1360_v18, %v1359_v53  ;;  %v1363_v23 = vrot.slane %v1352_v19, 5  ;;  %v3775_v18 = vld [vmem:[%s5081_s13 + $0xa4] ss:$16 sps:$4 sm:$0xff]   ;;  %v3773_v19 = vld [vmem:[%s5081_s13 + $0xa0] ss:$16 sps:$4 sm:$0xff]  }
 0x411   :  { %v3781_v20 = vld [vmem:[%s5081_s13 + $0xc4] ss:$16 sps:$4 sm:$0xff]  }
 0x412   :  { %v1365_v27 = vsel %vm1364_vm3, %v1363_v23, %v1362_v22  ;;  %v3787_v23 = vld [vmem:[%s5081_s13 + $0xe4] ss:$16 sps:$4 sm:$0xff]  }
 0x429   :  { %v1031_v37 = vpop.f32.mrb[12].mxu1 }
 0x42a   :  { %v1321_v38 = vpack.c.bf16 %v1031_v37, %v1031_v37  ;;  %v3513_v39 = vpop.f32.mrb[13].mxu1  ;;  %v3815_v37 = vld [vmem:[%s5082_s12 + $0x80] ss:$16 sps:$4 sm:$0xff]  }
 0x42b   :  { %v1034_v40 = vpop.f32.mrb[14].mxu1  ;;  %v1119_v41 = vpop.f32.mrb[16].mxu0  ;;  %v3821_v39 = vld [vmem:[%s5082_s12 + $0xa0] ss:$16 sps:$4 sm:$0xff]  }
 0x42c   :  { %v1353_v42 = vunpack.c.l.b16 %v1321_v38  ;;  %v1322_v43 = vpack.c.bf16 %v1119_v41, %v1119_v41  ;;  %v3514_v44 = vpop.f32.mrb[15].mxu1  ;;  %v3533_v45 = vpop.f32.mrb[17].mxu0  ;;  %v3823_v38 = vld [vmem:[%s5082_s12 + $0xa4] ss:$16 sps:$4 sm:$0xff]   ;;  %v3832_v41 = vld [vmem:[%s5082_s12 + $0xcc] ss:$16 sps:$4 sm:$0xff]  }
 0x42d   :  { %v1122_v46 = vpop.f32.mrb[18].mxu0  ;;  %v3829_v40 = vld [vmem:[%s5082_s12 + $0xc4] ss:$16 sps:$4 sm:$0xff]   ;;  %2088 = vmatprep.subr.bf16.mxu0 %v3832_v41  ;;  %v3838_v45 = vld [vmem:[%s5082_s12 + $0xec] ss:$16 sps:$4 sm:$0xff]  }
 0x42e   :  { %v1366_v47 = vrot.slane %v1353_v42, 4  ;;  %v1354_v48 = vunpack.c.l.b16 %v1322_v43  ;;  %v3534_v49 = vpop.f32.mrb[19].mxu0  ;;  %v3827_v42 = vld [vmem:[%s5082_s12 + $0xc0] ss:$16 sps:$4 sm:$0xff]   ;;  %v3830_v43 = vld [vmem:[%s5082_s12 + $0xc8] ss:$16 sps:$4 sm:$0xff]  }
 0x42f   :  { %2089 = vmatpush1.bf16.msra.mxu0 %v3830_v43  ;;  %v3835_v44 = vld [vmem:[%s5082_s12 + $0xe4] ss:$16 sps:$4 sm:$0xff]   ;;  %v3833_v46 = vld [vmem:[%s5082_s12 + $0xe0] ss:$16 sps:$4 sm:$0xff]   ;;  %v3844_v49 = vld [vmem:[%s5081_s13 + $0x10c] ss:$16 sps:$4 sm:$0xff]  }
 0x430   :  { %v1368_v50 = vsel %vm1367_vm4, %v1366_v47, %v1365_v27  ;;  %v1369_v51 = vrot.slane %v1354_v48, 3  ;;  %v3836_v47 = vld [vmem:[%s5082_s12 + $0xe8] ss:$16 sps:$4 sm:$0xff]   ;;  %2090 = vmatprep.subr.bf16.mxu0 %v3838_v45  ;;  %v3841_v48 = vld [vmem:[%s5081_s13 + $0x104] ss:$16 sps:$4 sm:$0xff]  }
 0x431   :  { %v3890_v41 = vld [vmem:[%s5082_s12 + $0x108] ss:$16 sps:$4 sm:$0xff]   ;;  %v3898_v43 = vld [vmem:[%s5082_s12 + $0x12c] ss:$16 sps:$4 sm:$0xff]  }
 0x432   :  { %v1371_v52 = vsel %vm1370_vm5, %v1369_v51, %v1368_v50  ;;  %v3896_v45 = vld [vmem:[%s5082_s12 + $0x128] ss:$16 sps:$4 sm:$0xff]  }
 0x433   :  { %2091 = vmatpush1.bf16.msra.mxu0 %v3836_v47  ;;  %v3899_v47 = vld [vmem:[%s5082_s12 + $0x140] ss:$16 sps:$4 sm:$0xff]  }
 0x434   :  { %2442 = vmatprep.subr.bf16.mxu0 %v3844_v49  ;;  %v3907_v49 = vld [vmem:[%s5082_s12 + $0x164] ss:$16 sps:$4 sm:$0xff]  }
 0x449   :  { %v1207_v53 = vpop.f32.mrb[16].mxu1 }
 0x44a   :  { %v1323_v54 = vpack.c.bf16 %v1207_v53, %v1207_v53  ;;  %v3553_v56 = vpop.f32.mrb[17].mxu1 }
 0x44b   :  { %v1210_v57 = vpop.f32.mrb[18].mxu1  ;;  %v1295_v58 = vpop.f32.mrb[20].mxu0  ;;  %v3016_v56 = vld [vmem:[%s5083_s11] ss:$0 sm:$0xff] }
 0x44c   :  { %v1355_v59 = vunpack.c.l.b16 %v1323_v54  ;;  %v1324_v60 = vpack.c.bf16 %v1295_v58, %v1295_v58  ;;  %v3554_v61 = vpop.f32.mrb[19].mxu1  ;;  %v3573_v62 = vpop.f32.mrb[21].mxu0 }
 0x44d   :  { %v1298_v63 = vpop.f32.mrb[22].mxu0 }
 0x44e   :  { %v1372_v1 = vrot.slane %v1355_v59, 2  ;;  %v1356_v2 = vunpack.c.l.b16 %v1324_v60  ;;  %v3574_v3 = vpop.f32.mrb[23].mxu0  ;;  %v3839_v63 = vld [vmem:[%s5081_s13 + $0x100] ss:$16 sps:$4 sm:$0xff]  }
 0x44f   :  { %v3847_v3 = vld [vmem:[%s5081_s13 + $0x124] ss:$16 sps:$4 sm:$0xff]  }
 0x450   :  { %v1374_v4 = vsel %vm1373_vm6, %v1372_v1, %v1371_v52  ;;  %v1375_v5 = vrot.slane %v1356_v2, 1  ;;  %v3842_v1 = vld [vmem:[%s5081_s13 + $0x108] ss:$16 sps:$4 sm:$0xff]  }
 0x452   :  { %v1377_v6 = vsel %vm1376_vm7, %v1375_v5, %v1374_v4  ;;  %v3850_v4 = vld [vmem:[%s5081_s13 + $0x12c] ss:$16 sps:$4 sm:$0xff]   ;;  %v3845_v5 = vld [vmem:[%s5081_s13 + $0x120] ss:$16 sps:$4 sm:$0xff]  }
 0x453   :  { %v1378_v8 = vpack.c.b16 %v1377_v6, %v1377_v6  ;;  %v3848_v6 = vld [vmem:[%s5081_s13 + $0x128] ss:$16 sps:$4 sm:$0xff]  }
 0x455   :  { %3592 = vmatmul.mubr.bf16.vlgmr.msra.gmra.mrb[20].mxu1 %v1378_v8  ;;  %v3856_v8 = vld [vmem:[%s5081_s13 + $0x14c] ss:$16 sps:$4 sm:$0xff]  }
 0x456   :  { %1794 = vmatpush1.bf16.msra.mxu1 %v3743_v7  ;;  %1825 = vmatprep.mubr.bf16.mxu1 %v3982_v55  ;;  %v3853_v7 = vld [vmem:[%s5081_s13 + $0x144] ss:$16 sps:$4 sm:$0xff]  }
 0x457   :  { %1795 = vmatprep.subr.bf16.mxu1 %v3751_v10  ;;  %v3851_v10 = vld [vmem:[%s5081_s13 + $0x140] ss:$16 sps:$4 sm:$0xff]  }
 0x45a   :  { %1796 = vmatpush1.bf16.msra.mxu1 %v3749_v11  ;;  %v3854_v11 = vld [vmem:[%s5081_s13 + $0x148] ss:$16 sps:$4 sm:$0xff]  }
 0x45b   :  { %1797 = vmatprep.subr.bf16.mxu1 %v3757_v12  ;;  %v3859_v12 = vld [vmem:[%s5081_s13 + $0x164] ss:$16 sps:$4 sm:$0xff]  }
 0x45e   :  { %1798 = vmatpush1.bf16.msra.mxu1 %v3755_v13  ;;  %v3862_v13 = vld [vmem:[%s5081_s13 + $0x16c] ss:$16 sps:$4 sm:$0xff]  }
 0x45f   :  { %1799 = vmatprep.subr.bf16.mxu1 %v3763_v14  ;;  %v3857_v14 = vld [vmem:[%s5081_s13 + $0x160] ss:$16 sps:$4 sm:$0xff]  }
 0x462   :  { %1800 = vmatpush1.bf16.msra.mxu1 %v3761_v15  ;;  %v3860_v15 = vld [vmem:[%s5081_s13 + $0x168] ss:$16 sps:$4 sm:$0xff]  }
 0x463   :  { %1801 = vmatprep.subr.bf16.mxu1 %v3769_v16 }
 0x466   :  { %1802 = vmatpush1.bf16.msra.mxu1 %v3767_v17 }
 0x467   :  { %1803 = vmatprep.subr.bf16.mxu1 %v3775_v18 }
 0x46a   :  { %1804 = vmatpush1.bf16.msra.mxu1 %v3773_v19 }
 0x46b   :  { %v4701_v22 = vpop.f32.mrb[24].mxu0  ;;  %1805 = vmatprep.subr.bf16.mxu1 %v3781_v20  ;;  %v3865_v20 = vld [vmem:[%s5081_s13 + $0x184] ss:$16 sps:$4 sm:$0xff]  }
 0x46c   :  { %v3613_v24 = vpop.f32.mrb[25].mxu0 }
 0x46d   :  { %v1553_v26 = vpop.f32.mrb[26].mxu0  ;;  %v3871_v24 = vld [vmem:[%s5081_s13 + $0x1a4] ss:$16 sps:$4 sm:$0xff]  }
 0x46e   :  { %v3614_v27 = vpop.f32.mrb[27].mxu0  ;;  %1806 = vmatpush1.bf16.msra.mxu1 %v3779_v21  ;;  %v3863_v21 = vld [vmem:[%s5081_s13 + $0x180] ss:$16 sps:$4 sm:$0xff]  }
 0x46f   :  { %1807 = vmatprep.subr.bf16.mxu1 %v3787_v23  ;;  %v3866_v23 = vld [vmem:[%s5081_s13 + $0x188] ss:$16 sps:$4 sm:$0xff]   ;;  %v3869_v26 = vld [vmem:[%s5081_s13 + $0x1a0] ss:$16 sps:$4 sm:$0xff]   ;;  %v3874_v27 = vld [vmem:[%s5081_s13 + $0x1ac] ss:$16 sps:$4 sm:$0xff]  }
 0x472   :  { %1808 = vmatpush1.bf16.msra.mxu1 %v3785_v28  ;;  %v3872_v28 = vld [vmem:[%s5081_s13 + $0x1a8] ss:$16 sps:$4 sm:$0xff]  }
 0x473   :  { %2035 = vmatprep.subr.bf16.mxu1 %v3793_v29  ;;  %v3877_v29 = vld [vmem:[%s5081_s13 + $0x1c4] ss:$16 sps:$4 sm:$0xff]  }
 0x475   :  { %1826 = vmatmul.mubr.bf16.vlgmr.msra.gmra.mrb[24].mxu1 %v4627_v25  ;;  %v3811_v25 = vld [vmem:[%s5082_s12 + $0x64] ss:$16 sps:$4 sm:$0xff]  }
 0x476   :  { %2036 = vmatpush1.bf16.msra.mxu1 %v3791_v30  ;;  %2067 = vmatprep.mubr.bf16.mxu1 %v3982_v55  ;;  %v3875_v30 = vld [vmem:[%s5081_s13 + $0x1c0] ss:$16 sps:$4 sm:$0xff]  }
 0x477   :  { %2037 = vmatprep.subr.bf16.mxu1 %v3799_v31  ;;  %v3880_v31 = vld [vmem:[%s5081_s13 + $0x1cc] ss:$16 sps:$4 sm:$0xff]  }
 0x47a   :  { %2038 = vmatpush1.bf16.msra.mxu1 %v3797_v34  ;;  %v3878_v34 = vld [vmem:[%s5081_s13 + $0x1c8] ss:$16 sps:$4 sm:$0xff]  }
 0x47b   :  { %2039 = vmatprep.subr.bf16.mxu1 %v3805_v32  ;;  %v3883_v32 = vld [vmem:[%s5081_s13 + $0x1e4] ss:$16 sps:$4 sm:$0xff]  }
 0x47e   :  { %2040 = vmatpush1.bf16.msra.mxu1 %v3803_v33  ;;  %v3881_v33 = vld [vmem:[%s5081_s13 + $0x1e0] ss:$16 sps:$4 sm:$0xff]  }
 0x47f   :  { %2041 = vmatprep.subr.bf16.mxu1 %v3811_v25  ;;  %v3886_v25 = vld [vmem:[%s5081_s13 + $0x1ec] ss:$16 sps:$4 sm:$0xff]  }
 0x482   :  { %2042 = vmatpush1.bf16.msra.mxu1 %v3809_v35  ;;  %v3884_v35 = vld [vmem:[%s5081_s13 + $0x1e8] ss:$16 sps:$4 sm:$0xff]  }
 0x483   :  { %2043 = vmatprep.subr.bf16.mxu1 %v3817_v36  ;;  %v3084_v36 = vld [vmem:[%s5104_s4 + $0x8] sm:$0xff] }
 0x486   :  { %2044 = vmatpush1.bf16.msra.mxu1 %v3815_v37  ;;  %v2207_v37 = vpack.c.bf16 %v3084_v36, %v3084_v36 }
 0x487   :  { %2045 = vmatprep.subr.bf16.mxu1 %v3823_v38  ;;  %v3889_v38 = vld [vmem:[%s5082_s12 + $0x104] ss:$16 sps:$4 sm:$0xff]  }
 0x48a   :  { %2046 = vmatpush1.bf16.msra.mxu1 %v3821_v39  ;;  %v3892_v39 = vld [vmem:[%s5082_s12 + $0x10c] ss:$16 sps:$4 sm:$0xff]  }
 0x48b   :  { %2047 = vmatprep.subr.bf16.mxu1 %v3829_v40  ;;  %v3887_v40 = vld [vmem:[%s5082_s12 + $0x100] ss:$16 sps:$4 sm:$0xff]  }
 0x48c   :  { %v4777_v50 = vpop.f32.mrb[28].mxu0 }
 0x48d   :  { %v4779_v51 = vpop.f32.mrb[29].mxu0 }
 0x48e   :  { %2048 = vmatpush1.bf16.msra.mxu1 %v3827_v42  ;;  %v1872_v52 = vpop.f32.mrb[30].mxu0  ;;  %v3895_v42 = vld [vmem:[%s5082_s12 + $0x124] ss:$16 sps:$4 sm:$0xff]  }
 0x48f   :  { %2049 = vmatprep.subr.bf16.mxu1 %v3835_v44  ;;  %v1873_v53 = vpop.f32.mrb[31].mxu0  ;;  %v3893_v44 = vld [vmem:[%s5082_s12 + $0x120] ss:$16 sps:$4 sm:$0xff]   ;;  %v3910_v52 = vld [vmem:[%s5082_s12 + $0x16c] ss:$16 sps:$4 sm:$0xff]  }
 0x490   :  { %v3905_v53 = vld [vmem:[%s5082_s12 + $0x160] ss:$16 sps:$4 sm:$0xff]  }
 0x492   :  { %2050 = vmatpush1.bf16.msra.mxu1 %v3833_v46  ;;  %v3901_v46 = vld [vmem:[%s5082_s12 + $0x144] ss:$16 sps:$4 sm:$0xff]  }
 0x493   :  { %2401 = vmatprep.subr.bf16.mxu1 %v3841_v48  ;;  %v3902_v48 = vld [vmem:[%s5082_s12 + $0x148] ss:$16 sps:$4 sm:$0xff]  }
 0x528   :  { %v1462_v54 = vpop.f32.mrb[20].mxu1 }
 0x529   :  { %v1551_v57 = vadd.f32 %v4701_v22, %v1462_v54  ;;  %v3593_v58 = vpop.f32.mrb[21].mxu1  ;;  %v3868_v22 = vld [vmem:[%s5081_s13 + $0x18c] ss:$16 sps:$4 sm:$0xff]   ;;  %v3908_v54 = vld [vmem:[%s5082_s12 + $0x168] ss:$16 sps:$4 sm:$0xff]  }
 0x52a   :  { %v1465_v59 = vpop.f32.mrb[22].mxu1  ;;  %v3911_v58 = vld [vmem:[%s5082_s12 + $0x180] ss:$16 sps:$4 sm:$0xff]  }
 0x52b   :  { %v1563_v60 = vadd.f32 %v3016_v56, %v1551_v57  ;;  %v3594_v61 = vpop.f32.mrb[23].mxu1  ;;  %v3913_v56 = vld [vmem:[%s5082_s12 + $0x184] ss:$16 sps:$4 sm:$0xff]   ;;  %v3916_v57 = vld [vmem:[%s5082_s12 + $0x18c] ss:$16 sps:$4 sm:$0xff]  }
 0x52c   :  { %v3914_v59 = vld [vmem:[%s5082_s12 + $0x188] ss:$16 sps:$4 sm:$0xff]   ;;  %v3917_v61 = vld [vmem:[%s5082_s12 + $0x1a0] ss:$16 sps:$4 sm:$0xff]  }
 0x52d   :  { %v1564_v62 = vmax.f32 %v1563_v60, 0.0  ;;  %v3919_v60 = vld [vmem:[%s5082_s12 + $0x1a4] ss:$16 sps:$4 sm:$0xff]  }
 0x52f   :  { %v1567_v2 = vpack.c.bf16 %v1564_v62, %v1564_v62  ;;  %v3922_v62 = vld [vmem:[%s5082_s12 + $0x1ac] ss:$16 sps:$4 sm:$0xff]  }
 0x531   :  { %2068 = vmatmul.mubr.bf16.vlgmr.msra.gmra.mrb[28].mxu1 %v1567_v2  ;;  %2109 = vmatmul.mubr.bf16.vlgmr.msra.gmra.mrb[32].mxu0 %v1567_v2  ;;  %v3928_v2 = vld [vmem:[%s5082_s12 + $0x1cc] ss:$16 sps:$4 sm:$0xff]  }
 0x532   :  { %2402 = vmatpush1.bf16.msra.mxu1 %v3839_v63  ;;  %2443 = vmatpush1.bf16.msra.mxu0 %v3842_v1  ;;  %v3920_v63 = vld [vmem:[%s5082_s12 + $0x1a8] ss:$16 sps:$4 sm:$0xff]   ;;  %v3925_v1 = vld [vmem:[%s5082_s12 + $0x1c4] ss:$16 sps:$4 sm:$0xff]  }
 0x533   :  { %2403 = vmatprep.subr.bf16.mxu1 %v3847_v3  ;;  %2444 = vmatprep.subr.bf16.mxu0 %v3850_v4  ;;  %v3923_v3 = vld [vmem:[%s5082_s12 + $0x1c0] ss:$16 sps:$4 sm:$0xff]   ;;  %v3926_v4 = vld [vmem:[%s5082_s12 + $0x1c8] ss:$16 sps:$4 sm:$0xff]  }
 0x534   :  { %2433 = vmatprep.mubr.bf16.mxu1 %v3982_v55  ;;  %2474 = vmatprep.mubr.bf16.mxu0 %v3982_v55 }
 0x536   :  { %2404 = vmatpush1.bf16.msra.mxu1 %v3845_v5  ;;  %2445 = vmatpush1.bf16.msra.mxu0 %v3848_v6  ;;  %v3931_v5 = vld [vmem:[%s5082_s12 + $0x1e4] ss:$16 sps:$4 sm:$0xff]   ;;  %v3934_v6 = vld [vmem:[%s5082_s12 + $0x1ec] ss:$16 sps:$4 sm:$0xff]  }
 0x537   :  { %2405 = vmatprep.subr.bf16.mxu1 %v3853_v7  ;;  %2446 = vmatprep.subr.bf16.mxu0 %v3856_v8  ;;  %v3929_v7 = vld [vmem:[%s5082_s12 + $0x1e0] ss:$16 sps:$4 sm:$0xff]   ;;  %v3932_v8 = vld [vmem:[%s5082_s12 + $0x1e8] ss:$16 sps:$4 sm:$0xff]  }
 0x53a   :  { %2406 = vmatpush1.bf16.msra.mxu1 %v3851_v10  ;;  %2447 = vmatpush1.bf16.msra.mxu0 %v3854_v11  ;;  %v2121_v10 = vsub.s32 0, %v4275_v9  ;;  %v2117_v11 = vld [vmem:[%s5084_s14] sm:$0xf] }
 0x53b   :  { %2407 = vmatprep.subr.bf16.mxu1 %v3859_v12  ;;  %2448 = vmatprep.subr.bf16.mxu0 %v3862_v13  ;;  %v2125_v12 = vsub.s32 1, %v4275_v9 }
 0x53c   :  { %v2122_v13 = vrot.slane %v2117_v11, %v2121_v10 }
 0x53e   :  { %2408 = vmatpush1.bf16.msra.mxu1 %v3857_v14  ;;  %2449 = vmatpush1.bf16.msra.mxu0 %v3860_v15 }
 0x53f   :  { %2409 = vmatprep.subr.bf16.mxu1 %v3865_v20  ;;  %2450 = vmatprep.subr.bf16.mxu0 %v3868_v22 }
 0x542   :  { %2410 = vmatpush1.bf16.msra.mxu1 %v3863_v21  ;;  %2451 = vmatpush1.bf16.msra.mxu0 %v3866_v23 }
 0x543   :  { %2411 = vmatprep.subr.bf16.mxu1 %v3871_v24  ;;  %2452 = vmatprep.subr.bf16.mxu0 %v3874_v27 }
 0x546   :  { %2412 = vmatpush1.bf16.msra.mxu1 %v3869_v26  ;;  %2453 = vmatpush1.bf16.msra.mxu0 %v3872_v28  ;;  %v2133_v26 = vsub.s32 3, %v4275_v9 }
 0x547   :  { %2413 = vmatprep.subr.bf16.mxu1 %v3877_v29  ;;  %2454 = vmatprep.subr.bf16.mxu0 %v3880_v31 }
 0x548   :  { %v4829_v16 = vpop.f32.mrb[24].mxu1 }
 0x549   :  { %v4831_v17 = vpop.f32.mrb[25].mxu1 }
 0x54a   :  { %v1831_v18 = vpop.f32.mrb[26].mxu1  ;;  %2414 = vmatpush1.bf16.msra.mxu1 %v3875_v30  ;;  %2455 = vmatpush1.bf16.msra.mxu0 %v3878_v34 }
 0x54b   :  { %v1832_v19 = vpop.f32.mrb[27].mxu1  ;;  %2415 = vmatprep.subr.bf16.mxu1 %v3883_v32  ;;  %2456 = vmatprep.subr.bf16.mxu0 %v3886_v25  ;;  %v2126_v18 = vrot.slane %v2117_v11, %v2125_v12 }
 0x54e   :  { %2416 = vmatpush1.bf16.msra.mxu1 %v3881_v33  ;;  %2457 = vmatpush1.bf16.msra.mxu0 %v3884_v35 }
 0x54f   :  { %2643 = vmatprep.subr.bf16.mxu1 %v3889_v38  ;;  %2684 = vmatprep.subr.bf16.mxu0 %v3892_v39 }
 0x551   :  { %2434 = vmatmul.mubr.bf16.vlgmr.msra.gmra.mrb[32].mxu1 %v2207_v37  ;;  %2475 = vmatmul.mubr.bf16.vlgmr.msra.gmra.mrb[36].mxu0 %v2207_v37 }
 0x552   :  { %2675 = vmatprep.mubr.bf16.mxu1 %v3982_v55  ;;  %2644 = vmatpush1.bf16.msra.mxu1 %v3887_v40 }
 0x553   :  { %2685 = vmatpush1.bf16.msra.mxu0 %v3890_v41  ;;  %2716 = vmatprep.mubr.bf16.mxu0 %v3982_v55  ;;  %v3904_v55 = vld [vmem:[%s5082_s12 + $0x14c] ss:$16 sps:$4 sm:$0xff]  }
 0x554   :  { %2645 = vmatprep.subr.bf16.mxu1 %v3895_v42  ;;  %2686 = vmatprep.subr.bf16.mxu0 %v3898_v43  ;;  %v1566_v42 = vld [vmem:[%s5085_s2] sm:$0xff] }
 0x556   :  { %2646 = vmatpush1.bf16.msra.mxu1 %v3893_v44 }
 0x557   :  { %2687 = vmatpush1.bf16.msra.mxu0 %v3896_v45  ;;  %2647 = vmatprep.subr.bf16.mxu1 %v3901_v46 }
 0x558   :  { %2688 = vmatprep.subr.bf16.mxu0 %v3904_v55 }
 0x55a   :  { %2648 = vmatpush1.bf16.msra.mxu1 %v3899_v47 }
 0x55b   :  { %2689 = vmatpush1.bf16.msra.mxu0 %v3902_v48  ;;  %2649 = vmatprep.subr.bf16.mxu1 %v3907_v49 }
 0x55c   :  { %2690 = vmatprep.subr.bf16.mxu0 %v3910_v52 }
 0x55e   :  { %2650 = vmatpush1.bf16.msra.mxu1 %v3905_v53 }
 0x55f   :  { %2691 = vmatpush1.bf16.msra.mxu0 %v3908_v54  ;;  %2651 = vmatprep.subr.bf16.mxu1 %v3913_v56 }
 0x560   :  { %2692 = vmatprep.subr.bf16.mxu0 %v3916_v57 }
 0x562   :  { %2652 = vmatpush1.bf16.msra.mxu1 %v3911_v58 }
 0x563   :  { %2693 = vmatpush1.bf16.msra.mxu0 %v3914_v59  ;;  %2653 = vmatprep.subr.bf16.mxu1 %v3919_v60 }
 0x564   :  { %2694 = vmatprep.subr.bf16.mxu0 %v3922_v62 }
 0x566   :  { %2654 = vmatpush1.bf16.msra.mxu1 %v3917_v61 }
 0x567   :  { %2695 = vmatpush1.bf16.msra.mxu0 %v3920_v63  ;;  %2655 = vmatprep.subr.bf16.mxu1 %v3925_v1  ;;  %v3935_v63 = vld [vmem:[%s5088_s15] sm:$0xff]   ;;  %v3936_v1 = vld [vmem:[%s5088_s15 + $0x8] sm:$0xff]  }
 0x568   :  { %2696 = vmatprep.subr.bf16.mxu0 %v3928_v2  ;;  %v3937_v2 = vld [vmem:[%s5088_s15 + $0x10] sm:$0xff]  }
 0x56a   :  { %2656 = vmatpush1.bf16.msra.mxu1 %v3923_v3  ;;  %v3938_v3 = vld [vmem:[%s5088_s15 + $0x18] sm:$0xff]  }
 0x56b   :  { %2697 = vmatpush1.bf16.msra.mxu0 %v3926_v4  ;;  %2657 = vmatprep.subr.bf16.mxu1 %v3931_v5  ;;  %v3939_v4 = vld [vmem:[%s5088_s15 + $0x20] sm:$0xff]   ;;  %v3940_v5 = vld [vmem:[%s5088_s15 + $0x28] sm:$0xff]  }
 0x56c   :  { %2698 = vmatprep.subr.bf16.mxu0 %v3934_v6  ;;  %v3941_v6 = vld [vmem:[%s5088_s15 + $0x30] sm:$0xff]  }
 0x56e   :  { %2658 = vmatpush1.bf16.msra.mxu1 %v3929_v7  ;;  %v3942_v7 = vld [vmem:[%s5088_s15 + $0x38] sm:$0xff]  }
 0x56f   :  { %2699 = vmatpush1.bf16.msra.mxu0 %v3932_v8  ;;  %3615 = vmatprep.subr.bf16.mxu1 %v3979_v0  ;;  %v3214_v8 = vld [vmem:[%s5084_s14 + $0x4] sm:$0xf] }
 0x604   :  { %v2069_v14 = vpop.f32.mrb[28].mxu1  ;;  %v2110_v15 = vpop.f32.mrb[32].mxu0 }
 0x605   :  { %v2070_v19 = vadd.f32 %v2069_v14, %v4829_v16  ;;  %v2111_v20 = vadd.f32 %v2110_v15, %v4777_v50  ;;  %v2071_v21 = vpop.f32.mrb[29].mxu1  ;;  %v2112_v22 = vpop.f32.mrb[33].mxu0  ;;  %v2134_v16 = vrot.slane %v2117_v11, %v2133_v26  ;;  %v2129_v50 = vsub.s32 2, %v4275_v9 }
 0x606   :  { %v2072_v23 = vadd.f32 %v2071_v21, %v4831_v17  ;;  %v2113_v24 = vadd.f32 %v2112_v22, %v4779_v51  ;;  %v2073_v27 = vpop.f32.mrb[30].mxu1  ;;  %v2114_v28 = vpop.f32.mrb[34].mxu0  ;;  %v2735_v15 = vrot.slane %v3214_v8, %v2125_v12 }
 0x607   :  { %v2139_v29 = vadd.f32 %v2122_v13, %v2070_v19  ;;  %v2074_v30 = vpop.f32.mrb[31].mxu1  ;;  %v2115_v31 = vpop.f32.mrb[35].mxu0  ;;  %v2130_v51 = vrot.slane %v2117_v11, %v2129_v50  ;;  %v2731_v11 = vrot.slane %v3214_v8, %v2121_v10  ;;  %v2743_v10 = vrot.slane %v3214_v8, %v2133_v26  ;;  %v3085_v26 = vld [vmem:[%s5085_s2 + $0x8] sm:$0xff] }
 0x608   :  { %v2140_v34 = vadd.f32 %v2126_v18, %v2072_v23  ;;  %v2142_v17 = vadd.f32 %v2134_v16, %v2113_v24 }
 0x609   :  { %v3081_v32 = vmul.f32 -1.442695, %v2139_v29  ;;  %v2141_v35 = vadd.f32 %v2130_v51, %v2111_v20 }
 0x60a   :  { %v3082_v33 = vmul.f32 -1.442695, %v2140_v34  ;;  %v3083_v25 = vmul.f32 -1.442695, %v2142_v17 }
 0x60b   :  { %3947 = vpow2.f32 %v3081_v32  ;;  %v2739_v32 = vrot.slane %v3214_v8, %v2129_v50 }
 0x60c   :  { %3949 = vpow2.f32 %v3082_v33 }
 0x60d   :  { %3951 = vpow2.f32 %v3083_v25 }
 0x60e   :  { %3953 = vtanh.f32 %v2141_v35 }
 0x615   :  { %v3948_v36 = vpop.eup %3947 }
 0x616   :  { %v3950_v37 = vpop.eup %3949  ;;  %v2149_v38 = vadd.f32 1.0, %v3948_v36 }
 0x617   :  { %v2150_v39 = vadd.f32 1.0, %v3950_v37  ;;  %v3952_v40 = vpop.eup %3951 }
 0x618   :  { %3955 = vrcp.f32 %v2149_v38  ;;  %v3954_v41 = vpop.eup %3953  ;;  %v2159_v46 = vadd.f32 1.0, %v3952_v40 }
 0x619   :  { %3957 = vrcp.f32 %v2150_v39 }
 0x61a   :  { %3959 = vrcp.f32 %v2159_v46  ;;  %v3220_v46 = vld [vmem:[%s5089_s16] ss:$0 sm:$0xff] }
 0x622   :  { %v3956_v43 = vpop.eup %3955 }
 0x623   :  { %v3958_v44 = vpop.eup %3957  ;;  %v2163_v45 = vmul.f32 %v3956_v43, %v3954_v41 }
 0x624   :  { %v2162_v55 = vmul.f32 %v3958_v44, %v1566_v42  ;;  %v3960_v48 = vpop.eup %3959  ;;  %v2435_v54 = vpop.f32.mrb[32].mxu1 }
 0x625   :  { %v2437_v56 = vpop.f32.mrb[33].mxu1  ;;  %v2476_v59 = vpop.f32.mrb[36].mxu0 }
 0x626   :  { %v2164_v47 = vadd.f32 %v2163_v45, %v2162_v55  ;;  %v2439_v57 = vpop.f32.mrb[34].mxu1  ;;  %v2478_v60 = vpop.f32.mrb[37].mxu0 }
 0x627   :  { %v2440_v58 = vpop.f32.mrb[35].mxu1  ;;  %v2480_v61 = vpop.f32.mrb[38].mxu0 }
 0x628   :  { %2168 = vst [vmem:[%s5086_s19] sm:$0xff] %v2164_v47  ;;  %3961 = vtanh.f32 %v2164_v47  ;;  %v2481_v62 = vpop.f32.mrb[39].mxu0 }
 0x632   :  { %v3962_v49 = vpop.eup %3961 }
 0x633   :  { %v2166_v52 = vmul.f32 %v3962_v49, %v3960_v48 }
 0x635   :  { %2167 = vst [vmem:[%s5087_s18] sm:$0xff] %v2166_v52  ;;  %v2173_v53 = vpack.c.bf16 %v2166_v52, %v2166_v52 }
 0x637   :  { %2676 = vmatmul.mubr.bf16.vlgmr.msra.gmra.mrb[36].mxu1 %v2173_v53  ;;  %2717 = vmatmul.mubr.bf16.vlgmr.msra.gmra.mrb[40].mxu0 %v2173_v53 }
 0x638   :  { %3631 = vmatprep.mubr.msk.bf16.mxu1 %vm3980_vm0, %v3979_v0  ;;  %3616 = vmatpush3.bf16.msra.mxu1 %v3935_v63 }
 0x639   :  { %3617 = vmatprep.subr.bf16.mxu1 %v3979_v0 }
 0x63c   :  { %3618 = vmatpush3.bf16.msra.mxu1 %v3936_v1 }
 0x63d   :  { %3619 = vmatprep.subr.bf16.mxu1 %v3979_v0 }
 0x640   :  { %3620 = vmatpush3.bf16.msra.mxu1 %v3937_v2 }
 0x641   :  { %3621 = vmatprep.subr.bf16.mxu1 %v3979_v0 }
 0x644   :  { %3622 = vmatpush3.bf16.msra.mxu1 %v3938_v3 }
 0x645   :  { %3623 = vmatprep.subr.bf16.mxu1 %v3979_v0 }
 0x648   :  { %3624 = vmatpush3.bf16.msra.mxu1 %v3939_v4 }
 0x649   :  { %3625 = vmatprep.subr.bf16.mxu1 %v3979_v0 }
 0x64c   :  { %3626 = vmatpush3.bf16.msra.mxu1 %v3940_v5 }
 0x64d   :  { %3627 = vmatprep.subr.bf16.mxu1 %v3979_v0 }
 0x650   :  { %3628 = vmatpush3.bf16.msra.mxu1 %v3941_v6 }
 0x651   :  { %3629 = vmatprep.subr.bf16.mxu1 %v3979_v0 }
 0x654   :  { %3630 = vmatpush3.bf16.msra.mxu1 %v3942_v7 }
 0x70a   :  { %v2677_v13 = vpop.f32.mrb[36].mxu1  ;;  %v2718_v14 = vpop.f32.mrb[40].mxu0 }
 0x70b   :  { %v2678_v18 = vadd.f32 %v2677_v13, %v2435_v54  ;;  %v2719_v19 = vadd.f32 %v2718_v14, %v2476_v59  ;;  %v2679_v20 = vpop.f32.mrb[37].mxu1  ;;  %v2720_v21 = vpop.f32.mrb[41].mxu0 }
 0x70c   :  { %v2680_v22 = vadd.f32 %v2679_v20, %v2437_v56  ;;  %v2721_v23 = vadd.f32 %v2720_v21, %v2478_v60  ;;  %v2681_v0 = vpop.f32.mrb[38].mxu1  ;;  %v2722_v24 = vpop.f32.mrb[42].mxu0 }
 0x70d   :  { %v2748_v27 = vadd.f32 %v2731_v11, %v2678_v18  ;;  %v2682_v28 = vpop.f32.mrb[39].mxu1  ;;  %v2723_v29 = vpop.f32.mrb[43].mxu0  ;;  %v2750_v16 = vadd.f32 %v2739_v32, %v2719_v19 }
 0x70e   :  { %v2749_v30 = vadd.f32 %v2735_v15, %v2680_v22  ;;  %v2751_v12 = vadd.f32 %v2743_v10, %v2721_v23 }
 0x70f   :  { %v3215_v31 = vmul.f32 -1.442695, %v2748_v27 }
 0x710   :  { %v3216_v34 = vmul.f32 -1.442695, %v2749_v30  ;;  %v3217_v33 = vmul.f32 -1.442695, %v2751_v12 }
 0x711   :  { %3963 = vpow2.f32 %v3215_v31 }
 0x712   :  { %3965 = vpow2.f32 %v3216_v34 }
 0x713   :  { %3967 = vpow2.f32 %v3217_v33 }
 0x714   :  { %3969 = vtanh.f32 %v2750_v16 }
 0x71b   :  { %v3964_v17 = vpop.eup %3963 }
 0x71c   :  { %v3966_v51 = vpop.eup %3965  ;;  %v2758_v25 = vadd.f32 1.0, %v3964_v17 }
 0x71d   :  { %v2759_v35 = vadd.f32 1.0, %v3966_v51  ;;  %v3968_v36 = vpop.eup %3967 }
 0x71e   :  { %3971 = vrcp.f32 %v2758_v25  ;;  %v3970_v37 = vpop.eup %3969  ;;  %v2768_v50 = vadd.f32 1.0, %v3968_v36 }
 0x71f   :  { %3973 = vrcp.f32 %v2759_v35 }
 0x720   :  { %3975 = vrcp.f32 %v2768_v50 }
 0x728   :  { %v3972_v38 = vpop.eup %3971 }
 0x729   :  { %v3974_v39 = vpop.eup %3973  ;;  %v2772_v9 = vmul.f32 %v3972_v38, %v3970_v37 }
 0x72a   :  { %v2771_v40 = vmul.f32 %v3974_v39, %v3085_v26  ;;  %v3976_v42 = vpop.eup %3975 }
 0x72c   :  { %v2773_v41 = vadd.f32 %v2772_v9, %v2771_v40 }
 0x72e   :  { %3219 = vst [vmem:[%s5086_s19 + $0x8] sm:$0xff] %v2773_v41  ;;  %3977 = vtanh.f32 %v2773_v41 }
 0x738   :  { %v3978_v43 = vpop.eup %3977 }
 0x739   :  { %v2775_v44 = vmul.f32 %v3978_v43, %v3976_v42 }
 0x73b   :  { %3218 = vst [vmem:[%s5087_s18 + $0x8] sm:$0xff] %v2775_v44  ;;  %v2780_v45 = vpack.c.bf16 %v2775_v44, %v2775_v44 }
 0x73d   :  { %3632 = vmatmul.mubr.bf16.vlgmr.msra.gmra.mrb[40].mxu1 %v2780_v45 }
 0x810   :  { %v2886_v55 = vpop.f32.mrb[40].mxu1 }
 0x811   :  { %v2887_v47 = vadd.f32 %v3220_v46, %v2886_v55  ;;  %v3633_v48 = vpop.f32.mrb[41].mxu1 }
 0x812   :  { %v2889_v49 = vpop.f32.mrb[42].mxu1 }
 0x813   :  { %v2892_v52 = vmax.f32 %v2887_v47, 0.0  ;;  %v3634_v53 = vpop.f32.mrb[43].mxu1 }
 0x815   :  { %2893 = vst [vmem:[%s5090_s17] sm:$0xff] %v2892_v52 }

</bundles_post_ra>
